<compile_context>
chip_gen: v6e
topology: v6e:2x2x1
jax: 0.10.0
libtpu: 0.0.40
codegen_flags: <defaults>
</compile_context>

<pallas_src>
import functools

import jax
import jax.numpy as jnp
from jax import lax
from jax.experimental import pallas as pl
from jax.experimental.pallas import tpu as pltpu


C1_IN, C1_OUT, C2_OUT = 5, 16, 32
B_TILE = 16            # images per grid step (stage-1 matmul M = B_TILE * H)


def _round_up(x, m):
    return (x + m - 1) // m * m


# ------------------------------ Pallas kernel -------------------------------

def cnn_pa_kernel(x_ref, w1_ref, b1_ref, sd1_ref, su1_ref, p1_ref,
                  w2_ref, b2_ref, sd2_ref, su2_ref, p2_ref,
                  wf_ref, bf_ref, o_ref, *, B, H4, nclass):
    f32, bf16 = jnp.float32, jnp.bfloat16

    # -------- stage 1: conv(5->16, 3x3, pad 1) + BN + ReLU + 2x2 max-pool ----
    xs = x_ref[...]                                          # (B*H1, K1p) bf16
    x_dn = jnp.dot(sd1_ref[...], xs, preferred_element_type=f32).astype(bf16)
    x_up = jnp.dot(su1_ref[...], xs, preferred_element_type=f32).astype(bf16)
    acc = jnp.dot(x_dn, w1_ref[0], preferred_element_type=f32)
    acc = acc + jnp.dot(xs, w1_ref[1], preferred_element_type=f32)
    acc = acc + jnp.dot(x_up, w1_ref[2], preferred_element_type=f32)
    y = jnp.maximum(acc + b1_ref[...], 0.0)                  # (B*H1, W1*C1o)
    h = y.shape[1] // 2                                      # even cols first
    yh = jnp.maximum(y[:, :h], y[:, h:]).astype(bf16)        # horizontal 2-max
    z = jnp.dot(p1_ref[...], yh, preferred_element_type=f32)  # row selection
    m = z.shape[0] // 2
    x2 = jnp.maximum(z[:m], z[m:]).astype(bf16)              # (B*H2, W2*C1o)

    # -------- stage 2: conv(16->32, 3x3, pad 1) + BN + ReLU + 2x2 max-pool ---
    x2_dn = jnp.dot(sd2_ref[...], x2, preferred_element_type=f32).astype(bf16)
    x2_up = jnp.dot(su2_ref[...], x2, preferred_element_type=f32).astype(bf16)
    acc2 = jnp.dot(x2_dn, w2_ref[0], preferred_element_type=f32)
    acc2 = acc2 + jnp.dot(x2, w2_ref[1], preferred_element_type=f32)
    acc2 = acc2 + jnp.dot(x2_up, w2_ref[2], preferred_element_type=f32)
    y2 = jnp.maximum(acc2 + b2_ref[...], 0.0)                # (B*H2, W2*C2o)
    h2 = y2.shape[1] // 2
    yh2 = jnp.maximum(y2[:, :h2], y2[:, h2:]).astype(bf16)
    z2 = jnp.dot(p2_ref[...], yh2, preferred_element_type=f32)
    m2 = z2.shape[0] // 2
    x3 = jnp.maximum(z2[:m2], z2[m2:]).astype(bf16)          # (H4*B, W4*C2o)

    # -------- fully connected ------------------------------------------------
    accf = jnp.zeros((B, nclass), f32)
    for r4 in range(H4):                                     # static, unrolled
        accf = accf + jnp.dot(x3[r4 * B:(r4 + 1) * B, :], wf_ref[r4],
                              preferred_element_type=f32)
    o_ref[...] = accf + bf_ref[...]


# --------------------------- constant construction --------------------------

def _fold_bn(w, b, gamma, beta, mean, var, eps=1e-5):
    # TODO(synk): BatchNorm uses running statistics (eval-mode semantics);
    #             train-mode batch statistics are not computed.
    scale = gamma * lax.rsqrt(var + eps)
    return w * scale[:, None, None, None], beta + scale * (b - mean)


def _banded_conv_weights(w, bias, W, k_pad):
    """(Cout,Cin,3,3) BN-folded weights -> (3, k_pad, W*Cout) bf16 banded
    weights (horizontal 'same' padding folded in as zeros, output columns
    parity-ordered: even output column first) + (1, W*Cout) f32 bias row."""
    cout, cin = w.shape[0], w.shape[1]
    wt = jnp.transpose(w, (2, 3, 1, 0))                      # (ki, kj, Cin, Cout)
    ji = jnp.arange(W)[:, None]                              # input column
    jo = jnp.arange(W)[None, :]                              # output column
    kj = ji - jo + 1                                         # horizontal tap
    valid = (kj >= 0) & (kj <= 2)
    band = wt[:, jnp.clip(kj, 0, 2), :, :]                   # (3, ji, jo, Cin, Cout)
    band = band * valid[None, :, :, None, None].astype(band.dtype)
    band = jnp.transpose(band, (0, 1, 3, 2, 4))              # (3, ji, Cin, jo, Cout)
    perm = jnp.concatenate([jnp.arange(0, W, 2), jnp.arange(1, W, 2)])
    band = band[:, :, :, perm, :]                            # even jo first
    band = band.reshape(3, W * cin, W * cout)
    band = jnp.pad(band, ((0, 0), (0, k_pad - W * cin), (0, 0)))
    bias_row = jnp.tile(bias, W).reshape(1, W * cout)
    return band.astype(jnp.bfloat16), bias_row.astype(jnp.float32)


def _vshift_mats(B, H):
    """Block-diagonal 0/1 shift matrices (B*H, B*H): sd supplies input row r-1
    at output row r (zero at each image's first row), su supplies row r+1."""
    n = B * H
    i = jnp.arange(n)[:, None]
    j = jnp.arange(n)[None, :]
    r = i % H
    sd = ((j == i - 1) & (r > 0)).astype(jnp.bfloat16)
    su = ((j == i + 1) & (r < H - 1)).astype(jnp.bfloat16)
    return sd, su


def _vpool_mat(B, H, spatial_major):
    """(2*B*(H//2), B*H) 0/1 selection matrix: top half picks even source rows
    of each image, bottom half the odd rows; the vertical 2-max is the max of
    the two halves of the product.  spatial_major orders output rows (r, b)
    instead of (b, r) (used before the FC so its slices are aligned)."""
    hh = H // 2
    o = jnp.arange(B * hh)
    if spatial_major:
        rp, b = o // B, o % B
    else:
        b, rp = o // hh, o % hh
    src = b * H + 2 * rp
    src = jnp.concatenate([src, src + 1])
    cols = jnp.arange(B * H)[None, :]
    return (cols == src[:, None]).astype(jnp.bfloat16)


# ------------------------------- forward -----------------------------------

def make_forward(params, img_size, num_class, b_tile=B_TILE):
    """Precomputes all kernel constants once and returns a jitted forward."""
    assert img_size % 4 == 0, "MaxPool2d(2,2) x2 path assumes img_size % 4 == 0"
    H1 = W1 = img_size
    H2, W2 = H1 // 2, W1 // 2
    H4, W4 = H1 // 4, W1 // 4
    k1p = _round_up(W1 * C1_IN, 128)

    w1s, bias1 = _fold_bn(params["w1"], params["b1"], params["g1"],
                          params["be1"], params["m1"], params["v1"])
    w2s, bias2 = _fold_bn(params["w2"], params["b2"], params["g2"],
                          params["be2"], params["m2"], params["v2"])
    wb1, b1row = _banded_conv_weights(w1s, bias1, W1, k1p)
    wb2, b2row = _banded_conv_weights(w2s, bias2, W2, W2 * C1_OUT)
    sd1, su1 = _vshift_mats(b_tile, H1)
    sd2, su2 = _vshift_mats(b_tile, H2)
    p1 = _vpool_mat(b_tile, H1, spatial_major=False)   # rows ordered (b, r2)
    p2 = _vpool_mat(b_tile, H2, spatial_major=True)    # rows ordered (r4, b)
    wf = jnp.transpose(params["wf"].reshape(num_class, C2_OUT, H4, W4),
                       (2, 3, 1, 0)).reshape(H4, W4 * C2_OUT, num_class)
    wf = wf.astype(jnp.bfloat16)
    bf = params["bf"].reshape(1, num_class).astype(jnp.float32)
    consts = (wb1, b1row, sd1, su1, p1, wb2, b2row, sd2, su2, p2, wf, bf)

    kernel = functools.partial(cnn_pa_kernel, B=b_tile, H4=H4,
                               nclass=num_class)

    def _const_spec(a):
        return pl.BlockSpec(a.shape, lambda n, _nd=a.ndim: (0,) * _nd)

    @jax.jit
    def forward(x_nchw):
        n = x_nchw.shape[0]
        n_pad = _round_up(n, b_tile)
        x = x_nchw.astype(jnp.bfloat16)              # bf16 before layout work
        if n_pad != n:
            x = jnp.pad(x, ((0, n_pad - n), (0, 0), (0, 0), (0, 0)))
        x = jnp.transpose(x, (0, 2, 3, 1))           # NCHW -> NHWC
        x = x.reshape(n_pad * H1, W1 * C1_IN)        # stacked image rows
        x = jnp.pad(x, ((0, 0), (0, k1p - W1 * C1_IN)))
        steps = n_pad // b_tile
        out = pl.pallas_call(
            kernel,
            out_shape=jax.ShapeDtypeStruct((n_pad, num_class), jnp.float32),
            grid=(steps,),
            in_specs=[pl.BlockSpec((b_tile * H1, k1p), lambda i: (i, 0))]
                     + [_const_spec(c) for c in consts],
            out_specs=pl.BlockSpec((b_tile, num_class), lambda i: (i, 0)),
            compiler_params=pltpu.CompilerParams(
                dimension_semantics=("parallel",)),
        )(x, *consts)
        return out[:n]

    return forward


# ----------------------------- reference & init ------------------------------

def reference_forward(x, params, eps=1e-5):
    """Pure-JAX f32 reference of the PyTorch module (eval-mode BatchNorm)."""
    def stage(x, w, b, g, be, m, v):
        y = lax.conv_general_dilated(
            x, w, window_strides=(1, 1), padding=((1, 1), (1, 1)),
            dimension_numbers=("NCHW", "OIHW", "NCHW"))
        y = y + b[None, :, None, None]
        s = g * lax.rsqrt(v + eps)
        y = (y - m[None, :, None, None]) * s[None, :, None, None] \
            + be[None, :, None, None]
        y = jnp.maximum(y, 0.0)
        return lax.reduce_window(y, -jnp.inf, lax.max,
                                 (1, 1, 2, 2), (1, 1, 2, 2), "VALID")

    y = stage(x, params["w1"], params["b1"], params["g1"], params["be1"],
              params["m1"], params["v1"])
    y = stage(y, params["w2"], params["b2"], params["g2"], params["be2"],
              params["m2"], params["v2"])
    y = y.reshape(y.shape[0], -1)
    return y @ params["wf"].T + params["bf"]


def init_params(key, img_size, num_class):
    ks = jax.random.split(key, 14)
    f = img_size // 4
    feat = 32 * f * f
    return {
        "w1": jax.random.normal(ks[0], (16, 5, 3, 3), jnp.float32) * 0.1,
        "b1": jax.random.normal(ks[1], (16,), jnp.float32) * 0.1,
        "g1": 1.0 + 0.1 * jax.random.normal(ks[2], (16,), jnp.float32),
        "be1": 0.1 * jax.random.normal(ks[3], (16,), jnp.float32),
        "m1": 0.1 * jax.random.normal(ks[4], (16,), jnp.float32),
        "v1": 0.5 + jax.random.uniform(ks[5], (16,), jnp.float32),
        "w2": jax.random.normal(ks[6], (32, 16, 3, 3), jnp.float32) * 0.1,
        "b2": jax.random.normal(ks[7], (32,), jnp.float32) * 0.1,
        "g2": 1.0 + 0.1 * jax.random.normal(ks[8], (32,), jnp.float32),
        "be2": 0.1 * jax.random.normal(ks[9], (32,), jnp.float32),
        "m2": 0.1 * jax.random.normal(ks[10], (32,), jnp.float32),
        "v2": 0.5 + jax.random.uniform(ks[11], (32,), jnp.float32),
        "wf": jax.random.normal(ks[12], (num_class, feat), jnp.float32) * 0.05,
        "bf": jax.random.normal(ks[13], (num_class,), jnp.float32) * 0.05,
    }


if __name__ == "__main__":
    img_size, num_class, batch = 16, 10, 32

    key = jax.random.PRNGKey(0)
    kx, kp = jax.random.split(key)
    x = jax.random.normal(kx, (batch, 5, img_size, img_size), jnp.float32)
    params = init_params(kp, img_size, num_class)

    forward = make_forward(params, img_size, num_class)
    out = forward(x)
    jax.block_until_ready(out)
    assert out.shape == (batch, num_class), out.shape

    ref = reference_forward(x, params)
    err = float(jnp.max(jnp.abs(out - ref)))
    assert err < 0.3, f"max abs error vs f32 reference: {err}"
    print("KERNEL_OK")
</pallas_src>

<mosaic_0001>
module attributes {stable_mosaic.version = 11 : i64} {
  func.func @cnn_pa_kernel(%arg0: i32, %arg1: memref<256x128xbf16, #tpu.memory_space<vmem>>, %arg2: memref<3x128x256xbf16, #tpu.memory_space<vmem>>, %arg3: memref<1x256xf32, #tpu.memory_space<vmem>>, %arg4: memref<256x256xbf16, #tpu.memory_space<vmem>>, %arg5: memref<256x256xbf16, #tpu.memory_space<vmem>>, %arg6: memref<256x256xbf16, #tpu.memory_space<vmem>>, %arg7: memref<3x128x256xbf16, #tpu.memory_space<vmem>>, %arg8: memref<1x256xf32, #tpu.memory_space<vmem>>, %arg9: memref<128x128xbf16, #tpu.memory_space<vmem>>, %arg10: memref<128x128xbf16, #tpu.memory_space<vmem>>, %arg11: memref<128x128xbf16, #tpu.memory_space<vmem>>, %arg12: memref<4x128x10xbf16, #tpu.memory_space<vmem>>, %arg13: memref<1x10xf32, #tpu.memory_space<vmem>>, %arg14: memref<16x10xf32, #tpu.memory_space<vmem>>) attributes {dimension_semantics = [#tpu.dimension_semantics<parallel>], iteration_bounds = array<i64: 2>, scalar_prefetch = 0 : i64, scratch_operands = 0 : i64, tpu.core_type = #tpu.core_type<tc>, window_params = [{transform_indices = @transform_0, window_bounds = array<i64: 256, 128>}, {pipeline_mode = #tpu.pipeline_mode<synchronous>, transform_indices = @transform_1, window_bounds = array<i64: 3, 128, 256>}, {pipeline_mode = #tpu.pipeline_mode<synchronous>, transform_indices = @transform_2, window_bounds = array<i64: 1, 256>}, {pipeline_mode = #tpu.pipeline_mode<synchronous>, transform_indices = @transform_3, window_bounds = array<i64: 256, 256>}, {pipeline_mode = #tpu.pipeline_mode<synchronous>, transform_indices = @transform_4, window_bounds = array<i64: 256, 256>}, {pipeline_mode = #tpu.pipeline_mode<synchronous>, transform_indices = @transform_5, window_bounds = array<i64: 256, 256>}, {pipeline_mode = #tpu.pipeline_mode<synchronous>, transform_indices = @transform_6, window_bounds = array<i64: 3, 128, 256>}, {pipeline_mode = #tpu.pipeline_mode<synchronous>, transform_indices = @transform_7, window_bounds = array<i64: 1, 256>}, {pipeline_mode = #tpu.pipeline_mode<synchronous>, transform_indices = @transform_8, window_bounds = array<i64: 128, 128>}, {pipeline_mode = #tpu.pipeline_mode<synchronous>, transform_indices = @transform_9, window_bounds = array<i64: 128, 128>}, {pipeline_mode = #tpu.pipeline_mode<synchronous>, transform_indices = @transform_10, window_bounds = array<i64: 128, 128>}, {pipeline_mode = #tpu.pipeline_mode<synchronous>, transform_indices = @transform_11, window_bounds = array<i64: 4, 128, 10>}, {pipeline_mode = #tpu.pipeline_mode<synchronous>, transform_indices = @transform_12, window_bounds = array<i64: 1, 10>}, {transform_indices = @transform_13, window_bounds = array<i64: 16, 10>}]} {
    %c0 = arith.constant 0 : index
    %c0_0 = arith.constant 0 : index
    %0 = vector.load %arg1[%c0, %c0_0] : memref<256x128xbf16, #tpu.memory_space<vmem>>, vector<256x128xbf16>
    %c0_1 = arith.constant 0 : index
    %c0_2 = arith.constant 0 : index
    %1 = vector.load %arg4[%c0_1, %c0_2] : memref<256x256xbf16, #tpu.memory_space<vmem>>, vector<256x256xbf16>
    %cst = arith.constant dense<0.000000e+00> : vector<256x128xf32>
    %2 = tpu.matmul %1, %0, %cst {dimension_numbers = #tpu.dot_dimension_numbers<[1], [0], [0], [1], [0, 0, 1, 1], [], []>} : vector<256x256xbf16>, vector<256x128xbf16>, vector<256x128xf32> -> vector<256x128xf32>
    %3 = arith.truncf %2 : vector<256x128xf32> to vector<256x128xbf16>
    %c0_3 = arith.constant 0 : index
    %c0_4 = arith.constant 0 : index
    %4 = vector.load %arg5[%c0_3, %c0_4] : memref<256x256xbf16, #tpu.memory_space<vmem>>, vector<256x256xbf16>
    %cst_5 = arith.constant dense<0.000000e+00> : vector<256x128xf32>
    %5 = tpu.matmul %4, %0, %cst_5 {dimension_numbers = #tpu.dot_dimension_numbers<[1], [0], [0], [1], [0, 0, 1, 1], [], []>} : vector<256x256xbf16>, vector<256x128xbf16>, vector<256x128xf32> -> vector<256x128xf32>
    %6 = arith.truncf %5 : vector<256x128xf32> to vector<256x128xbf16>
    %c0_6 = arith.constant 0 : index
    %c0_7 = arith.constant 0 : index
    %c0_8 = arith.constant 0 : index
    %7 = vector.load %arg2[%c0_6, %c0_7, %c0_8] : memref<3x128x256xbf16, #tpu.memory_space<vmem>>, vector<1x128x256xbf16>
    %8 = vector.shape_cast %7 : vector<1x128x256xbf16> to vector<128x256xbf16>
    %cst_9 = arith.constant dense<0.000000e+00> : vector<256x256xf32>
    %9 = tpu.matmul %3, %8, %cst_9 {dimension_numbers = #tpu.dot_dimension_numbers<[1], [0], [0], [1], [0, 0, 1, 1], [], []>} : vector<256x128xbf16>, vector<128x256xbf16>, vector<256x256xf32> -> vector<256x256xf32>
    %c1 = arith.constant 1 : index
    %c0_10 = arith.constant 0 : index
    %c0_11 = arith.constant 0 : index
    %10 = vector.load %arg2[%c1, %c0_10, %c0_11] : memref<3x128x256xbf16, #tpu.memory_space<vmem>>, vector<1x128x256xbf16>
    %11 = vector.shape_cast %10 : vector<1x128x256xbf16> to vector<128x256xbf16>
    %cst_12 = arith.constant dense<0.000000e+00> : vector<256x256xf32>
    %12 = tpu.matmul %0, %11, %cst_12 {dimension_numbers = #tpu.dot_dimension_numbers<[1], [0], [0], [1], [0, 0, 1, 1], [], []>} : vector<256x128xbf16>, vector<128x256xbf16>, vector<256x256xf32> -> vector<256x256xf32>
    %13 = arith.addf %9, %12 : vector<256x256xf32>
    %c2 = arith.constant 2 : index
    %c0_13 = arith.constant 0 : index
    %c0_14 = arith.constant 0 : index
    %14 = vector.load %arg2[%c2, %c0_13, %c0_14] : memref<3x128x256xbf16, #tpu.memory_space<vmem>>, vector<1x128x256xbf16>
    %15 = vector.shape_cast %14 : vector<1x128x256xbf16> to vector<128x256xbf16>
    %cst_15 = arith.constant dense<0.000000e+00> : vector<256x256xf32>
    %16 = tpu.matmul %6, %15, %cst_15 {dimension_numbers = #tpu.dot_dimension_numbers<[1], [0], [0], [1], [0, 0, 1, 1], [], []>} : vector<256x128xbf16>, vector<128x256xbf16>, vector<256x256xf32> -> vector<256x256xf32>
    %17 = arith.addf %13, %16 : vector<256x256xf32>
    %c0_16 = arith.constant 0 : index
    %c0_17 = arith.constant 0 : index
    %18 = vector.load %arg3[%c0_16, %c0_17] : memref<1x256xf32, #tpu.memory_space<vmem>>, vector<1x256xf32>
    %19 = vector.broadcast %18 : vector<1x256xf32> to vector<256x256xf32>
    %20 = arith.addf %17, %19 : vector<256x256xf32>
    %cst_18 = arith.constant 0.000000e+00 : f32
    %21 = vector.broadcast %cst_18 : f32 to vector<256x256xf32>
    %22 = arith.maximumf %20, %21 : vector<256x256xf32>
    %23 = vector.extract_strided_slice %22 {offsets = [0, 0], sizes = [256, 128], strides = [1, 1]} : vector<256x256xf32> to vector<256x128xf32>
    %24 = vector.extract_strided_slice %22 {offsets = [0, 128], sizes = [256, 128], strides = [1, 1]} : vector<256x256xf32> to vector<256x128xf32>
    %25 = arith.maximumf %23, %24 : vector<256x128xf32>
    %26 = arith.truncf %25 : vector<256x128xf32> to vector<256x128xbf16>
    %c0_19 = arith.constant 0 : index
    %c0_20 = arith.constant 0 : index
    %27 = vector.load %arg6[%c0_19, %c0_20] : memref<256x256xbf16, #tpu.memory_space<vmem>>, vector<256x256xbf16>
    %cst_21 = arith.constant dense<0.000000e+00> : vector<256x128xf32>
    %28 = tpu.matmul %27, %26, %cst_21 {dimension_numbers = #tpu.dot_dimension_numbers<[1], [0], [0], [1], [0, 0, 1, 1], [], []>} : vector<256x256xbf16>, vector<256x128xbf16>, vector<256x128xf32> -> vector<256x128xf32>
    %29 = vector.extract_strided_slice %28 {offsets = [0, 0], sizes = [128, 128], strides = [1, 1]} : vector<256x128xf32> to vector<128x128xf32>
    %30 = vector.extract_strided_slice %28 {offsets = [128, 0], sizes = [128, 128], strides = [1, 1]} : vector<256x128xf32> to vector<128x128xf32>
    %31 = arith.maximumf %29, %30 : vector<128x128xf32>
    %32 = arith.truncf %31 : vector<128x128xf32> to vector<128x128xbf16>
    %c0_22 = arith.constant 0 : index
    %c0_23 = arith.constant 0 : index
    %33 = vector.load %arg9[%c0_22, %c0_23] : memref<128x128xbf16, #tpu.memory_space<vmem>>, vector<128x128xbf16>
    %cst_24 = arith.constant dense<0.000000e+00> : vector<128x128xf32>
    %34 = tpu.matmul %33, %32, %cst_24 {dimension_numbers = #tpu.dot_dimension_numbers<[1], [0], [0], [1], [0, 0, 1, 1], [], []>} : vector<128x128xbf16>, vector<128x128xbf16>, vector<128x128xf32> -> vector<128x128xf32>
    %35 = arith.truncf %34 : vector<128x128xf32> to vector<128x128xbf16>
    %c0_25 = arith.constant 0 : index
    %c0_26 = arith.constant 0 : index
    %36 = vector.load %arg10[%c0_25, %c0_26] : memref<128x128xbf16, #tpu.memory_space<vmem>>, vector<128x128xbf16>
    %cst_27 = arith.constant dense<0.000000e+00> : vector<128x128xf32>
    %37 = tpu.matmul %36, %32, %cst_27 {dimension_numbers = #tpu.dot_dimension_numbers<[1], [0], [0], [1], [0, 0, 1, 1], [], []>} : vector<128x128xbf16>, vector<128x128xbf16>, vector<128x128xf32> -> vector<128x128xf32>
    %38 = arith.truncf %37 : vector<128x128xf32> to vector<128x128xbf16>
    %c0_28 = arith.constant 0 : index
    %c0_29 = arith.constant 0 : index
    %c0_30 = arith.constant 0 : index
    %39 = vector.load %arg7[%c0_28, %c0_29, %c0_30] : memref<3x128x256xbf16, #tpu.memory_space<vmem>>, vector<1x128x256xbf16>
    %40 = vector.shape_cast %39 : vector<1x128x256xbf16> to vector<128x256xbf16>
    %cst_31 = arith.constant dense<0.000000e+00> : vector<128x256xf32>
    %41 = tpu.matmul %35, %40, %cst_31 {dimension_numbers = #tpu.dot_dimension_numbers<[1], [0], [0], [1], [0, 0, 1, 1], [], []>} : vector<128x128xbf16>, vector<128x256xbf16>, vector<128x256xf32> -> vector<128x256xf32>
    %c1_32 = arith.constant 1 : index
    %c0_33 = arith.constant 0 : index
    %c0_34 = arith.constant 0 : index
    %42 = vector.load %arg7[%c1_32, %c0_33, %c0_34] : memref<3x128x256xbf16, #tpu.memory_space<vmem>>, vector<1x128x256xbf16>
    %43 = vector.shape_cast %42 : vector<1x128x256xbf16> to vector<128x256xbf16>
    %cst_35 = arith.constant dense<0.000000e+00> : vector<128x256xf32>
    %44 = tpu.matmul %32, %43, %cst_35 {dimension_numbers = #tpu.dot_dimension_numbers<[1], [0], [0], [1], [0, 0, 1, 1], [], []>} : vector<128x128xbf16>, vector<128x256xbf16>, vector<128x256xf32> -> vector<128x256xf32>
    %45 = arith.addf %41, %44 : vector<128x256xf32>
    %c2_36 = arith.constant 2 : index
    %c0_37 = arith.constant 0 : index
    %c0_38 = arith.constant 0 : index
    %46 = vector.load %arg7[%c2_36, %c0_37, %c0_38] : memref<3x128x256xbf16, #tpu.memory_space<vmem>>, vector<1x128x256xbf16>
    %47 = vector.shape_cast %46 : vector<1x128x256xbf16> to vector<128x256xbf16>
    %cst_39 = arith.constant dense<0.000000e+00> : vector<128x256xf32>
    %48 = tpu.matmul %38, %47, %cst_39 {dimension_numbers = #tpu.dot_dimension_numbers<[1], [0], [0], [1], [0, 0, 1, 1], [], []>} : vector<128x128xbf16>, vector<128x256xbf16>, vector<128x256xf32> -> vector<128x256xf32>
    %49 = arith.addf %45, %48 : vector<128x256xf32>
    %c0_40 = arith.constant 0 : index
    %c0_41 = arith.constant 0 : index
    %50 = vector.load %arg8[%c0_40, %c0_41] : memref<1x256xf32, #tpu.memory_space<vmem>>, vector<1x256xf32>
    %51 = vector.broadcast %50 : vector<1x256xf32> to vector<128x256xf32>
    %52 = arith.addf %49, %51 : vector<128x256xf32>
    %cst_42 = arith.constant 0.000000e+00 : f32
    %53 = vector.broadcast %cst_42 : f32 to vector<128x256xf32>
    %54 = arith.maximumf %52, %53 : vector<128x256xf32>
    %55 = vector.extract_strided_slice %54 {offsets = [0, 0], sizes = [128, 128], strides = [1, 1]} : vector<128x256xf32> to vector<128x128xf32>
    %56 = vector.extract_strided_slice %54 {offsets = [0, 128], sizes = [128, 128], strides = [1, 1]} : vector<128x256xf32> to vector<128x128xf32>
    %57 = arith.maximumf %55, %56 : vector<128x128xf32>
    %58 = arith.truncf %57 : vector<128x128xf32> to vector<128x128xbf16>
    %c0_43 = arith.constant 0 : index
    %c0_44 = arith.constant 0 : index
    %59 = vector.load %arg11[%c0_43, %c0_44] : memref<128x128xbf16, #tpu.memory_space<vmem>>, vector<128x128xbf16>
    %cst_45 = arith.constant dense<0.000000e+00> : vector<128x128xf32>
    %60 = tpu.matmul %59, %58, %cst_45 {dimension_numbers = #tpu.dot_dimension_numbers<[1], [0], [0], [1], [0, 0, 1, 1], [], []>} : vector<128x128xbf16>, vector<128x128xbf16>, vector<128x128xf32> -> vector<128x128xf32>
    %61 = vector.extract_strided_slice %60 {offsets = [0, 0], sizes = [64, 128], strides = [1, 1]} : vector<128x128xf32> to vector<64x128xf32>
    %62 = vector.extract_strided_slice %60 {offsets = [64, 0], sizes = [64, 128], strides = [1, 1]} : vector<128x128xf32> to vector<64x128xf32>
    %63 = arith.maximumf %61, %62 : vector<64x128xf32>
    %64 = arith.truncf %63 : vector<64x128xf32> to vector<64x128xbf16>
    %cst_46 = arith.constant 0.000000e+00 : f32
    %65 = vector.broadcast %cst_46 : f32 to vector<16x10xf32>
    %66 = vector.extract_strided_slice %64 {offsets = [0, 0], sizes = [16, 128], strides = [1, 1]} : vector<64x128xbf16> to vector<16x128xbf16>
    %c0_47 = arith.constant 0 : index
    %c0_48 = arith.constant 0 : index
    %c0_49 = arith.constant 0 : index
    %67 = vector.load %arg12[%c0_47, %c0_48, %c0_49] : memref<4x128x10xbf16, #tpu.memory_space<vmem>>, vector<1x128x10xbf16>
    %68 = vector.shape_cast %67 : vector<1x128x10xbf16> to vector<128x10xbf16>
    %cst_50 = arith.constant dense<0.000000e+00> : vector<16x10xf32>
    %69 = tpu.matmul %66, %68, %cst_50 {dimension_numbers = #tpu.dot_dimension_numbers<[1], [0], [0], [1], [0, 0, 1, 1], [], []>} : vector<16x128xbf16>, vector<128x10xbf16>, vector<16x10xf32> -> vector<16x10xf32>
    %70 = arith.addf %65, %69 : vector<16x10xf32>
    %71 = vector.extract_strided_slice %64 {offsets = [16, 0], sizes = [16, 128], strides = [1, 1]} : vector<64x128xbf16> to vector<16x128xbf16>
    %c1_51 = arith.constant 1 : index
    %c0_52 = arith.constant 0 : index
    %c0_53 = arith.constant 0 : index
    %72 = vector.load %arg12[%c1_51, %c0_52, %c0_53] : memref<4x128x10xbf16, #tpu.memory_space<vmem>>, vector<1x128x10xbf16>
    %73 = vector.shape_cast %72 : vector<1x128x10xbf16> to vector<128x10xbf16>
    %cst_54 = arith.constant dense<0.000000e+00> : vector<16x10xf32>
    %74 = tpu.matmul %71, %73, %cst_54 {dimension_numbers = #tpu.dot_dimension_numbers<[1], [0], [0], [1], [0, 0, 1, 1], [], []>} : vector<16x128xbf16>, vector<128x10xbf16>, vector<16x10xf32> -> vector<16x10xf32>
    %75 = arith.addf %70, %74 : vector<16x10xf32>
    %76 = vector.extract_strided_slice %64 {offsets = [32, 0], sizes = [16, 128], strides = [1, 1]} : vector<64x128xbf16> to vector<16x128xbf16>
    %c2_55 = arith.constant 2 : index
    %c0_56 = arith.constant 0 : index
    %c0_57 = arith.constant 0 : index
    %77 = vector.load %arg12[%c2_55, %c0_56, %c0_57] : memref<4x128x10xbf16, #tpu.memory_space<vmem>>, vector<1x128x10xbf16>
    %78 = vector.shape_cast %77 : vector<1x128x10xbf16> to vector<128x10xbf16>
    %cst_58 = arith.constant dense<0.000000e+00> : vector<16x10xf32>
    %79 = tpu.matmul %76, %78, %cst_58 {dimension_numbers = #tpu.dot_dimension_numbers<[1], [0], [0], [1], [0, 0, 1, 1], [], []>} : vector<16x128xbf16>, vector<128x10xbf16>, vector<16x10xf32> -> vector<16x10xf32>
    %80 = arith.addf %75, %79 : vector<16x10xf32>
    %81 = vector.extract_strided_slice %64 {offsets = [48, 0], sizes = [16, 128], strides = [1, 1]} : vector<64x128xbf16> to vector<16x128xbf16>
    %c3 = arith.constant 3 : index
    %c0_59 = arith.constant 0 : index
    %c0_60 = arith.constant 0 : index
    %82 = vector.load %arg12[%c3, %c0_59, %c0_60] : memref<4x128x10xbf16, #tpu.memory_space<vmem>>, vector<1x128x10xbf16>
    %83 = vector.shape_cast %82 : vector<1x128x10xbf16> to vector<128x10xbf16>
    %cst_61 = arith.constant dense<0.000000e+00> : vector<16x10xf32>
    %84 = tpu.matmul %81, %83, %cst_61 {dimension_numbers = #tpu.dot_dimension_numbers<[1], [0], [0], [1], [0, 0, 1, 1], [], []>} : vector<16x128xbf16>, vector<128x10xbf16>, vector<16x10xf32> -> vector<16x10xf32>
    %85 = arith.addf %80, %84 : vector<16x10xf32>
    %c0_62 = arith.constant 0 : index
    %c0_63 = arith.constant 0 : index
    %86 = vector.load %arg13[%c0_62, %c0_63] : memref<1x10xf32, #tpu.memory_space<vmem>>, vector<1x10xf32>
    %87 = vector.broadcast %86 : vector<1x10xf32> to vector<16x10xf32>
    %88 = arith.addf %85, %87 : vector<16x10xf32>
    %c0_64 = arith.constant 0 : index
    %c0_65 = arith.constant 0 : index
    %89 = vector.load %arg14[%c0_64, %c0_65] : memref<16x10xf32, #tpu.memory_space<vmem>>, vector<16x10xf32>
    tpu.vector_store %arg14[%c0_64, %c0_65], %88 {strides = array<i32>} : memref<16x10xf32, #tpu.memory_space<vmem>>, vector<16x10xf32>,
    return
  }
  func.func @transform_0(%arg0: i32) -> (i32, i32) {
    %c0_i32 = arith.constant 0 : i32
    %c0_i32_0 = arith.constant 0 : i32
    return %arg0, %c0_i32 : i32, i32
  }
  func.func @transform_1(%arg0: i32) -> (i32, i32, i32) {
    %c0_i32 = arith.constant 0 : i32
    %c0_i32_0 = arith.constant 0 : i32
    %c0_i32_1 = arith.constant 0 : i32
    %c0_i32_2 = arith.constant 0 : i32
    return %c0_i32, %c0_i32_0, %c0_i32_1 : i32, i32, i32
  }
  func.func @transform_2(%arg0: i32) -> (i32, i32) {
    %c0_i32 = arith.constant 0 : i32
    %c0_i32_0 = arith.constant 0 : i32
    %c0_i32_1 = arith.constant 0 : i32
    return %c0_i32, %c0_i32_0 : i32, i32
  }
  func.func @transform_3(%arg0: i32) -> (i32, i32) {
    %c0_i32 = arith.constant 0 : i32
    %c0_i32_0 = arith.constant 0 : i32
    %c0_i32_1 = arith.constant 0 : i32
    return %c0_i32, %c0_i32_0 : i32, i32
  }
  func.func @transform_4(%arg0: i32) -> (i32, i32) {
    %c0_i32 = arith.constant 0 : i32
    %c0_i32_0 = arith.constant 0 : i32
    %c0_i32_1 = arith.constant 0 : i32
    return %c0_i32, %c0_i32_0 : i32, i32
  }
  func.func @transform_5(%arg0: i32) -> (i32, i32) {
    %c0_i32 = arith.constant 0 : i32
    %c0_i32_0 = arith.constant 0 : i32
    %c0_i32_1 = arith.constant 0 : i32
    return %c0_i32, %c0_i32_0 : i32, i32
  }
  func.func @transform_6(%arg0: i32) -> (i32, i32, i32) {
    %c0_i32 = arith.constant 0 : i32
    %c0_i32_0 = arith.constant 0 : i32
    %c0_i32_1 = arith.constant 0 : i32
    %c0_i32_2 = arith.constant 0 : i32
    return %c0_i32, %c0_i32_0, %c0_i32_1 : i32, i32, i32
  }
  func.func @transform_7(%arg0: i32) -> (i32, i32) {
    %c0_i32 = arith.constant 0 : i32
    %c0_i32_0 = arith.constant 0 : i32
    %c0_i32_1 = arith.constant 0 : i32
    return %c0_i32, %c0_i32_0 : i32, i32
  }
  func.func @transform_8(%arg0: i32) -> (i32, i32) {
    %c0_i32 = arith.constant 0 : i32
    %c0_i32_0 = arith.constant 0 : i32
    %c0_i32_1 = arith.constant 0 : i32
    return %c0_i32, %c0_i32_0 : i32, i32
  }
  func.func @transform_9(%arg0: i32) -> (i32, i32) {
    %c0_i32 = arith.constant 0 : i32
    %c0_i32_0 = arith.constant 0 : i32
    %c0_i32_1 = arith.constant 0 : i32
    return %c0_i32, %c0_i32_0 : i32, i32
  }
  func.func @transform_10(%arg0: i32) -> (i32, i32) {
    %c0_i32 = arith.constant 0 : i32
    %c0_i32_0 = arith.constant 0 : i32
    %c0_i32_1 = arith.constant 0 : i32
    return %c0_i32, %c0_i32_0 : i32, i32
  }
  func.func @transform_11(%arg0: i32) -> (i32, i32, i32) {
    %c0_i32 = arith.constant 0 : i32
    %c0_i32_0 = arith.constant 0 : i32
    %c0_i32_1 = arith.constant 0 : i32
    %c0_i32_2 = arith.constant 0 : i32
    return %c0_i32, %c0_i32_0, %c0_i32_1 : i32, i32, i32
  }
  func.func @transform_12(%arg0: i32) -> (i32, i32) {
    %c0_i32 = arith.constant 0 : i32
    %c0_i32_0 = arith.constant 0 : i32
    %c0_i32_1 = arith.constant 0 : i32
    return %c0_i32, %c0_i32_0 : i32, i32
  }
  func.func @transform_13(%arg0: i32) -> (i32, i32) {
    %c0_i32 = arith.constant 0 : i32
    %c0_i32_0 = arith.constant 0 : i32
    return %arg0, %c0_i32 : i32, i32
  }
}

</mosaic_0001>

<bundles_post_ra>
// kernel: forward.1
= control target key start
LH: loop header
LB: loop body
LE: loop exit
PB: predicated region body
PF: predicated region fallthrough
CT: control target
= control target key end

     0   :  { %s6026_s25 = smov 0   ;;  %s7938_s0 = inlined_call_operand.vmem [shape: bf16[512,128], index: 0, kind: input, shape index: {}]   ;;  %s7939_s1 = inlined_call_operand.vmem [shape: bf16[3,128,256], index: 1, kind: input, shape index: {}]   ;;  %s7940_s2 = inlined_call_operand.vmem [shape: f32[1,256], index: 2, kind: input, shape index: {}]   ;;  %s7941_s3 = inlined_call_operand.vmem [shape: bf16[256,256], index: 3, kind: input, shape index: {}]   ;;  %s7942_s4 = inlined_call_operand.vmem [shape: bf16[256,256], index: 4, kind: input, shape index: {}]   ;;  %s7943_s5 = inlined_call_operand.vmem [shape: bf16[256,256], index: 5, kind: input, shape index: {}]   ;;  %s7944_s6 = inlined_call_operand.vmem [shape: bf16[3,128,256], index: 6, kind: input, shape index: {}]   ;;  %s7945_s7 = inlined_call_operand.vmem [shape: f32[1,256], index: 7, kind: input, shape index: {}]   ;;  %s7946_s8 = inlined_call_operand.vmem [shape: bf16[128,128], index: 8, kind: input, shape index: {}]   ;;  %s7947_s9 = inlined_call_operand.vmem [shape: bf16[128,128], index: 9, kind: input, shape index: {}]   ;;  %s7948_s10 = inlined_call_operand.vmem [shape: bf16[128,128], index: 10, kind: input, shape index: {}]   ;;  %s7949_s11 = inlined_call_operand.vmem [shape: bf16[4,128,10], index: 11, kind: input, shape index: {}]   ;;  %s7950_s12 = inlined_call_operand.vmem [shape: f32[1,10], index: 12, kind: input, shape index: {}]   ;;  %s7951_s13 = inlined_call_operand.vmem [shape: f32[32,10], index: 13, kind: output, shape index: {}]  }
   0x1 LB: > { %s4576_s26 = sadd.s32 4294967295, %s5951_s25   ;;  %p4580_p0 = scmp.ge.s32.totalorder %s5951_s25, 1  ;;  %s5951_s25 = sphi %s6026_s25, %s23_s25  }
   0x2   : > { %p388_p1 = scmp.lt.s32.totalorder %s5951_s25, 3 }
   0x4   : > { %p389_p2 = pnand %p4580_p0, %p388_p1 }
   0x6   : > { %392 = sbr.rel (%p389_p2) target bundleno = 1977 (0x7b9), region = 72 }
   0xb   : > { %s4581_s27 = sshll.u32 %s4576_s26, 5  ;;  %v5589_v0 = vld [vmem:[%s7941_s3 + $0x4] ss:$8 sps:$4 sm:$0xff]   ;;  %v5587_v18 = vld [vmem:[%s7941_s3] ss:$8 sps:$4 sm:$0xff]   ;;  %vm5955_vm0 = vmmov 0  }
   0xc   : > { %p433_p3 = scmp.lt.s32.totalorder %s4581_s27, 63  ;;  %797 = vmatprep.mubr.bf16.mxu0 %v5589_v0  ;;  %v5607_v12 = vld [vmem:[%s7942_s4 + $0x4] ss:$8 sps:$4 sm:$0xff]   ;;  %v5590_v19 = vld [vmem:[%s7941_s3 + $0x14] ss:$8 sps:$4 sm:$0xff]   ;;  %s4583_s20 = sshll.u32 %s4576_s26, 1 }
   0xd   : > { %1166 = vmatprep.mubr.bf16.mxu1 %v5607_v12  ;;  %v5605_v20 = vld [vmem:[%s7942_s4] ss:$8 sps:$4 sm:$0xff]   ;;  %v5611_v21 = vld [vmem:[%s7942_s4 + $0x14] ss:$8 sps:$4 sm:$0xff]   ;;  %v5592_v22 = vld [vmem:[%s7941_s3 + $0x10] ss:$8 sps:$4 sm:$0xff]  }
   0xe   : > { %s8147_s27 = smov (!%p433_p3, %s4581_s27), 63  ;;  %v5647_v23 = vld [vmem:[%s7939_s1 + $0xf0] ss:$8 sps:$4 sm:$0xff]   ;;  %v5649_v24 = vld [vmem:[%s7939_s1 + $0xf4] ss:$8 sps:$4 sm:$0xff]   ;;  %p439_p4 = scmp.lt.s32.totalorder %s4583_s20, 3 }
   0xf   : > { %s4582_s30 = sshll.u32 %s8147_s27, 2  ;;  %v5593_v25 = vld [vmem:[%s7941_s3 + $0x24] ss:$8 sps:$4 sm:$0xff]   ;;  %v5615_v26 = vld [vmem:[%s7942_s4 + $0x10] ss:$8 sps:$4 sm:$0xff]   ;;  %vm4517_vm1 = vcmask 80896  }
  0x10   : > { %s6042_s16 = scalar_lea.vmem %s7938_s0, %s4582_s30  ;;  %v5652_v27 = vld [vmem:[%s7939_s1 + $0xe4] ss:$8 sps:$4 sm:$0xff]   ;;  %v5650_v29 = vld [vmem:[%s7939_s1 + $0xe0] ss:$8 sps:$4 sm:$0xff]   ;;  %v5661_v30 = vld [vmem:[%s7939_s1 + $0xd4] ss:$8 sps:$4 sm:$0xff]  }
  0x11   : > { %v5571_v1 = vld [vmem:[%s6042_s16 + $0x78] sm:$0xff]   ;;  %v5573_v3 = vld [vmem:[%s6042_s16 + $0x70] sm:$0xff]   ;;  %v5575_v5 = vld [vmem:[%s6042_s16 + $0x68] sm:$0xff]   ;;  %s8149_s20 = smov (!%p439_p4, %s4583_s20), 3 }
  0x12   : > { %v5572_v2 = vld [vmem:[%s6042_s16 + $0x38] sm:$0xff]   ;;  %4964 = vmatprep.subr.bf16.mxu0 %v5571_v1  ;;  %5076 = vmatprep.subr.bf16.mxu1 %v5571_v1  ;;  %v5574_v4 = vld [vmem:[%s6042_s16 + $0x30] sm:$0xff]   ;;  %v5576_v6 = vld [vmem:[%s6042_s16 + $0x28] sm:$0xff]   ;;  %s4584_s21 = sshll.u32 %s8149_s20, 3 }
  0x13   : > { %4965 = vmatpush3.bf16.msra.mxu0 %v5572_v2  ;;  %5077 = vmatpush3.bf16.msra.mxu1 %v5572_v2  ;;  %v5577_v7 = vld [vmem:[%s6042_s16 + $0x60] sm:$0xff]   ;;  %v5579_v9 = vld [vmem:[%s6042_s16 + $0x58] sm:$0xff]   ;;  %v5581_v11 = vld [vmem:[%s6042_s16 + $0x50] sm:$0xff]   ;;  %s442_s28 = scalar_lea.vmem %s7951_s13, %s4584_s21 }
  0x14   : > { %4966 = vmatprep.subr.bf16.mxu0 %v5573_v3  ;;  %5078 = vmatprep.subr.bf16.mxu1 %v5573_v3  ;;  %v5578_v8 = vld [vmem:[%s6042_s16 + $0x20] sm:$0xff]   ;;  %v5580_v10 = vld [vmem:[%s6042_s16 + $0x18] sm:$0xff]   ;;  %v5582_v13 = vld [vmem:[%s6042_s16 + $0x10] sm:$0xff]  }
  0x15   : > { %v5583_v14 = vld [vmem:[%s6042_s16 + $0x48] sm:$0xff]   ;;  %v5585_v16 = vld [vmem:[%s6042_s16 + $0x40] sm:$0xff]   ;;  %v5659_v31 = vld [vmem:[%s7939_s1 + $0xd0] ss:$8 sps:$4 sm:$0xff]  }
  0x16   : > { %v6061_v15 = vld [vmem:[%s6042_s16 + $0x8] sm:$0xff]   ;;  %v6066_v17 = vld [vmem:[%s6042_s16] sm:$0xff]   ;;  %v5596_v35 = vld [vmem:[%s7941_s3 + $0x34] ss:$8 sps:$4 sm:$0xff]  }
  0x17   : > { %4967 = vmatpush3.bf16.msra.mxu0 %v5574_v4  ;;  %5079 = vmatpush3.bf16.msra.mxu1 %v5574_v4  ;;  %v5617_v28 = vld [vmem:[%s7942_s4 + $0x24] ss:$8 sps:$4 sm:$0xff]   ;;  %v5595_v32 = vld [vmem:[%s7941_s3 + $0x20] ss:$8 sps:$4 sm:$0xff]   ;;  %v5623_v36 = vld [vmem:[%s7942_s4 + $0x34] ss:$8 sps:$4 sm:$0xff]  }
  0x18   : > { %4968 = vmatprep.subr.bf16.mxu0 %v5575_v5  ;;  %5080 = vmatprep.subr.bf16.mxu1 %v5575_v5  ;;  %v5664_v33 = vld [vmem:[%s7939_s1 + $0xc4] ss:$8 sps:$4 sm:$0xff]   ;;  %v5621_v34 = vld [vmem:[%s7942_s4 + $0x20] ss:$8 sps:$4 sm:$0xff]   ;;  %v5673_v38 = vld [vmem:[%s7939_s1 + $0xb4] ss:$8 sps:$4 sm:$0xff]  }
  0x19   : > { %v5662_v37 = vld [vmem:[%s7939_s1 + $0xc0] ss:$8 sps:$4 sm:$0xff]   ;;  %v5598_v39 = vld [vmem:[%s7941_s3 + $0x30] ss:$8 sps:$4 sm:$0xff]   ;;  %v5676_v41 = vld [vmem:[%s7939_s1 + $0xa4] ss:$8 sps:$4 sm:$0xff]  }
  0x1a   : > { %v5671_v40 = vld [vmem:[%s7939_s1 + $0xb0] ss:$8 sps:$4 sm:$0xff]   ;;  %v5599_v43 = vld [vmem:[%s7941_s3 + $0x44] ss:$8 sps:$4 sm:$0xff]   ;;  %v5674_v45 = vld [vmem:[%s7939_s1 + $0xa0] ss:$8 sps:$4 sm:$0xff]  }
  0x1b   : > { %4969 = vmatpush3.bf16.msra.mxu0 %v5576_v6  ;;  %5081 = vmatpush3.bf16.msra.mxu1 %v5576_v6  ;;  %v5627_v42 = vld [vmem:[%s7942_s4 + $0x30] ss:$8 sps:$4 sm:$0xff]   ;;  %v5629_v44 = vld [vmem:[%s7942_s4 + $0x44] ss:$8 sps:$4 sm:$0xff]   ;;  %v5685_v46 = vld [vmem:[%s7939_s1 + $0x94] ss:$8 sps:$4 sm:$0xff]  }
  0x1c   : > { %4970 = vmatprep.subr.bf16.mxu0 %v5577_v7  ;;  %5082 = vmatprep.subr.bf16.mxu1 %v5577_v7  ;;  %v5601_v47 = vld [vmem:[%s7941_s3 + $0x40] ss:$8 sps:$4 sm:$0xff]   ;;  %v5683_v49 = vld [vmem:[%s7939_s1 + $0x90] ss:$8 sps:$4 sm:$0xff]   ;;  %v5688_v50 = vld [vmem:[%s7939_s1 + $0x84] ss:$8 sps:$4 sm:$0xff]  }
  0x1d   : > { %v5633_v48 = vld [vmem:[%s7942_s4 + $0x40] ss:$8 sps:$4 sm:$0xff]   ;;  %v5602_v51 = vld [vmem:[%s7941_s3 + $0x54] ss:$8 sps:$4 sm:$0xff]   ;;  %v5604_v54 = vld [vmem:[%s7941_s3 + $0x50] ss:$8 sps:$4 sm:$0xff]  }
  0x1e   : > { %v5635_v52 = vld [vmem:[%s7942_s4 + $0x54] ss:$8 sps:$4 sm:$0xff]   ;;  %v5686_v53 = vld [vmem:[%s7939_s1 + $0x80] ss:$8 sps:$4 sm:$0xff]   ;;  %v5639_v55 = vld [vmem:[%s7942_s4 + $0x50] ss:$8 sps:$4 sm:$0xff]  }
  0x1f   : > { %4971 = vmatpush3.bf16.msra.mxu0 %v5578_v8  ;;  %5083 = vmatpush3.bf16.msra.mxu1 %v5578_v8  ;;  %v5608_v56 = vld [vmem:[%s7941_s3 + $0x64] ss:$8 sps:$4 sm:$0xff]   ;;  %v5707_v58 = vld [vmem:[%s7939_s1 + $0x70] ss:$8 sps:$4 sm:$0xff]   ;;  %v5709_v59 = vld [vmem:[%s7939_s1 + $0x74] ss:$8 sps:$4 sm:$0xff]  }
  0x20   : > { %4972 = vmatprep.subr.bf16.mxu0 %v5579_v9  ;;  %5084 = vmatprep.subr.bf16.mxu1 %v5579_v9  ;;  %v5641_v57 = vld [vmem:[%s7942_s4 + $0x64] ss:$8 sps:$4 sm:$0xff]   ;;  %v5710_v60 = vld [vmem:[%s7939_s1 + $0x60] ss:$8 sps:$4 sm:$0xff]   ;;  %v5613_v0 = vld [vmem:[%s7941_s3 + $0x74] ss:$8 sps:$4 sm:$0xff]  }
  0x21   : > { %v5712_v61 = vld [vmem:[%s7939_s1 + $0x64] ss:$8 sps:$4 sm:$0xff]   ;;  %v5610_v62 = vld [vmem:[%s7941_s3 + $0x60] ss:$8 sps:$4 sm:$0xff]   ;;  %v5653_v1 = vld [vmem:[%s7942_s4 + $0x74] ss:$8 sps:$4 sm:$0xff]  }
  0x22   : > { %v5645_v63 = vld [vmem:[%s7942_s4 + $0x60] ss:$8 sps:$4 sm:$0xff]   ;;  %v5713_v2 = vld [vmem:[%s7939_s1 + $0x50] ss:$8 sps:$4 sm:$0xff]   ;;  %v5715_v3 = vld [vmem:[%s7939_s1 + $0x54] ss:$8 sps:$4 sm:$0xff]  }
  0x23   : > { %4973 = vmatpush3.bf16.msra.mxu0 %v5580_v10  ;;  %5085 = vmatpush3.bf16.msra.mxu1 %v5580_v10  ;;  %v5716_v4 = vld [vmem:[%s7939_s1 + $0x40] ss:$8 sps:$4 sm:$0xff]   ;;  %v5718_v5 = vld [vmem:[%s7939_s1 + $0x44] ss:$8 sps:$4 sm:$0xff]   ;;  %v5616_v6 = vld [vmem:[%s7941_s3 + $0x70] ss:$8 sps:$4 sm:$0xff]  }
  0x24   : > { %4974 = vmatprep.subr.bf16.mxu0 %v5581_v11  ;;  %5086 = vmatprep.subr.bf16.mxu1 %v5581_v11  ;;  %v5657_v7 = vld [vmem:[%s7942_s4 + $0x70] ss:$8 sps:$4 sm:$0xff]   ;;  %v5619_v8 = vld [vmem:[%s7941_s3 + $0x84] ss:$8 sps:$4 sm:$0xff]   ;;  %v5721_v11 = vld [vmem:[%s7939_s1 + $0x34] ss:$8 sps:$4 sm:$0xff]  }
  0x25   : > { %v5665_v9 = vld [vmem:[%s7942_s4 + $0x84] ss:$8 sps:$4 sm:$0xff]   ;;  %v5719_v10 = vld [vmem:[%s7939_s1 + $0x30] ss:$8 sps:$4 sm:$0xff]   ;;  %v5722_v12 = vld [vmem:[%s7939_s1 + $0x20] ss:$8 sps:$4 sm:$0xff]  }
  0x27   : > { %4975 = vmatpush3.bf16.msra.mxu0 %v5582_v13  ;;  %5087 = vmatpush3.bf16.msra.mxu1 %v5582_v13  ;;  %v5724_v13 = vld [vmem:[%s7939_s1 + $0x24] ss:$8 sps:$4 sm:$0xff]  }
  0x28   : > { %4976 = vmatprep.subr.bf16.mxu0 %v5583_v14  ;;  %5088 = vmatprep.subr.bf16.mxu1 %v5583_v14  ;;  %v5622_v14 = vld [vmem:[%s7941_s3 + $0x80] ss:$8 sps:$4 sm:$0xff]  }
  0x2b   : > { %4977 = vmatpush3.bf16.msra.mxu0 %v6061_v15  ;;  %5089 = vmatpush3.bf16.msra.mxu1 %v6061_v15 }
  0x2c   : > { %4978 = vmatprep.subr.bf16.mxu0 %v5585_v16  ;;  %5090 = vmatprep.subr.bf16.mxu1 %v5585_v16  ;;  %v5669_v16 = vld [vmem:[%s7942_s4 + $0x80] ss:$8 sps:$4 sm:$0xff]  }
  0x2f   : > { %4979 = vmatpush3.bf16.msra.mxu0 %v6066_v17  ;;  %5091 = vmatpush3.bf16.msra.mxu1 %v6066_v17 }
  0x30   : > { %1424 = vmatprep.subr.bf16.mxu0 %v5649_v24  ;;  %1697 = vmatprep.subr.bf16.mxu1 %v5709_v59  ;;  %v5631_v24 = vld [vmem:[%s7941_s3 + $0xa4] ss:$8 sps:$4 sm:$0xff]   ;;  %v5743_v59 = vld [vmem:[%s7939_s1 + $0x130] ss:$8 sps:$4 sm:$0xff]  }
  0x32   : > { %798 = vmatmul.mubr.bf16.vlgmr.msra.gmra.mxu0 %v5587_v18  ;;  %1167 = vmatmul.mubr.bf16.vlgmr.msra.gmra.mxu1 %v5605_v20  ;;  %v5625_v18 = vld [vmem:[%s7941_s3 + $0x94] ss:$8 sps:$4 sm:$0xff]  }
  0x33   : > { %805 = vmatprep.mubr.bf16.mxu0 %v5590_v19  ;;  %1174 = vmatprep.mubr.bf16.mxu1 %v5611_v21  ;;  %v5677_v19 = vld [vmem:[%s7942_s4 + $0x94] ss:$8 sps:$4 sm:$0xff]   ;;  %v5628_v21 = vld [vmem:[%s7941_s3 + $0x90] ss:$8 sps:$4 sm:$0xff]  }
  0x34   : > { %1425 = vmatpush1.bf16.msra.mxu0 %v5647_v23  ;;  %1698 = vmatpush1.bf16.msra.mxu1 %v5707_v58  ;;  %v5727_v20 = vld [vmem:[%s7939_s1 + $0x14] ss:$8 sps:$4 sm:$0xff]   ;;  %v5725_v23 = vld [vmem:[%s7939_s1 + $0x10] ss:$8 sps:$4 sm:$0xff]  }
  0x35   : > { %1426 = vmatprep.subr.bf16.mxu0 %v5652_v27  ;;  %1699 = vmatprep.subr.bf16.mxu1 %v5712_v61  ;;  %v5728_v27 = vld [vmem:[%s7939_s1] ss:$8 sps:$4 sm:$0xff]   ;;  %v5745_v58 = vld [vmem:[%s7939_s1 + $0x134] ss:$8 sps:$4 sm:$0xff]  }
  0x36   : > { %v5746_v61 = vld [vmem:[%s7939_s1 + $0x120] ss:$8 sps:$4 sm:$0xff]  }
  0x38   : > { %1427 = vmatpush1.bf16.msra.mxu0 %v5650_v29  ;;  %1700 = vmatpush1.bf16.msra.mxu1 %v5710_v60  ;;  %v5691_v29 = vld [vmem:[%s7942_s4 + $0xa0] ss:$8 sps:$4 sm:$0xff]   ;;  %v5931_v60 = vld [vmem:[%s6042_s16 + $0x10] sm:$0xff]  }
  0x39   : > { %1428 = vmatprep.subr.bf16.mxu0 %v5661_v30  ;;  %1701 = vmatprep.subr.bf16.mxu1 %v5715_v3  ;;  %v5637_v30 = vld [vmem:[%s7941_s3 + $0xb4] ss:$8 sps:$4 sm:$0xff]   ;;  %v5933_v3 = vld [vmem:[%s6042_s16 + $0x20] sm:$0xff]  }
  0x3a   : > { %806 = vmatmul.mubr.bf16.gmra.mxu0 %v5592_v22  ;;  %1175 = vmatmul.mubr.bf16.gmra.mxu1 %v5615_v26  ;;  %v5681_v22 = vld [vmem:[%s7942_s4 + $0x90] ss:$8 sps:$4 sm:$0xff]   ;;  %v5730_v26 = vld [vmem:[%s7939_s1 + $0x4] ss:$8 sps:$4 sm:$0xff]  }
  0x3b   : > { %813 = vmatprep.mubr.bf16.mxu0 %v5593_v25  ;;  %1182 = vmatprep.mubr.bf16.mxu1 %v5617_v28  ;;  %v5689_v25 = vld [vmem:[%s7942_s4 + $0xa4] ss:$8 sps:$4 sm:$0xff]   ;;  %v5634_v28 = vld [vmem:[%s7941_s3 + $0xa0] ss:$8 sps:$4 sm:$0xff]  }
  0x3c   : > { %1429 = vmatpush1.bf16.msra.mxu0 %v5659_v31  ;;  %1702 = vmatpush1.bf16.msra.mxu1 %v5713_v2  ;;  %v5692_v31 = vld [vmem:[%s7942_s4 + $0xb4] ss:$8 sps:$4 sm:$0xff]   ;;  %v5752_v2 = vld [vmem:[%s7939_s1 + $0x100] ss:$8 sps:$4 sm:$0xff]  }
  0x3d   : > { %1430 = vmatprep.subr.bf16.mxu0 %v5664_v33  ;;  %1703 = vmatprep.subr.bf16.mxu1 %v5718_v5  ;;  %v5694_v33 = vld [vmem:[%s7942_s4 + $0xb0] ss:$8 sps:$4 sm:$0xff]  }
  0x3e   : > { %v5935_v5 = vld [vmem:[%s6042_s16 + $0x30] sm:$0xff]  }
  0x40   : > { %1431 = vmatpush1.bf16.msra.mxu0 %v5662_v37  ;;  %1704 = vmatpush1.bf16.msra.mxu1 %v5716_v4  ;;  %v5697_v37 = vld [vmem:[%s7942_s4 + $0xc0] ss:$8 sps:$4 sm:$0xff]  }
  0x41   : > { %1432 = vmatprep.subr.bf16.mxu0 %v5673_v38  ;;  %1705 = vmatprep.subr.bf16.mxu1 %v5721_v11  ;;  %v5655_v38 = vld [vmem:[%s7941_s3 + $0xd4] ss:$8 sps:$4 sm:$0xff]   ;;  %v5934_v4 = vld [vmem:[%s6042_s16 + $0x28] sm:$0xff]  }
  0x42   : > { %814 = vmatmul.mubr.bf16.gmra.mxu0 %v5595_v32  ;;  %1183 = vmatmul.mubr.bf16.gmra.mxu1 %v5621_v34  ;;  %v5640_v32 = vld [vmem:[%s7941_s3 + $0xb0] ss:$8 sps:$4 sm:$0xff]   ;;  %v5643_v34 = vld [vmem:[%s7941_s3 + $0xc4] ss:$8 sps:$4 sm:$0xff]  }
  0x43   : > { %821 = vmatprep.mubr.bf16.mxu0 %v5596_v35  ;;  %1190 = vmatprep.mubr.bf16.mxu1 %v5623_v36  ;;  %v5695_v35 = vld [vmem:[%s7942_s4 + $0xc4] ss:$8 sps:$4 sm:$0xff]   ;;  %v5646_v36 = vld [vmem:[%s7941_s3 + $0xc0] ss:$8 sps:$4 sm:$0xff]  }
  0x44   : > { %1433 = vmatpush1.bf16.msra.mxu0 %v5671_v40  ;;  %1706 = vmatpush1.bf16.msra.mxu1 %v5719_v10  ;;  %v5733_v40 = vld [vmem:[%s7939_s1 + $0x174] ss:$8 sps:$4 sm:$0xff]  }
  0x45   : > { %1434 = vmatprep.subr.bf16.mxu0 %v5676_v41  ;;  %1707 = vmatprep.subr.bf16.mxu1 %v5724_v13  ;;  %v5658_v41 = vld [vmem:[%s7941_s3 + $0xd0] ss:$8 sps:$4 sm:$0xff]  }
  0x48   : > { %1435 = vmatpush1.bf16.msra.mxu0 %v5674_v45  ;;  %1708 = vmatpush1.bf16.msra.mxu1 %v5722_v12  ;;  %v5670_v45 = vld [vmem:[%s7941_s3 + $0xe0] ss:$8 sps:$4 sm:$0xff]  }
  0x49   : > { %1436 = vmatprep.subr.bf16.mxu0 %v5685_v46  ;;  %1709 = vmatprep.subr.bf16.mxu1 %v5727_v20  ;;  %v5703_v46 = vld [vmem:[%s7942_s4 + $0xe0] ss:$8 sps:$4 sm:$0xff]  }
  0x4a   : > { %822 = vmatmul.mubr.bf16.gmra.mxu0 %v5598_v39  ;;  %1191 = vmatmul.mubr.bf16.gmra.mxu1 %v5627_v42  ;;  %v5698_v39 = vld [vmem:[%s7942_s4 + $0xd4] ss:$8 sps:$4 sm:$0xff]   ;;  %v5700_v42 = vld [vmem:[%s7942_s4 + $0xd0] ss:$8 sps:$4 sm:$0xff]  }
  0x4b   : > { %829 = vmatprep.mubr.bf16.mxu0 %v5599_v43  ;;  %1198 = vmatprep.mubr.bf16.mxu1 %v5629_v44  ;;  %v5667_v43 = vld [vmem:[%s7941_s3 + $0xe4] ss:$8 sps:$4 sm:$0xff]  }
  0x4c   : > { %1437 = vmatpush1.bf16.msra.mxu0 %v5683_v49  ;;  %1710 = vmatpush1.bf16.msra.mxu1 %v5725_v23  ;;  %v5701_v44 = vld [vmem:[%s7942_s4 + $0xe4] ss:$8 sps:$4 sm:$0xff]   ;;  %v5682_v49 = vld [vmem:[%s7941_s3 + $0xf0] ss:$8 sps:$4 sm:$0xff]  }
  0x4d   : > { %1438 = vmatprep.subr.bf16.mxu0 %v5688_v50  ;;  %1711 = vmatprep.subr.bf16.mxu1 %v5730_v26  ;;  %v5706_v50 = vld [vmem:[%s7942_s4 + $0xf0] ss:$8 sps:$4 sm:$0xff]  }
  0x50   : > { %1439 = vmatpush1.bf16.msra.mxu0 %v5686_v53  ;;  %1712 = vmatpush1.bf16.msra.mxu1 %v5728_v27  ;;  %v5736_v53 = vld [vmem:[%s7939_s1 + $0x164] ss:$8 sps:$4 sm:$0xff]  }
  0x51   : > { %1987 = vmatprep.subr.bf16.mxu0 %v5733_v40 }
  0x52   : > { %830 = vmatmul.mubr.bf16.gmra.mxu0 %v5601_v47  ;;  %1199 = vmatmul.mubr.bf16.gmra.mxu1 %v5633_v48  ;;  %v5679_v47 = vld [vmem:[%s7941_s3 + $0xf4] ss:$8 sps:$4 sm:$0xff]  }
  0x53   : > { %837 = vmatprep.mubr.bf16.mxu0 %v5602_v51  ;;  %1206 = vmatprep.mubr.bf16.mxu1 %v5635_v52  ;;  %v5704_v48 = vld [vmem:[%s7942_s4 + $0xf4] ss:$8 sps:$4 sm:$0xff]   ;;  %v7952_v51 = vmov 0   ;;  %v5731_v52 = vld [vmem:[%s7939_s1 + $0x170] ss:$8 sps:$4 sm:$0xff]  }
  0x5a   : > { %838 = vmatmul.mubr.bf16.gmra.mxu0 %v5604_v54  ;;  %1207 = vmatmul.mubr.bf16.gmra.mxu1 %v5639_v55  ;;  %v5734_v54 = vld [vmem:[%s7939_s1 + $0x160] ss:$8 sps:$4 sm:$0xff]   ;;  %v5739_v55 = vld [vmem:[%s7939_s1 + $0x154] ss:$8 sps:$4 sm:$0xff]  }
  0x5b   : > { %845 = vmatprep.mubr.bf16.mxu0 %v5608_v56  ;;  %1214 = vmatprep.mubr.bf16.mxu1 %v5641_v57  ;;  %v5737_v56 = vld [vmem:[%s7939_s1 + $0x150] ss:$8 sps:$4 sm:$0xff]   ;;  %v5740_v57 = vld [vmem:[%s7939_s1 + $0x140] ss:$8 sps:$4 sm:$0xff]  }
  0x62   : > { %846 = vmatmul.mubr.bf16.gmra.mxu0 %v5610_v62  ;;  %1215 = vmatmul.mubr.bf16.gmra.mxu1 %v5645_v63  ;;  %v5751_v62 = vld [vmem:[%s7939_s1 + $0x114] ss:$8 sps:$4 sm:$0xff]   ;;  %v5749_v63 = vld [vmem:[%s7939_s1 + $0x110] ss:$8 sps:$4 sm:$0xff]  }
  0x63   : > { %853 = vmatprep.mubr.bf16.mxu0 %v5613_v0  ;;  %1222 = vmatprep.mubr.bf16.mxu1 %v5653_v1  ;;  %v5754_v0 = vld [vmem:[%s7939_s1 + $0x104] ss:$8 sps:$4 sm:$0xff]   ;;  %v5932_v1 = vld [vmem:[%s6042_s16 + $0x18] sm:$0xff]  }
  0x6a   : > { %854 = vmatmul.mubr.bf16.gmra.mxu0 %v5616_v6  ;;  %1223 = vmatmul.mubr.bf16.gmra.mxu1 %v5657_v7  ;;  %v5936_v6 = vld [vmem:[%s6042_s16 + $0x38] sm:$0xff]  }
  0x6b   : > { %861 = vmatprep.mubr.bf16.mxu0 %v5619_v8  ;;  %1230 = vmatprep.mubr.bf16.mxu1 %v5665_v9  ;;  %v5937_v8 = vld [vmem:[%s6042_s16 + $0x40] sm:$0xff]  }
  0x72   : > { %862 = vmatmul.mubr.bf16.gmra.mxu0 %v5622_v14  ;;  %1231 = vmatmul.mubr.bf16.gmra.mxu1 %v5669_v16 }
  0x73   : > { %869 = vmatprep.mubr.bf16.mxu0 %v5625_v18  ;;  %1238 = vmatprep.mubr.bf16.mxu1 %v5677_v19 }
  0x7a   : > { %870 = vmatmul.mubr.bf16.gmra.mxu0 %v5628_v21  ;;  %1239 = vmatmul.mubr.bf16.gmra.mxu1 %v5681_v22  ;;  %v5938_v21 = vld [vmem:[%s6042_s16 + $0x48] sm:$0xff]  }
  0x7b   : > { %877 = vmatprep.mubr.bf16.mxu0 %v5631_v24  ;;  %1246 = vmatprep.mubr.bf16.mxu1 %v5689_v25 }
  0x82   : > { %878 = vmatmul.mubr.bf16.gmra.mxu0 %v5634_v28  ;;  %1247 = vmatmul.mubr.bf16.gmra.mxu1 %v5691_v29 }
  0x83   : > { %885 = vmatprep.mubr.bf16.mxu0 %v5637_v30  ;;  %1254 = vmatprep.mubr.bf16.mxu1 %v5692_v31 }
  0x8a   : > { %886 = vmatmul.mubr.bf16.gmra.mxu0 %v5640_v32  ;;  %1255 = vmatmul.mubr.bf16.gmra.mxu1 %v5694_v33  ;;  %v5939_v33 = vld [vmem:[%s6042_s16 + $0x50] sm:$0xff]  }
  0x8b   : > { %893 = vmatprep.mubr.bf16.mxu0 %v5643_v34  ;;  %1262 = vmatprep.mubr.bf16.mxu1 %v5695_v35 }
  0x92   : > { %894 = vmatmul.mubr.bf16.gmra.mxu0 %v5646_v36  ;;  %1263 = vmatmul.mubr.bf16.gmra.mxu1 %v5697_v37 }
  0x93   : > { %901 = vmatprep.mubr.bf16.mxu0 %v5655_v38  ;;  %1270 = vmatprep.mubr.bf16.mxu1 %v5698_v39 }
  0x9a   : > { %902 = vmatmul.mubr.bf16.gmra.mxu0 %v5658_v41  ;;  %1271 = vmatmul.mubr.bf16.gmra.mxu1 %v5700_v42 }
  0x9b   : > { %909 = vmatprep.mubr.bf16.mxu0 %v5667_v43  ;;  %1278 = vmatprep.mubr.bf16.mxu1 %v5701_v44 }
  0xa2   : > { %910 = vmatmul.mubr.bf16.gmra.mxu0 %v5670_v45  ;;  %1279 = vmatmul.mubr.bf16.gmra.mxu1 %v5703_v46  ;;  %v5940_v45 = vld [vmem:[%s6042_s16 + $0x58] sm:$0xff]  }
  0xa3   : > { %917 = vmatprep.mubr.bf16.mxu0 %v5679_v47  ;;  %1286 = vmatprep.mubr.bf16.mxu1 %v5704_v48 }
  0xaa   : > { %918 = vmatmul.mubr.bf16.gmra.mxu0 %v5682_v49  ;;  %1287 = vmatmul.mubr.bf16.gmra.mxu1 %v5706_v50 }
  0xab   : > { %1456 = vmatprep.mubr.bf16.mxu0 %v7952_v51  ;;  %1729 = vmatprep.mubr.bf16.mxu1 %v7952_v51 }
  0xb2   : > { %1457 = vmatmul.mubr.bf16.vlgmr.msra.gmra.mxu0 %v6066_v17  ;;  %v5742_v17 = vld [vmem:[%s7939_s1 + $0x144] ss:$8 sps:$4 sm:$0xff]  }
  0xb3   : > { %1466 = vmatprep.mubr.bf16.mxu0 %v7952_v51  ;;  %1988 = vmatpush1.bf16.msra.mxu0 %v5731_v52 }
  0xb4   : > { %1989 = vmatprep.subr.bf16.mxu0 %v5736_v53 }
  0xb7   : > { %1990 = vmatpush1.bf16.msra.mxu0 %v5734_v54 }
  0xb8   : > { %1991 = vmatprep.subr.bf16.mxu0 %v5739_v55 }
  0xba   : > { %1467 = vmatmul.mubr.bf16.gmra.mxu0 %v6061_v15  ;;  %v5748_v15 = vld [vmem:[%s7939_s1 + $0x124] ss:$8 sps:$4 sm:$0xff]  }
  0xbb   : > { %1476 = vmatprep.mubr.bf16.mxu0 %v7952_v51  ;;  %1992 = vmatpush1.bf16.msra.mxu0 %v5737_v56 }
  0xbc   : > { %1993 = vmatprep.subr.bf16.mxu0 %v5742_v17 }
  0xbf   : > { %1994 = vmatpush1.bf16.msra.mxu0 %v5740_v57  ;;  %v5941_v57 = vld [vmem:[%s6042_s16 + $0x60] sm:$0xff]  }
  0xc0   : > { %1995 = vmatprep.subr.bf16.mxu0 %v5745_v58 }
  0xc2   : > { %1477 = vmatmul.mubr.bf16.gmra.mxu0 %v5931_v60 }
  0xc3   : > { %1486 = vmatprep.mubr.bf16.mxu0 %v7952_v51  ;;  %1996 = vmatpush1.bf16.msra.mxu0 %v5743_v59 }
  0xc4   : > { %1997 = vmatprep.subr.bf16.mxu0 %v5748_v15 }
  0xc7   : > { %1998 = vmatpush1.bf16.msra.mxu0 %v5746_v61 }
  0xc8   : > { %1999 = vmatprep.subr.bf16.mxu0 %v5751_v62 }
  0xca   : > { %1487 = vmatmul.mubr.bf16.gmra.mxu0 %v5932_v1 }
  0xcb   : > { %1496 = vmatprep.mubr.bf16.mxu0 %v7952_v51  ;;  %2000 = vmatpush1.bf16.msra.mxu0 %v5749_v63 }
  0xcc   : > { %2001 = vmatprep.subr.bf16.mxu0 %v5754_v0 }
  0xcf   : > { %2002 = vmatpush1.bf16.msra.mxu0 %v5752_v2 }
  0xd2   : > { %1497 = vmatmul.mubr.bf16.gmra.mxu0 %v5933_v3 }
  0xd3   : > { %1506 = vmatprep.mubr.bf16.mxu0 %v7952_v51 }
  0xda   : > { %1507 = vmatmul.mubr.bf16.gmra.mxu0 %v5934_v4  ;;  %v5942_v4 = vld [vmem:[%s6042_s16 + $0x68] sm:$0xff]  }
  0xdb   : > { %1516 = vmatprep.mubr.bf16.mxu0 %v7952_v51 }
  0xe2   : > { %1517 = vmatmul.mubr.bf16.gmra.mxu0 %v5935_v5 }
  0xe3   : > { %1526 = vmatprep.mubr.bf16.mxu0 %v7952_v51 }
  0xea   : > { %1527 = vmatmul.mubr.bf16.gmra.mxu0 %v5936_v6 }
  0xeb   : > { %1536 = vmatprep.mubr.bf16.mxu0 %v7952_v51 }
  0xf2   : > { %v4980_v7 = vpop.f32.mrf.mxu0  ;;  %1537 = vmatmul.mubr.bf16.gmra.mxu0 %v5937_v8  ;;  %v6420_v9 = vpop.f32.mrf.mxu1 }
  0xf3   : > { %1546 = vmatprep.mubr.bf16.mxu0 %v7952_v51 }
  0xf4   : > { %v4981_v10 = vpop.f32.mrf.mxu0  ;;  %v6423_v11 = vpop.f32.mrf.mxu1 }
  0xf5   : > { %v4982_v18 = vadd.f32 %v4981_v10, %v4980_v7 }
  0xf6   : > { %v4983_v12 = vpop.f32.mrf.mxu0  ;;  %v6425_v13 = vpop.f32.mrf.mxu1 }
  0xf8   : > { %v4984_v14 = vpop.f32.mrf.mxu0  ;;  %v6427_v16 = vpop.f32.mrf.mxu1 }
  0xf9   : > { %v4985_v19 = vadd.f32 %v4984_v14, %v4983_v12 }
  0xfa   : > { %v4986_v20 = vpop.f32.mrf.mxu0  ;;  %1547 = vmatmul.mubr.bf16.gmra.mxu0 %v5938_v21  ;;  %v6430_v22 = vpop.f32.mrf.mxu1 }
  0xfb   : > { %v926_v23 = vpack.c.bf16 %v4985_v19, %v4982_v18  ;;  %1556 = vmatprep.mubr.bf16.mxu0 %v7952_v51 }
  0xfc   : > { %v4987_v24 = vpop.f32.mrf.mxu0  ;;  %v6433_v25 = vpop.f32.mrf.mxu1 }
  0xfd   : > { %1730 = vmatmul.mubr.bf16.vlgmr.msra.gmra.mxu1 %v926_v23  ;;  %v4988_v30 = vadd.f32 %v4987_v24, %v4986_v20  ;;  %v5943_v23 = vld [vmem:[%s6042_s16 + $0x70] sm:$0xff]  }
  0xfe   : > { %v4989_v26 = vpop.f32.mrf.mxu0  ;;  %1739 = vmatprep.mubr.bf16.mxu1 %v7952_v51  ;;  %v6436_v27 = vpop.f32.mrf.mxu1 }
 0x100   : > { %v4990_v28 = vpop.f32.mrf.mxu0  ;;  %v6438_v29 = vpop.f32.mrf.mxu1 }
 0x101   : > { %v4991_v31 = vadd.f32 %v4990_v28, %v4989_v26 }
 0x102   : > { %v4992_v32 = vpop.f32.mrf.mxu0  ;;  %1557 = vmatmul.mubr.bf16.gmra.mxu0 %v5939_v33  ;;  %v6441_v34 = vpop.f32.mrf.mxu1 }
 0x103   : > { %v927_v35 = vpack.c.bf16 %v4991_v31, %v4988_v30  ;;  %1566 = vmatprep.mubr.bf16.mxu0 %v7952_v51 }
 0x104   : > { %v4993_v36 = vpop.f32.mrf.mxu0  ;;  %v6444_v37 = vpop.f32.mrf.mxu1 }
 0x105   : > { %1740 = vmatmul.mubr.bf16.gmra.mxu1 %v927_v35  ;;  %v4994_v42 = vadd.f32 %v4993_v36, %v4992_v32 }
 0x106   : > { %v4995_v38 = vpop.f32.mrf.mxu0  ;;  %1749 = vmatprep.mubr.bf16.mxu1 %v7952_v51  ;;  %v6447_v39 = vpop.f32.mrf.mxu1 }
 0x108   : > { %v4996_v40 = vpop.f32.mrf.mxu0  ;;  %v6449_v41 = vpop.f32.mrf.mxu1 }
 0x109   : > { %v4997_v43 = vadd.f32 %v4996_v40, %v4995_v38 }
 0x10a   : > { %v4998_v44 = vpop.f32.mrf.mxu0  ;;  %1567 = vmatmul.mubr.bf16.gmra.mxu0 %v5940_v45  ;;  %v6452_v46 = vpop.f32.mrf.mxu1  ;;  %v5094_v45 = vadd.f32 %v6423_v11, %v6420_v9 }
 0x10b   : > { %v928_v47 = vpack.c.bf16 %v4997_v43, %v4994_v42  ;;  %1576 = vmatprep.mubr.bf16.mxu0 %v7952_v51  ;;  %v5944_v42 = vld [vmem:[%s6042_s16 + $0x78] sm:$0xff]  }
 0x10c   : > { %v4999_v48 = vpop.f32.mrf.mxu0  ;;  %v6455_v49 = vpop.f32.mrf.mxu1 }
 0x10d   : > { %1750 = vmatmul.mubr.bf16.gmra.mxu1 %v928_v47  ;;  %v5000_v55 = vadd.f32 %v4999_v48, %v4998_v44  ;;  %v5097_v47 = vadd.f32 %v6427_v16, %v6425_v13  ;;  %v5100_v13 = vadd.f32 %v6433_v25, %v6430_v22  ;;  %v5103_v16 = vadd.f32 %v6438_v29, %v6436_v27 }
 0x10e   : > { %v5001_v50 = vpop.f32.mrf.mxu0  ;;  %1759 = vmatprep.mubr.bf16.mxu1 %v7952_v51  ;;  %v6458_v52 = vpop.f32.mrf.mxu1  ;;  %v5106_v27 = vadd.f32 %v6444_v37, %v6441_v34  ;;  %v5109_v29 = vadd.f32 %v6449_v41, %v6447_v39  ;;  %v5112_v37 = vadd.f32 %v6455_v49, %v6452_v46 }
 0x110   : > { %v5002_v53 = vpop.f32.mrf.mxu0  ;;  %v6460_v54 = vpop.f32.mrf.mxu1 }
 0x111   : > { %v5003_v56 = vadd.f32 %v5002_v53, %v5001_v50  ;;  %v5115_v39 = vadd.f32 %v6460_v54, %v6458_v52 }
 0x112   : > { %v5004_v17 = vpop.f32.mrf.mxu0  ;;  %1577 = vmatmul.mubr.bf16.gmra.mxu0 %v5941_v57  ;;  %v6463_v58 = vpop.f32.mrf.mxu1 }
 0x113   : > { %v929_v59 = vpack.c.bf16 %v5003_v56, %v5000_v55  ;;  %1586 = vmatprep.mubr.bf16.mxu0 %v7952_v51  ;;  %v1295_v56 = vpack.c.bf16 %v5097_v47, %v5094_v45  ;;  %v1298_v45 = vpack.c.bf16 %v5115_v39, %v5112_v37 }
 0x114   : > { %v5005_v15 = vpop.f32.mrf.mxu0  ;;  %v6466_v60 = vpop.f32.mrf.mxu1 }
 0x115   : > { %1760 = vmatmul.mubr.bf16.gmra.mxu1 %v929_v59  ;;  %v5006_v1 = vadd.f32 %v5005_v15, %v5004_v17  ;;  %v5118_v46 = vadd.f32 %v6466_v60, %v6463_v58 }
 0x116   : > { %v5007_v61 = vpop.f32.mrf.mxu0  ;;  %1769 = vmatprep.mubr.bf16.mxu1 %v7952_v51  ;;  %v6469_v62 = vpop.f32.mrf.mxu1 }
 0x118   : > { %v5008_v63 = vpop.f32.mrf.mxu0  ;;  %v6471_v0 = vpop.f32.mrf.mxu1 }
 0x119   : > { %v5009_v2 = vadd.f32 %v5008_v63, %v5007_v61  ;;  %v5121_v49 = vadd.f32 %v6471_v0, %v6469_v62 }
 0x11a   : > { %v5010_v3 = vpop.f32.mrf.mxu0  ;;  %1587 = vmatmul.mubr.bf16.gmra.mxu0 %v5942_v4  ;;  %v6474_v5 = vpop.f32.mrf.mxu1  ;;  %v1296_v4 = vpack.c.bf16 %v5103_v16, %v5100_v13 }
 0x11b   : > { %v930_v6 = vpack.c.bf16 %v5009_v2, %v5006_v1  ;;  %1596 = vmatprep.mubr.bf16.mxu0 %v7952_v51 }
 0x11c   : > { %v5011_v7 = vpop.f32.mrf.mxu0  ;;  %v6477_v8 = vpop.f32.mrf.mxu1 }
 0x11d   : > { %1770 = vmatmul.mubr.bf16.gmra.mxu1 %v930_v6  ;;  %v5012_v19 = vadd.f32 %v5011_v7, %v5010_v3  ;;  %v5124_v58 = vadd.f32 %v6477_v8, %v6474_v5 }
 0x11e   : > { %v5013_v10 = vpop.f32.mrf.mxu0  ;;  %1779 = vmatprep.mubr.bf16.mxu1 %v7952_v51  ;;  %v6480_v12 = vpop.f32.mrf.mxu1 }
 0x120   : > { %v5014_v14 = vpop.f32.mrf.mxu0  ;;  %v6482_v18 = vpop.f32.mrf.mxu1 }
 0x121   : > { %v5015_v20 = vadd.f32 %v5014_v14, %v5013_v10  ;;  %v5127_v60 = vadd.f32 %v6482_v18, %v6480_v12 }
 0x122   : > { %v5016_v21 = vpop.f32.mrf.mxu0  ;;  %1597 = vmatmul.mubr.bf16.gmra.mxu0 %v5943_v23  ;;  %v6485_v24 = vpop.f32.mrf.mxu1 }
 0x123   : > { %v931_v26 = vpack.c.bf16 %v5015_v20, %v5012_v19  ;;  %1606 = vmatprep.mubr.bf16.mxu0 %v7952_v51 }
 0x124   : > { %v5017_v28 = vpop.f32.mrf.mxu0  ;;  %v6488_v30 = vpop.f32.mrf.mxu1 }
 0x125   : > { %1780 = vmatmul.mubr.bf16.gmra.mxu1 %v931_v26  ;;  %v5018_v36 = vadd.f32 %v5017_v28, %v5016_v21  ;;  %v1297_v28 = vpack.c.bf16 %v5109_v29, %v5106_v27  ;;  %v5130_v5 = vadd.f32 %v6488_v30, %v6485_v24 }
 0x126   : > { %v5019_v31 = vpop.f32.mrf.mxu0  ;;  %1789 = vmatprep.mubr.bf16.mxu1 %v7952_v51  ;;  %v6491_v32 = vpop.f32.mrf.mxu1 }
 0x128   : > { %v5020_v33 = vpop.f32.mrf.mxu0  ;;  %v6493_v35 = vpop.f32.mrf.mxu1 }
 0x129   : > { %v5021_v38 = vadd.f32 %v5020_v33, %v5019_v31  ;;  %v5133_v8 = vadd.f32 %v6493_v35, %v6491_v32 }
 0x12a   : > { %v5022_v40 = vpop.f32.mrf.mxu0  ;;  %1607 = vmatmul.mubr.bf16.gmra.mxu0 %v5944_v42  ;;  %v6496_v43 = vpop.f32.mrf.mxu1 }
 0x12b   : > { %v932_v44 = vpack.c.bf16 %v5021_v38, %v5018_v36  ;;  %2019 = vmatprep.mubr.bf16.mxu0 %v7952_v51 }
 0x12c   : > { %v5023_v48 = vpop.f32.mrf.mxu0  ;;  %v6503_v50 = vpop.f32.mrf.mxu1 }
 0x12d   : > { %1790 = vmatmul.mubr.bf16.gmra.mxu1 %v932_v44  ;;  %v5024_v59 = vadd.f32 %v5023_v48, %v5022_v40  ;;  %v5136_v24 = vadd.f32 %v6503_v50, %v6496_v43 }
 0x12e   : > { %v5025_v53 = vpop.f32.mrf.mxu0  ;;  %1799 = vmatprep.mubr.bf16.mxu1 %v7952_v51  ;;  %v6506_v55 = vpop.f32.mrf.mxu1 }
 0x130   : > { %v5026_v17 = vpop.f32.mrf.mxu0  ;;  %v6508_v57 = vpop.f32.mrf.mxu1 }
 0x131   : > { %v5027_v15 = vadd.f32 %v5026_v17, %v5025_v53  ;;  %v5139_v30 = vadd.f32 %v6508_v57, %v6506_v55 }
 0x132   : > { %v5028_v61 = vpop.f32.mrf.mxu0  ;;  %2020 = vmatmul.mubr.bf16.vlgmr.msra.gmra.mxu0 %v1295_v56  ;;  %v6510_v9 = vpop.f32.mrf.mxu1 }
 0x133   : > { %v933_v11 = vpack.c.bf16 %v5027_v15, %v5024_v59  ;;  %2029 = vmatprep.mubr.bf16.mxu0 %v7952_v51 }
 0x134   : > { %v5029_v63 = vpop.f32.mrf.mxu0  ;;  %v6517_v1 = vpop.f32.mrf.mxu1 }
 0x135   : > { %1800 = vmatmul.mubr.bf16.gmra.mxu1 %v933_v11  ;;  %v5030_v10 = vadd.f32 %v5029_v63, %v5028_v61  ;;  %v1299_v61 = vpack.c.bf16 %v5121_v49, %v5118_v46  ;;  %v5142_v43 = vadd.f32 %v6517_v1, %v6510_v9 }
 0x136   : > { %v5031_v2 = vpop.f32.mrf.mxu0  ;;  %1809 = vmatprep.mubr.bf16.mxu1 %v7952_v51  ;;  %v6520_v3 = vpop.f32.mrf.mxu1 }
 0x138   : > { %v5032_v6 = vpop.f32.mrf.mxu0  ;;  %v6522_v7 = vpop.f32.mrf.mxu1 }
 0x139   : > { %v5033_v14 = vadd.f32 %v5032_v6, %v5031_v2  ;;  %v5145_v50 = vadd.f32 %v6522_v7, %v6520_v3 }
 0x13a   : > { %v5034_v19 = vpop.f32.mrf.mxu0  ;;  %2030 = vmatmul.mubr.bf16.gmra.mxu0 %v1296_v4  ;;  %v6524_v22 = vpop.f32.mrf.mxu1 }
 0x13b   : > { %v934_v25 = vpack.c.bf16 %v5033_v14, %v5030_v10  ;;  %2039 = vmatprep.mubr.bf16.mxu0 %v7952_v51  ;;  %v1300_v10 = vpack.c.bf16 %v5127_v60, %v5124_v58  ;;  %v1303_v46 = vpack.c.bf16 %v5145_v50, %v5142_v43 }
 0x13c   : > { %v5035_v20 = vpop.f32.mrf.mxu0  ;;  %v6531_v21 = vpop.f32.mrf.mxu1 }
 0x13d   : > { %1810 = vmatmul.mubr.bf16.gmra.mxu1 %v934_v25  ;;  %v5036_v33 = vadd.f32 %v5035_v20, %v5034_v19  ;;  %v5148_v9 = vadd.f32 %v6531_v21, %v6524_v22 }
 0x13e   : > { %v5037_v23 = vpop.f32.mrf.mxu0  ;;  %1819 = vmatprep.mubr.bf16.mxu1 %v7952_v51  ;;  %v6534_v26 = vpop.f32.mrf.mxu1 }
 0x140   : > { %v5038_v31 = vpop.f32.mrf.mxu0  ;;  %v6536_v38 = vpop.f32.mrf.mxu1 }
 0x141   : > { %v5039_v36 = vadd.f32 %v5038_v31, %v5037_v23  ;;  %v5151_v1 = vadd.f32 %v6536_v38, %v6534_v26 }
 0x142   : > { %v5040_v40 = vpop.f32.mrf.mxu0  ;;  %2040 = vmatmul.mubr.bf16.gmra.mxu0 %v1297_v28  ;;  %v6543_v42 = vpop.f32.mrf.mxu1  ;;  %v1301_v28 = vpack.c.bf16 %v5133_v8, %v5130_v5 }
 0x143   : > { %v935_v34 = vpack.c.bf16 %v5039_v36, %v5036_v33  ;;  %2049 = vmatprep.mubr.bf16.mxu0 %v7952_v51 }
 0x144   : > { %v5041_v41 = vpop.f32.mrf.mxu0  ;;  %v6546_v56 = vpop.f32.mrf.mxu1 }
 0x145   : > { %1820 = vmatmul.mubr.bf16.gmra.mxu1 %v935_v34  ;;  %v5042_v48 = vadd.f32 %v5041_v41, %v5040_v40  ;;  %v1302_v41 = vpack.c.bf16 %v5139_v30, %v5136_v24  ;;  %v5154_v22 = vadd.f32 %v6546_v56, %v6543_v42 }
 0x146   : > { %v5043_v44 = vpop.f32.mrf.mxu0  ;;  %1829 = vmatprep.mubr.bf16.mxu1 %v7952_v51  ;;  %v6553_v54 = vpop.f32.mrf.mxu1 }
 0x148   : > { %v5044_v47 = vpop.f32.mrf.mxu0  ;;  %v6556_v63 = vpop.f32.mrf.mxu1 }
 0x149   : > { %v5045_v53 = vadd.f32 %v5044_v47, %v5043_v44  ;;  %v5157_v21 = vadd.f32 %v6556_v63, %v6553_v54 }
 0x14a   : > { %v5046_v17 = vpop.f32.mrf.mxu0  ;;  %2050 = vmatmul.mubr.bf16.gmra.mxu0 %v1298_v45  ;;  %v6563_v0 = vpop.f32.mrf.mxu1 }
 0x14b   : > { %v936_v59 = vpack.c.bf16 %v5045_v53, %v5042_v48  ;;  %2059 = vmatprep.mubr.bf16.mxu0 %v7952_v51 }
 0x14c   : > { %v5047_v52 = vpop.f32.mrf.mxu0  ;;  %v6566_v27 = vpop.f32.mrf.mxu1 }
 0x14d   : > { %1830 = vmatmul.mubr.bf16.gmra.mxu1 %v936_v59  ;;  %v5048_v13 = vadd.f32 %v5047_v52, %v5046_v17  ;;  %v5160_v42 = vadd.f32 %v6566_v27, %v6563_v0 }
 0x14e   : > { %v5049_v15 = vpop.f32.mrf.mxu0  ;;  %1839 = vmatprep.mubr.bf16.mxu1 %v7952_v51  ;;  %v6573_v18 = vpop.f32.mrf.mxu1 }
 0x150   : > { %v5050_v11 = vpop.f32.mrf.mxu0  ;;  %v5162_v40 = vpop.f32.mrf.mxu1 }
 0x151   : > { %v5051_v16 = vadd.f32 %v5050_v11, %v5049_v15  ;;  %v5163_v56 = vadd.f32 %v5162_v40, %v6573_v18 }
 0x152   : > { %v5052_v2 = vpop.f32.mrf.mxu0  ;;  %2060 = vmatmul.mubr.bf16.gmra.mxu0 %v1299_v61  ;;  %v5164_v35 = vpop.f32.mrf.mxu1 }
 0x153   : > { %v937_v4 = vpack.c.bf16 %v5051_v16, %v5048_v13  ;;  %2069 = vmatprep.mubr.bf16.mxu0 %v7952_v51 }
 0x154   : > { %v5053_v62 = vpop.f32.mrf.mxu0  ;;  %v5165_v48 = vpop.f32.mrf.mxu1 }
 0x155   : > { %1840 = vmatmul.mubr.bf16.gmra.mxu1 %v937_v4  ;;  %v5054_v19 = vadd.f32 %v5053_v62, %v5052_v2  ;;  %v1304_v2 = vpack.c.bf16 %v5151_v1, %v5148_v9 }
 0x156   : > { %v5055_v6 = vpop.f32.mrf.mxu0  ;;  %1849 = vmatprep.mubr.bf16.mxu1 %v7952_v51  ;;  %v5167_v57 = vpop.f32.mrf.mxu1 }
 0x158   : > { %v5056_v14 = vpop.f32.mrf.mxu0  ;;  %v5168_v61 = vpop.f32.mrf.mxu1 }
 0x159   : > { %v5057_v25 = vadd.f32 %v5056_v14, %v5055_v6  ;;  %v1305_v6 = vpack.c.bf16 %v5157_v21, %v5154_v22 }
 0x15a   : > { %v5058_v29 = vpop.f32.mrf.mxu0  ;;  %2070 = vmatmul.mubr.bf16.gmra.mxu0 %v1300_v10  ;;  %v5170_v7 = vpop.f32.mrf.mxu1 }
 0x15b   : > { %v938_v20 = vpack.c.bf16 %v5057_v25, %v5054_v19  ;;  %2079 = vmatprep.mubr.bf16.mxu0 %v7952_v51 }
 0x15c   : > { %v5059_v12 = vpop.f32.mrf.mxu0  ;;  %v5171_v58 = vpop.f32.mrf.mxu1 }
 0x15d   : > { %1850 = vmatmul.mubr.bf16.gmra.mxu1 %v938_v20  ;;  %v5060_v33 = vadd.f32 %v5059_v12, %v5058_v29  ;;  %v1306_v29 = vpack.c.bf16 %v5163_v56, %v5160_v42  ;;  %v5166_v12 = vadd.f32 %v5165_v48, %v5164_v35  ;;  %v5172_v40 = vadd.f32 %v5171_v58, %v5170_v7 }
 0x15e   : > { %v5061_v23 = vpop.f32.mrf.mxu0  ;;  %1859 = vmatprep.mubr.bf16.mxu1 %v7952_v51  ;;  %v5173_v38 = vpop.f32.mrf.mxu1 }
 0x160   : > { %v5062_v31 = vpop.f32.mrf.mxu0  ;;  %v5174_v14 = vpop.f32.mrf.mxu1 }
 0x161   : > { %v5063_v36 = vadd.f32 %v5062_v31, %v5061_v23  ;;  %v5169_v23 = vadd.f32 %v5168_v61, %v5167_v57 }
 0x162   : > { %v5064_v34 = vpop.f32.mrf.mxu0  ;;  %2080 = vmatmul.mubr.bf16.gmra.mxu0 %v1301_v28  ;;  %v5176_v63 = vpop.f32.mrf.mxu1 }
 0x163   : > { %v939_v37 = vpack.c.bf16 %v5063_v36, %v5060_v33  ;;  %2089 = vmatprep.mubr.bf16.mxu0 %v7952_v51  ;;  %v1307_v18 = vpack.c.bf16 %v5169_v23, %v5166_v12 }
 0x164   : > { %v5065_v32 = vpop.f32.mrf.mxu0  ;;  %v5177_v5 = vpop.f32.mrf.mxu1 }
 0x165   : > { %1860 = vmatmul.mubr.bf16.gmra.mxu1 %v939_v37  ;;  %v5066_v45 = vadd.f32 %v5065_v32, %v5064_v34  ;;  %v5175_v34 = vadd.f32 %v5174_v14, %v5173_v38 }
 0x166   : > { %v5067_v39 = vpop.f32.mrf.mxu0  ;;  %1869 = vmatprep.mubr.bf16.mxu1 %v7952_v51  ;;  %v5179_v0 = vpop.f32.mrf.mxu1 }
 0x167   : > { %v1308_v32 = vpack.c.bf16 %v5175_v34, %v5172_v40 }
 0x168   : > { %v5068_v44 = vpop.f32.mrf.mxu0  ;;  %v5180_v33 = vpop.f32.mrf.mxu1 }
 0x169   : > { %v5069_v47 = vadd.f32 %v5068_v44, %v5067_v39  ;;  %v5178_v44 = vadd.f32 %v5177_v5, %v5176_v63 }
 0x16a   : > { %v5070_v53 = vpop.f32.mrf.mxu0  ;;  %2090 = vmatmul.mubr.bf16.gmra.mxu0 %v1302_v41  ;;  %v5182_v24 = vpop.f32.mrf.mxu1 }
 0x16b   : > { %v940_v17 = vpack.c.bf16 %v5069_v47, %v5066_v45  ;;  %2099 = vmatprep.mubr.bf16.mxu0 %v7952_v51  ;;  %v5181_v45 = vadd.f32 %v5180_v33, %v5179_v0 }
 0x16c   : > { %v5071_v55 = vpop.f32.mrf.mxu0  ;;  %v5183_v39 = vpop.f32.mrf.mxu1 }
 0x16d   : > { %1870 = vmatmul.mubr.bf16.gmra.mxu1 %v940_v17  ;;  %v5072_v52 = vadd.f32 %v5071_v55, %v5070_v53  ;;  %v1309_v17 = vpack.c.bf16 %v5181_v45, %v5178_v44  ;;  %v5184_v57 = vadd.f32 %v5183_v39, %v5182_v24 }
 0x16e   : > { %v5073_v59 = vpop.f32.mrf.mxu0  ;;  %1879 = vmatprep.mubr.bf16.mxu1 %v7952_v51  ;;  %v5185_v48 = vpop.f32.mrf.mxu1 }
 0x170   : > { %v5074_v49 = vpop.f32.mrf.mxu0  ;;  %v5186_v50 = vpop.f32.mrf.mxu1 }
 0x171   : > { %v5075_v15 = vadd.f32 %v5074_v49, %v5073_v59  ;;  %v5187_v59 = vadd.f32 %v5186_v50, %v5185_v48 }
 0x172   : > { %v6588_v11 = vpop.f32.mrf.mxu0  ;;  %2100 = vmatmul.mubr.bf16.gmra.mxu0 %v1303_v46 }
 0x173   : > { %v941_v13 = vpack.c.bf16 %v5075_v15, %v5072_v52  ;;  %2109 = vmatprep.mubr.bf16.mxu0 %v7952_v51  ;;  %v1310_v52 = vpack.c.bf16 %v5187_v59, %v5184_v57 }
 0x174   : > { %v6595_v3 = vpop.f32.mrf.mxu0 }
 0x175   : > { %1880 = vmatmul.mubr.bf16.gmra.mxu1 %v941_v13 }
 0x176   : > { %v6597_v16 = vpop.f32.mrf.mxu0 }
 0x178   : > { %v6599_v4 = vpop.f32.mrf.mxu0 }
 0x17a   : > { %v6601_v60 = vpop.f32.mrf.mxu0  ;;  %2110 = vmatmul.mubr.bf16.gmra.mxu0 %v1304_v2 }
 0x17b   : > { %2119 = vmatprep.mubr.bf16.mxu0 %v7952_v51 }
 0x17c   : > { %v6608_v26 = vpop.f32.mrf.mxu0 }
 0x17e   : > { %v6610_v62 = vpop.f32.mrf.mxu0 }
 0x180   : > { %v6612_v10 = vpop.f32.mrf.mxu0 }
 0x182   : > { %v6614_v19 = vpop.f32.mrf.mxu0  ;;  %2120 = vmatmul.mubr.bf16.gmra.mxu0 %v1305_v6 }
 0x183   : > { %2129 = vmatprep.mubr.bf16.mxu0 %v7952_v51 }
 0x184   : > { %v6620_v54 = vpop.f32.mrf.mxu0 }
 0x186   : > { %v6622_v25 = vpop.f32.mrf.mxu0 }
 0x188   : > { %v6624_v20 = vpop.f32.mrf.mxu0 }
 0x18a   : > { %v6626_v8 = vpop.f32.mrf.mxu0  ;;  %2130 = vmatmul.mubr.bf16.gmra.mxu0 %v1306_v29 }
 0x18b   : > { %2139 = vmatprep.mubr.bf16.mxu0 %v7952_v51 }
 0x18c   : > { %v6629_v28 = vpop.f32.mrf.mxu0 }
 0x18e   : > { %v6631_v27 = vpop.f32.mrf.mxu0 }
 0x190   : > { %v6633_v31 = vpop.f32.mrf.mxu0 }
 0x192   : > { %v6635_v36 = vpop.f32.mrf.mxu0  ;;  %2140 = vmatmul.mubr.bf16.gmra.mxu0 %v1307_v18 }
 0x193   : > { %2149 = vmatprep.mubr.bf16.mxu0 %v7952_v51 }
 0x194   : > { %v6638_v37 = vpop.f32.mrf.mxu0 }
 0x196   : > { %v6640_v30 = vpop.f32.mrf.mxu0 }
 0x198   : > { %v6642_v35 = vpop.f32.mrf.mxu0 }
 0x19a   : > { %v6644_v41 = vpop.f32.mrf.mxu0  ;;  %2150 = vmatmul.mubr.bf16.gmra.mxu0 %v1308_v32 }
 0x19b   : > { %2159 = vmatprep.mubr.bf16.mxu0 %v7952_v51 }
 0x19c   : > { %v6647_v47 = vpop.f32.mrf.mxu0 }
 0x19e   : > { %v6649_v53 = vpop.f32.mrf.mxu0 }
 0x1a0   : > { %v6651_v43 = vpop.f32.mrf.mxu0 }
 0x1a2   : > { %v6653_v55 = vpop.f32.mrf.mxu0  ;;  %2160 = vmatmul.mubr.bf16.gmra.mxu0 %v1309_v17 }
 0x1a3   : > { %2169 = vmatprep.mubr.bf16.mxu0 %v7952_v51 }
 0x1a4   : > { %v6656_v46 = vpop.f32.mrf.mxu0 }
 0x1a5   : > { %7982 = vst [vmem:[#allocation2_spill] sm:$0xff] %v6656_v46 }
 0x1a6   : > { %v6658_v49 = vpop.f32.mrf.mxu0 }
 0x1a7   : > { %7983 = vst [vmem:[#allocation3_spill] sm:$0xff] %v6658_v49 }
 0x1a8   : > { %v6660_v15 = vpop.f32.mrf.mxu0 }
 0x1a9   : > { %7984 = vst [vmem:[#allocation4_spill] sm:$0xff] %v6660_v15 }
 0x1aa   : > { %v6662_v61 = vpop.f32.mrf.mxu0  ;;  %2170 = vmatmul.mubr.bf16.gmra.mxu0 %v1310_v52 }
 0x1ab   : > { %7985 = vst [vmem:[#allocation5_spill] sm:$0xff] %v6662_v61 }
 0x1ac   : > { %v6664_v13 = vpop.f32.mrf.mxu0 }
 0x1ad   : > { %7986 = vst [vmem:[#allocation6_spill] sm:$0xff] %v6664_v13 }
 0x1ae   : > { %v6666_v9 = vpop.f32.mrf.mxu0 }
 0x1af   : > { %7987 = vst [vmem:[#allocation7_spill] sm:$0xff] %v6666_v9 }
 0x1b0   : > { %v6668_v1 = vpop.f32.mrf.mxu0 }
 0x1b1   : > { %7988 = vst [vmem:[#allocation8_spill] sm:$0xff] %v6668_v1 }
 0x1b2   : > { %v6670_v7 = vpop.f32.mrf.mxu0 }
 0x1b3   : > { %7989 = vst [vmem:[#allocation9_spill] sm:$0xff] %v6670_v7 }
 0x1b4   : > { %v6672_v2 = vpop.f32.mrf.mxu0 }
 0x1b5   : > { %7990 = vst [vmem:[#allocation10_spill] sm:$0xff] %v6672_v2 }
 0x1b6   : > { %v6674_v58 = vpop.f32.mrf.mxu0 }
 0x1b7   : > { %7991 = vst [vmem:[#allocation11_spill] sm:$0xff] %v6674_v58 }
 0x1b8   : > { %v6676_v22 = vpop.f32.mrf.mxu0 }
 0x1b9   : > { %7992 = vst [vmem:[#allocation12_spill] sm:$0xff] %v6676_v22 }
 0x1ba   : > { %v6678_v21 = vpop.f32.mrf.mxu0 }
 0x1bb   : > { %7993 = vst [vmem:[#allocation13_spill] sm:$0xff] %v6678_v21 }
 0x1bc   : > { %v6680_v38 = vpop.f32.mrf.mxu0 }
 0x1bd   : > { %7994 = vst [vmem:[#allocation14_spill] sm:$0xff] %v6680_v38  ;;  %v1731_v6 = vpop.f32.mrf.mxu1  ;;  %v2246_v38 = vlaneseq }
 0x1be   : > { %v6682_v14 = vpop.f32.mrf.mxu0 }
 0x1bf   : > { %7995 = vst [vmem:[#allocation15_spill] sm:$0xff] %v6682_v14  ;;  %v1733_v42 = vpop.f32.mrf.mxu1 }
 0x1c0   : > { %v6684_v56 = vpop.f32.mrf.mxu0 }
 0x1c1   : > { %7996 = vst [vmem:[#allocation16_spill] sm:$0xff] %v6684_v56  ;;  %v1735_v63 = vpop.f32.mrf.mxu1 }
 0x1c2   : > { %v6686_v29 = vpop.f32.mrf.mxu0 }
 0x1c3   : > { %7997 = vst [vmem:[#allocation17_spill] sm:$0xff] %v6686_v29  ;;  %v6688_v5 = vpop.f32.mrf.mxu1 }
 0x1c4   : > { %v6690_v12 = vpop.f32.mrf.mxu0 }
 0x1c5   : > { %7998 = vst [vmem:[#allocation18_spill] sm:$0xff] %v6690_v12  ;;  %v6692_v23 = vpop.f32.mrf.mxu1 }
 0x1c6   : > { %v6694_v0 = vpop.f32.mrf.mxu0 }
 0x1c7   : > { %7999 = vst [vmem:[#allocation19_spill] sm:$0xff] %v6694_v0  ;;  %v6696_v18 = vpop.f32.mrf.mxu1 }
 0x1c8   : > { %v6698_v33 = vpop.f32.mrf.mxu0 }
 0x1c9   : > { %8000 = vst [vmem:[#allocation20_spill] sm:$0xff] %v6698_v33  ;;  %v6700_v40 = vpop.f32.mrf.mxu1 }
 0x1ca   : > { %v6702_v34 = vpop.f32.mrf.mxu0 }
 0x1cb   : > { %8001 = vst [vmem:[#allocation21_spill] sm:$0xff] %v6702_v34  ;;  %v6704_v24 = vpop.f32.mrf.mxu1 }
 0x1cc   : > { %v6706_v32 = vpop.f32.mrf.mxu0 }
 0x1cd   : > { %8002 = vst [vmem:[#allocation22_spill] sm:$0xff] %v6706_v32  ;;  %v6708_v39 = vpop.f32.mrf.mxu1 }
 0x1ce   : > { %v6710_v44 = vpop.f32.mrf.mxu0 }
 0x1cf   : > { %8003 = vst [vmem:[#allocation23_spill] sm:$0xff] %v6710_v44  ;;  %v6712_v45 = vpop.f32.mrf.mxu1 }
 0x1d0   : > { %v6714_v48 = vpop.f32.mrf.mxu0 }
 0x1d1   : > { %8004 = vst [vmem:[#allocation24_spill] sm:$0xff] %v6714_v48  ;;  %v6716_v17 = vpop.f32.mrf.mxu1 }
 0x1d2   : > { %v6718_v50 = vpop.f32.mrf.mxu0 }
 0x1d3   : > { %8005 = vst [vmem:[#allocation25_spill] sm:$0xff] %v6718_v50  ;;  %v6720_v57 = vpop.f32.mrf.mxu1 }
 0x1d4   : > { %v6722_v59 = vpop.f32.mrf.mxu0 }
 0x1d5   : > { %8006 = vst [vmem:[#allocation26_spill] sm:$0xff] %v6722_v59  ;;  %v6724_v52 = vpop.f32.mrf.mxu1 }
 0x1d6   : > { %v6726_v51 = vpop.f32.mrf.mxu0 }
 0x1d7   : > { %8007 = vst [vmem:[#allocation27_spill] sm:$0xff] %v6726_v51  ;;  %v6728_v32 = vpop.f32.mrf.mxu1 }
 0x1d8   : > { %v6730_v34 = vpop.f32.mrf.mxu0 }
 0x1d9   : > { %8008 = vst [vmem:[#allocation28_spill] sm:$0xff] %v6730_v34  ;;  %v6732_v44 = vpop.f32.mrf.mxu1 }
 0x1da   : > { %v6734_v33 = vpop.f32.mrf.mxu0 }
 0x1db   : > { %8009 = vst [vmem:[#allocation29_spill] sm:$0xff] %v6734_v33  ;;  %v6736_v48 = vpop.f32.mrf.mxu1 }
 0x1dc   : > { %v6738_v0 = vpop.f32.mrf.mxu0 }
 0x1dd   : > { %8010 = vst [vmem:[#allocation30_spill] sm:$0xff] %v6738_v0  ;;  %v6740_v50 = vpop.f32.mrf.mxu1 }
 0x1de   : > { %v6742_v12 = vpop.f32.mrf.mxu0 }
 0x1df   : > { %8011 = vst [vmem:[#allocation31_spill] sm:$0xff] %v6742_v12  ;;  %v6744_v59 = vpop.f32.mrf.mxu1 }
 0x1e0   : > { %v6746_v29 = vpop.f32.mrf.mxu0 }
 0x1e1   : > { %8012 = vst [vmem:[#allocation32_spill] sm:$0xff] %v6746_v29  ;;  %v6748_v51 = vpop.f32.mrf.mxu1  ;;  %v6766_v29 = vshrl.u32 %v2246_v38, 7 }
 0x1e2   : > { %v6750_v56 = vpop.f32.mrf.mxu0 }
 0x1e3   : > { %8013 = vst [vmem:[#allocation33_spill] sm:$0xff] %v6750_v56  ;;  %v6752_v34 = vpop.f32.mrf.mxu1  ;;  %8017 = vst [vmem:[#allocation37_spill] sm:$0xff] %v6766_v29  ;;  %v7954_v7 = vsub.s32 0, %v6766_v29  ;;  %v7955_v38 = vsub.s32 1, %v6766_v29 }
 0x1e4   : > { %v6754_v14 = vpop.f32.mrf.mxu0 }
 0x1e5   : > { %8014 = vst [vmem:[#allocation34_spill] sm:$0xff] %v6754_v14  ;;  %v6756_v33 = vpop.f32.mrf.mxu1 }
 0x1e6   : > { %v6758_v0 = vpop.f32.mrf.mxu0 }
 0x1e7   : > { %8015 = vst [vmem:[#allocation35_spill] sm:$0xff] %v6758_v0  ;;  %v6760_v21 = vpop.f32.mrf.mxu1  ;;  %v2244_v0 = vld [vmem:[%s7940_s2] sm:$0x3] }
 0x1e8   : > { %v6762_v12 = vpop.f32.mrf.mxu0 }
 0x1e9   : > { %8016 = vst [vmem:[#allocation36_spill] sm:$0xff] %v6762_v12  ;;  %v6764_v22 = vpop.f32.mrf.mxu1 }
 0x1ea   : > { %v6768_v58 = vpop.f32.mrf.mxu0 }
 0x1eb   : > { %8018 = vst [vmem:[#allocation38_spill] sm:$0xff] %v6768_v58  ;;  %v6770_v56 = vpop.f32.mrf.mxu1  ;;  %v1732_v58 = vadd.f32 %v1731_v6, %v6588_v11 }
 0x1ec   : > { %v6772_v2 = vpop.f32.mrf.mxu0 }
 0x1ed   : > { %8019 = vst [vmem:[#allocation39_spill] sm:$0xff] %v6772_v2  ;;  %v6774_v14 = vpop.f32.mrf.mxu1  ;;  %v6792_v2 = vrot.slane %v2244_v0, %v7954_v7 }
 0x1ee   : > { %8020 = vst [vmem:[#allocation40_spill] sm:$0xff] %v6774_v14  ;;  %v6777_v1 = vpop.f32.mrf.mxu0  ;;  %v1738_v14 = vadd.f32 %v6688_v5, %v6599_v4  ;;  %v1744_v4 = vadd.f32 %v6696_v18, %v6608_v26  ;;  %v1748_v26 = vadd.f32 %v6704_v24, %v6612_v10 }
 0x1ef   : > { %8021 = vst [vmem:[#allocation41_spill] sm:$0xff] %v6777_v1  ;;  %v6782_v12 = vpop.f32.mrf.mxu1  ;;  %v1734_v1 = vadd.f32 %v1733_v42, %v6595_v3  ;;  %v1742_v42 = vadd.f32 %v6692_v23, %v6601_v60  ;;  %v1746_v60 = vadd.f32 %v6700_v40, %v6610_v62  ;;  %v1752_v62 = vadd.f32 %v6708_v39, %v6614_v19 }
 0x1f0   : > { %8022 = vst [vmem:[#allocation42_spill] sm:$0xff] %v6782_v12  ;;  %v6785_v9 = vpop.f32.mrf.mxu0  ;;  %v6799_v12 = vrot.slane %v2244_v0, %v7955_v38 }
 0x1f1   : > { %8023 = vst [vmem:[#allocation43_spill] sm:$0xff] %v6785_v9  ;;  %v6788_v13 = vpop.f32.mrf.mxu1  ;;  %v1736_v9 = vadd.f32 %v1735_v63, %v6597_v16 }
 0x1f2   : > { %8024 = vst [vmem:[#allocation44_spill] sm:$0xff] %v6788_v13  ;;  %v2021_v61 = vpop.f32.mrf.mxu0 }
 0x1f3   : > { %v2180_v15 = vadd.f32 %v2021_v61, %v1732_v58  ;;  %v6795_v49 = vpop.f32.mrf.mxu1 }
 0x1f4   : > { %v2023_v46 = vpop.f32.mrf.mxu0 }
 0x1f5   : > { %v2256_v11 = vadd.f32 %v6792_v2, %v2180_v15  ;;  %v2181_v6 = vadd.f32 %v2023_v46, %v1734_v1  ;;  %v6803_v13 = vpop.f32.mrf.mxu1 }
 0x1f6   : > { %v2025_v7 = vpop.f32.mrf.mxu0 }
 0x1f7   : > { %v2257_v3 = vadd.f32 %v6799_v12, %v2181_v6  ;;  %v2182_v61 = vadd.f32 %v2025_v7, %v1736_v9  ;;  %v6808_v58 = vpop.f32.mrf.mxu1  ;;  %v2320_v38 = vmax.f32 %v2256_v11, 0.0 }
 0x1f8   : > { %v2027_v0 = vpop.f32.mrf.mxu0 }
 0x1f9   : > { %v2321_v16 = vmax.f32 %v2257_v3, 0.0  ;;  %v2258_v15 = vadd.f32 %v6792_v2, %v2182_v61  ;;  %v2183_v46 = vadd.f32 %v2027_v0, %v1738_v14  ;;  %v6813_v1 = vpop.f32.mrf.mxu1 }
 0x1fa   : > { %v2031_v63 = vpop.f32.mrf.mxu0 }
 0x1fb   : > { %v6817_v5 = vmax.f32 %v2320_v38, %v2321_v16  ;;  %v2259_v9 = vadd.f32 %v6799_v12, %v2183_v46  ;;  %v2184_v7 = vadd.f32 %v2031_v63, %v1742_v42  ;;  %v6820_v6 = vpop.f32.mrf.mxu1  ;;  %v2322_v11 = vmax.f32 %v2258_v15, 0.0 }
 0x1fc   : > { %v2033_v23 = vpop.f32.mrf.mxu0 }
 0x1fd   : > { %8025 = vst [vmem:[#allocation45_spill] sm:$0xff] %v6817_v5  ;;  %v2323_v3 = vmax.f32 %v2259_v9, 0.0  ;;  %v2260_v14 = vadd.f32 %v6792_v2, %v2184_v7  ;;  %v2185_v61 = vadd.f32 %v2033_v23, %v1744_v4  ;;  %v6825_v0 = vpop.f32.mrf.mxu1  ;;  %v1756_v23 = vadd.f32 %v6716_v17, %v6622_v25 }
 0x1fe   : > { %v2035_v29 = vpop.f32.mrf.mxu0  ;;  %v1762_v25 = vadd.f32 %v6724_v52, %v6626_v8 }
 0x1ff   : > { %v6829_v18 = vmax.f32 %v2322_v11, %v2323_v3  ;;  %v2261_v38 = vadd.f32 %v6799_v12, %v2185_v61  ;;  %v2186_v42 = vadd.f32 %v2035_v29, %v1746_v60  ;;  %v6832_v16 = vpop.f32.mrf.mxu1  ;;  %v2324_v40 = vmax.f32 %v2260_v14, 0.0 }
 0x200   : > { %v2037_v15 = vpop.f32.mrf.mxu0  ;;  %v1754_v29 = vadd.f32 %v6712_v45, %v6620_v54  ;;  %v1758_v54 = vadd.f32 %v6720_v57, %v6624_v20 }
 0x201   : > { %8026 = vst [vmem:[#allocation46_spill] sm:$0xff] %v6829_v18  ;;  %v2325_v46 = vmax.f32 %v2261_v38, 0.0  ;;  %v2262_v63 = vadd.f32 %v6792_v2, %v2186_v42  ;;  %v2187_v4 = vadd.f32 %v2037_v15, %v1748_v26  ;;  %v6837_v9 = vpop.f32.mrf.mxu1  ;;  %v8066_v18 = vld [vmem:[#allocation19_spill] sm:$0xff] }
 0x202   : > { %v2041_v24 = vpop.f32.mrf.mxu0 }
 0x203   : > { %v6843_v7 = vmax.f32 %v2324_v40, %v2325_v46  ;;  %v2263_v60 = vadd.f32 %v6799_v12, %v2187_v4  ;;  %v2188_v19 = vadd.f32 %v2041_v24, %v1752_v62  ;;  %v6846_v39 = vpop.f32.mrf.mxu1  ;;  %v2326_v3 = vmax.f32 %v2262_v63, 0.0 }
 0x204   : > { %v2043_v11 = vpop.f32.mrf.mxu0 }
 0x205   : > { %8027 = vst [vmem:[#allocation47_spill] sm:$0xff] %v6843_v7  ;;  %v2327_v14 = vmax.f32 %v2263_v60, 0.0  ;;  %v2264_v61 = vadd.f32 %v6792_v2, %v2188_v19  ;;  %v2189_v26 = vadd.f32 %v2043_v11, %v1754_v29  ;;  %v6851_v38 = vpop.f32.mrf.mxu1  ;;  %v1764_v60 = vadd.f32 %v6728_v32, %v6629_v28 }
 0x206   : > { %v2045_v42 = vpop.f32.mrf.mxu0  ;;  %v1766_v11 = vadd.f32 %v6732_v44, %v6631_v27  ;;  %v1768_v28 = vadd.f32 %v6736_v48, %v6633_v31  ;;  %v1772_v27 = vadd.f32 %v6740_v50, %v6635_v36  ;;  %v1774_v48 = vadd.f32 %v6744_v59, %v6638_v37 }
 0x207   : > { %v6855_v45 = vmax.f32 %v2326_v3, %v2327_v14  ;;  %v2265_v62 = vadd.f32 %v6799_v12, %v2189_v26  ;;  %v2190_v40 = vadd.f32 %v2045_v42, %v1756_v23  ;;  %v6858_v15 = vpop.f32.mrf.mxu1  ;;  %v2328_v17 = vmax.f32 %v2264_v61, 0.0 }
 0x208   : > { %v2047_v46 = vpop.f32.mrf.mxu0  ;;  %v1776_v50 = vadd.f32 %v6748_v51, %v6640_v30  ;;  %v1778_v37 = vadd.f32 %v6752_v34, %v6642_v35  ;;  %v1782_v51 = vadd.f32 %v6756_v33, %v6644_v41 }
 0x209   : > { %8028 = vst [vmem:[#allocation48_spill] sm:$0xff] %v6855_v45  ;;  %v2329_v63 = vmax.f32 %v2265_v62, 0.0  ;;  %v2266_v4 = vadd.f32 %v6792_v2, %v2190_v40  ;;  %v2191_v24 = vadd.f32 %v2047_v46, %v1758_v54  ;;  %v6863_v29 = vpop.f32.mrf.mxu1  ;;  %v8068_v45 = vld [vmem:[#allocation21_spill] sm:$0xff] }
 0x20a   : > { %v2051_v57 = vpop.f32.mrf.mxu0 }
 0x20b   : > { %v6869_v19 = vmax.f32 %v2328_v17, %v2329_v63  ;;  %v2267_v23 = vadd.f32 %v6799_v12, %v2191_v24  ;;  %v2192_v8 = vadd.f32 %v2051_v57, %v1762_v25  ;;  %v6872_v52 = vpop.f32.mrf.mxu1  ;;  %v2330_v14 = vmax.f32 %v2266_v4, 0.0 }
 0x20c   : > { %v2053_v3 = vpop.f32.mrf.mxu0 }
 0x20d   : > { %8029 = vst [vmem:[#allocation49_spill] sm:$0xff] %v6869_v19  ;;  %v2331_v61 = vmax.f32 %v2267_v23, 0.0  ;;  %v2268_v26 = vadd.f32 %v6792_v2, %v2192_v8  ;;  %v2193_v42 = vadd.f32 %v2053_v3, %v1764_v60  ;;  %v6882_v40 = vpop.f32.mrf.mxu1 }
 0x20e   : > { %v2055_v54 = vpop.f32.mrf.mxu0 }
 0x20f   : > { %v6879_v32 = vmax.f32 %v2330_v14, %v2331_v61  ;;  %v2269_v62 = vadd.f32 %v6799_v12, %v2193_v42  ;;  %v2194_v25 = vadd.f32 %v2055_v54, %v1766_v11  ;;  %v2332_v44 = vmax.f32 %v2268_v26, 0.0  ;;  %v6893_v60 = vpop.f32.mrf.mxu1 }
 0x210   : > { %v2057_v17 = vpop.f32.mrf.mxu0 }
 0x211   : > { %8030 = vst [vmem:[#allocation50_spill] sm:$0xff] %v6879_v32  ;;  %v2333_v46 = vmax.f32 %v2269_v62, 0.0  ;;  %v2270_v63 = vadd.f32 %v6792_v2, %v2194_v25  ;;  %v2195_v4 = vadd.f32 %v2057_v17, %v1768_v28  ;;  %v6903_v42 = vpop.f32.mrf.mxu1  ;;  %v5757_v25 = vld [vmem:[%s7943_s5 + $0x4] ss:$8 sps:$4 sm:$0xff]  }
 0x212   : > { %v2061_v31 = vpop.f32.mrf.mxu0  ;;  %2656 = vmatprep.mubr.bf16.mxu1 %v5757_v25 }
 0x213   : > { %v6891_v57 = vmax.f32 %v2332_v44, %v2333_v46  ;;  %v2271_v23 = vadd.f32 %v6799_v12, %v2195_v4  ;;  %v2196_v36 = vadd.f32 %v2061_v31, %v1772_v27  ;;  %v2334_v11 = vmax.f32 %v2270_v63, 0.0  ;;  %v6916_v63 = vpop.f32.mrf.mxu1 }
 0x214   : > { %v2063_v8 = vpop.f32.mrf.mxu0  ;;  %v1784_v46 = vadd.f32 %v6760_v21, %v6647_v47  ;;  %v1786_v31 = vadd.f32 %v6764_v22, %v6649_v53  ;;  %v1788_v47 = vadd.f32 %v6770_v56, %v6651_v43  ;;  %v8036_v56 = vld [vmem:[#allocation2_spill] sm:$0xff] }
 0x215   : > { %8031 = vst [vmem:[#allocation51_spill] sm:$0xff] %v6891_v57  ;;  %v2335_v3 = vmax.f32 %v2271_v23, 0.0  ;;  %v2272_v14 = vadd.f32 %v6792_v2, %v2196_v36  ;;  %v2197_v61 = vadd.f32 %v2063_v8, %v1774_v48  ;;  %v6926_v21 = vpop.f32.mrf.mxu1  ;;  %v8071_v57 = vld [vmem:[#allocation24_spill] sm:$0xff] }
 0x216   : > { %v2065_v26 = vpop.f32.mrf.mxu0 }
 0x217   : > { %v6901_v59 = vmax.f32 %v2334_v11, %v2335_v3  ;;  %v2273_v54 = vadd.f32 %v6799_v12, %v2197_v61  ;;  %v2198_v28 = vadd.f32 %v2065_v26, %v1776_v50  ;;  %v2336_v30 = vmax.f32 %v2272_v14, 0.0  ;;  %v8035_v26 = vld [vmem:[#allocation40_spill] sm:$0xff] }
 0x218   : > { %v2067_v62 = vpop.f32.mrf.mxu0  ;;  %v1792_v53 = vadd.f32 %v8035_v26, %v6653_v55 }
 0x219   : > { %8032 = vst [vmem:[#allocation52_spill] sm:$0xff] %v6901_v59  ;;  %v2337_v27 = vmax.f32 %v2273_v54, 0.0  ;;  %v2274_v44 = vadd.f32 %v6792_v2, %v2198_v28  ;;  %v2199_v35 = vadd.f32 %v2067_v62, %v1778_v37  ;;  %v8037_v62 = vld [vmem:[#allocation42_spill] sm:$0xff] }
 0x21a   : > { %v2071_v17 = vpop.f32.mrf.mxu0  ;;  %v1794_v25 = vadd.f32 %v8037_v62, %v8036_v56  ;;  %v8044_v62 = vld [vmem:[#allocation6_spill] sm:$0xff] }
 0x21b   : > { %v6918_v41 = vmax.f32 %v2336_v30, %v2337_v27  ;;  %v2275_v33 = vadd.f32 %v6799_v12, %v2199_v35  ;;  %v2200_v4 = vadd.f32 %v2071_v17, %v1782_v51  ;;  %v2338_v23 = vmax.f32 %v2274_v44, 0.0  ;;  %v6938_v27 = vpop.f32.mrf.mxu1  ;;  %v8039_v17 = vld [vmem:[#allocation3_spill] sm:$0xff] }
 0x21c   : > { %v2073_v48 = vpop.f32.mrf.mxu0 }
 0x21d   : > { %8033 = vst [vmem:[#allocation53_spill] sm:$0xff] %v6918_v41  ;;  %v2339_v36 = vmax.f32 %v2275_v33, 0.0  ;;  %v2276_v50 = vadd.f32 %v6792_v2, %v2200_v4  ;;  %v2201_v8 = vadd.f32 %v2073_v48, %v1784_v46  ;;  %v8040_v46 = vld [vmem:[#allocation44_spill] sm:$0xff]  ;;  %v8074_v41 = vld [vmem:[#allocation26_spill] sm:$0xff] }
 0x21e   : > { %v2075_v11 = vpop.f32.mrf.mxu0  ;;  %v1796_v33 = vadd.f32 %v8040_v46, %v8039_v17  ;;  %v8046_v46 = vld [vmem:[#allocation7_spill] sm:$0xff] }
 0x21f   : > { %v6928_v3 = vmax.f32 %v2338_v23, %v2339_v36  ;;  %v2277_v14 = vadd.f32 %v6799_v12, %v2201_v8  ;;  %v2202_v61 = vadd.f32 %v2075_v11, %v1786_v31  ;;  %v2340_v22 = vmax.f32 %v2276_v50, 0.0  ;;  %v8041_v8 = vld [vmem:[#allocation4_spill] sm:$0xff] }
 0x220   : > { %v2077_v37 = vpop.f32.mrf.mxu0  ;;  %v1798_v11 = vadd.f32 %v6795_v49, %v8041_v8  ;;  %v8047_v8 = vld [vmem:[#allocation8_spill] sm:$0xff] }
 0x221   : > { %8034 = vst [vmem:[#allocation54_spill] sm:$0xff] %v6928_v3  ;;  %v2341_v54 = vmax.f32 %v2277_v14, 0.0  ;;  %v2278_v28 = vadd.f32 %v6792_v2, %v2202_v61  ;;  %v2203_v51 = vadd.f32 %v2077_v37, %v1788_v47  ;;  %v6948_v47 = vpop.f32.mrf.mxu1 }
 0x222   : > { %v2081_v43 = vpop.f32.mrf.mxu0 }
 0x223   : > { %v6940_v44 = vmax.f32 %v2340_v22, %v2341_v54  ;;  %v2279_v35 = vadd.f32 %v6799_v12, %v2203_v51  ;;  %v2204_v55 = vadd.f32 %v2081_v43, %v1792_v53  ;;  %v2342_v31 = vmax.f32 %v2278_v28, 0.0  ;;  %v8043_v53 = vld [vmem:[#allocation5_spill] sm:$0xff] }
 0x224   : > { %v2083_v4 = vpop.f32.mrf.mxu0  ;;  %v1802_v22 = vadd.f32 %v6803_v13, %v8043_v53 }
 0x225   : > { %8038 = vst [vmem:[#allocation40_spill] sm:$0xff] %v6940_v44  ;;  %v2343_v48 = vmax.f32 %v2279_v35, 0.0  ;;  %v2280_v23 = vadd.f32 %v6792_v2, %v2204_v55  ;;  %v2205_v36 = vadd.f32 %v2083_v4, %v1794_v25  ;;  %v1804_v25 = vadd.f32 %v6808_v58, %v8044_v62  ;;  %v6960_v35 = vpop.f32.mrf.mxu1  ;;  %v8050_v62 = vld [vmem:[#allocation10_spill] sm:$0xff] }
 0x226   : > { %v2085_v50 = vpop.f32.mrf.mxu0  ;;  %v1808_v58 = vadd.f32 %v6820_v6, %v8047_v8  ;;  %v8077_v44 = vld [vmem:[#allocation34_spill] sm:$0xff] }
 0x227   : > { %v6950_v14 = vmax.f32 %v2342_v31, %v2343_v48  ;;  %v2281_v61 = vadd.f32 %v6799_v12, %v2205_v36  ;;  %v2206_v26 = vadd.f32 %v2085_v50, %v1796_v33  ;;  %v2344_v37 = vmax.f32 %v2280_v23, 0.0 }
 0x228   : > { %v2087_v54 = vpop.f32.mrf.mxu0  ;;  %v1806_v33 = vadd.f32 %v6813_v1, %v8046_v46 }
 0x229   : > { %8042 = vst [vmem:[#allocation2_spill] sm:$0xff] %v6950_v14  ;;  %v2345_v28 = vmax.f32 %v2281_v61, 0.0  ;;  %v2282_v51 = vadd.f32 %v6792_v2, %v2206_v26  ;;  %v2207_v43 = vadd.f32 %v2087_v54, %v1798_v11  ;;  %v6970_v11 = vpop.f32.mrf.mxu1  ;;  %v8078_v14 = vld [vmem:[#allocation35_spill] sm:$0xff] }
 0x22a   : > { %v2091_v49 = vpop.f32.mrf.mxu0 }
 0x22b   : > { %v6962_v55 = vmax.f32 %v2344_v37, %v2345_v28  ;;  %v2283_v17 = vadd.f32 %v6799_v12, %v2207_v43  ;;  %v2208_v13 = vadd.f32 %v2091_v49, %v1802_v22  ;;  %v2346_v31 = vmax.f32 %v2282_v51, 0.0  ;;  %v8049_v22 = vld [vmem:[#allocation9_spill] sm:$0xff]  ;;  %v8065_v49 = vld [vmem:[#allocation18_spill] sm:$0xff] }
 0x22c   : > { %v2093_v4 = vpop.f32.mrf.mxu0  ;;  %v1812_v1 = vadd.f32 %v6825_v0, %v8049_v22 }
 0x22d   : > { %8045 = vst [vmem:[#allocation42_spill] sm:$0xff] %v6962_v55  ;;  %v2347_v48 = vmax.f32 %v2283_v17, 0.0  ;;  %v2284_v23 = vadd.f32 %v6792_v2, %v2208_v13  ;;  %v2209_v36 = vadd.f32 %v2093_v4, %v1804_v25  ;;  %v1814_v25 = vadd.f32 %v6832_v16, %v8050_v62  ;;  %v6982_v17 = vpop.f32.mrf.mxu1  ;;  %v8080_v55 = vld [vmem:[#allocation39_spill] sm:$0xff] }
 0x22e   : > { %v2095_v50 = vpop.f32.mrf.mxu0  ;;  %v7053_v62 = vadd.f32 %v6893_v60, %v8065_v49  ;;  %v8070_v60 = vld [vmem:[#allocation23_spill] sm:$0xff] }
 0x22f   : > { %v6972_v61 = vmax.f32 %v2346_v31, %v2347_v48  ;;  %v2285_v26 = vadd.f32 %v6799_v12, %v2209_v36  ;;  %v2210_v53 = vadd.f32 %v2095_v50, %v1806_v33  ;;  %v2348_v37 = vmax.f32 %v2284_v23, 0.0  ;;  %v8052_v33 = vld [vmem:[#allocation11_spill] sm:$0xff] }
 0x230   : > { %v2097_v54 = vpop.f32.mrf.mxu0  ;;  %v1816_v4 = vadd.f32 %v6837_v9, %v8052_v33  ;;  %v7073_v49 = vadd.f32 %v6948_v47, %v8070_v60 }
 0x231   : > { %8048 = vst [vmem:[#allocation3_spill] sm:$0xff] %v6972_v61  ;;  %v2349_v28 = vmax.f32 %v2285_v26, 0.0  ;;  %v2286_v51 = vadd.f32 %v6792_v2, %v2210_v53  ;;  %v2211_v43 = vadd.f32 %v2097_v54, %v1808_v58  ;;  %v8053_v58 = vld [vmem:[#allocation12_spill] sm:$0xff]  ;;  %v6992_v26 = vpop.f32.mrf.mxu1 }
 0x232   : > { %v2101_v6 = vpop.f32.mrf.mxu0  ;;  %v1818_v16 = vadd.f32 %v6846_v39, %v8053_v58 }
 0x233   : > { %v6984_v13 = vmax.f32 %v2348_v37, %v2349_v28  ;;  %v2287_v46 = vadd.f32 %v6799_v12, %v2211_v43  ;;  %v2212_v0 = vadd.f32 %v2101_v6, %v1812_v1  ;;  %v2350_v48 = vmax.f32 %v2286_v51, 0.0  ;;  %v8055_v37 = vld [vmem:[#allocation13_spill] sm:$0xff] }
 0x234   : > { %v2103_v31 = vpop.f32.mrf.mxu0  ;;  %v1822_v9 = vadd.f32 %v6851_v38, %v8055_v37 }
 0x235   : > { %8051 = vst [vmem:[#allocation44_spill] sm:$0xff] %v6984_v13  ;;  %v2351_v23 = vmax.f32 %v2287_v46, 0.0  ;;  %v2288_v36 = vadd.f32 %v6792_v2, %v2212_v0  ;;  %v2213_v50 = vadd.f32 %v2103_v31, %v1814_v25  ;;  %v8056_v25 = vld [vmem:[#allocation14_spill] sm:$0xff]  ;;  %v7004_v0 = vpop.f32.mrf.mxu1  ;;  %v8058_v31 = vld [vmem:[#allocation15_spill] sm:$0xff] }
 0x236   : > { %v2105_v8 = vpop.f32.mrf.mxu0  ;;  %v1824_v46 = vadd.f32 %v6858_v15, %v8056_v25 }
 0x237   : > { %v6994_v53 = vmax.f32 %v2350_v48, %v2351_v23  ;;  %v2289_v22 = vadd.f32 %v6799_v12, %v2213_v50  ;;  %v2214_v1 = vadd.f32 %v2105_v8, %v1816_v4  ;;  %v2352_v54 = vmax.f32 %v2288_v36, 0.0 }
 0x238   : > { %v2107_v28 = vpop.f32.mrf.mxu0  ;;  %v1826_v48 = vadd.f32 %v6863_v29, %v8058_v31 }
 0x239   : > { %8054 = vst [vmem:[#allocation4_spill] sm:$0xff] %v6994_v53  ;;  %v2353_v51 = vmax.f32 %v2289_v22, 0.0  ;;  %v2290_v43 = vadd.f32 %v6792_v2, %v2214_v1  ;;  %v2215_v6 = vadd.f32 %v2107_v28, %v1818_v16  ;;  %v8059_v22 = vld [vmem:[#allocation16_spill] sm:$0xff]  ;;  %v7014_v1 = vpop.f32.mrf.mxu1 }
 0x23a   : > { %v2111_v39 = vpop.f32.mrf.mxu0  ;;  %v1828_v15 = vadd.f32 %v6872_v52, %v8059_v22 }
 0x23b   : > { %v7006_v33 = vmax.f32 %v2352_v54, %v2353_v51  ;;  %v2291_v4 = vadd.f32 %v6799_v12, %v2215_v6  ;;  %v2216_v38 = vadd.f32 %v2111_v39, %v1822_v9  ;;  %v2354_v36 = vmax.f32 %v2290_v43, 0.0  ;;  %v8061_v9 = vld [vmem:[#allocation17_spill] sm:$0xff] }
 0x23c   : > { %v2113_v23 = vpop.f32.mrf.mxu0  ;;  %v1832_v29 = vadd.f32 %v6882_v40, %v8061_v9 }
 0x23d   : > { %8057 = vst [vmem:[#allocation5_spill] sm:$0xff] %v7006_v33  ;;  %v2355_v50 = vmax.f32 %v2291_v4, 0.0  ;;  %v2292_v8 = vadd.f32 %v6792_v2, %v2216_v38  ;;  %v2217_v58 = vadd.f32 %v2113_v23, %v1824_v46  ;;  %v7024_v4 = vpop.f32.mrf.mxu1  ;;  %v7057_v33 = vadd.f32 %v6903_v42, %v8066_v18  ;;  %v8072_v42 = vld [vmem:[#allocation25_spill] sm:$0xff] }
 0x23e   : > { %v2115_v16 = vpop.f32.mrf.mxu0  ;;  %v1848_v18 = vadd.f32 %v6960_v35, %v8071_v57  ;;  %v8079_v57 = vld [vmem:[#allocation38_spill] sm:$0xff] }
 0x23f   : > { %v2293_v37 = vadd.f32 %v6799_v12, %v2217_v58  ;;  %v2218_v54 = vadd.f32 %v2115_v16, %v1826_v48  ;;  %v7017_v28 = vmax.f32 %v2354_v36, %v2355_v50  ;;  %v2356_v51 = vmax.f32 %v2292_v8, 0.0  ;;  %v1865_v8 = vpop.f32.mrf.mxu1 }
 0x240   : > { %v2117_v43 = vpop.f32.mrf.mxu0 }
 0x241   : > { %8060 = vst [vmem:[#allocation6_spill] sm:$0xff] %v7017_v28  ;;  %v2357_v6 = vmax.f32 %v2293_v37, 0.0  ;;  %v2294_v39 = vadd.f32 %v6792_v2, %v2218_v54  ;;  %v2219_v25 = vadd.f32 %v2117_v43, %v1828_v15  ;;  %v1867_v37 = vpop.f32.mrf.mxu1  ;;  %v8067_v28 = vld [vmem:[#allocation20_spill] sm:$0xff] }
 0x242   : > { %v2121_v52 = vpop.f32.mrf.mxu0  ;;  %v7061_v7 = vadd.f32 %v6916_v63, %v8067_v28  ;;  %v1852_v63 = vadd.f32 %v6970_v11, %v8072_v42  ;;  %v8073_v28 = vld [vmem:[#allocation36_spill] sm:$0xff] }
 0x243   : > { %v7026_v38 = vmax.f32 %v2356_v51, %v2357_v6  ;;  %v2295_v31 = vadd.f32 %v6799_v12, %v2219_v25  ;;  %v7029_v48 = vadd.f32 %v2121_v52, %v1832_v29  ;;  %v2358_v40 = vmax.f32 %v2294_v39, 0.0  ;;  %v1871_v29 = vpop.f32.mrf.mxu1 }
 0x244   : > { %v7031_v23 = vpop.f32.mrf.mxu0 }
 0x245   : > { %8062 = vst [vmem:[#allocation7_spill] sm:$0xff] %v7026_v38  ;;  %8063 = vst [vmem:[#allocation8_spill] sm:$0xff] %v7029_v48  ;;  %v2359_v36 = vmax.f32 %v2295_v31, 0.0  ;;  %v1873_v6 = vpop.f32.mrf.mxu1  ;;  %v7065_v38 = vadd.f32 %v6926_v21, %v8068_v45  ;;  %v1854_v45 = vadd.f32 %v6982_v17, %v8074_v41  ;;  %v8075_v21 = vld [vmem:[#allocation27_spill] sm:$0xff]  ;;  %v8082_v17 = vld [vmem:[#allocation32_spill] sm:$0xff] }
 0x246   : > { %v7033_v50 = vpop.f32.mrf.mxu0  ;;  %v1874_v47 = vadd.f32 %v1873_v6, %v8077_v44  ;;  %v1868_v61 = vadd.f32 %v1867_v37, %v8082_v17 }
 0x247   : > { %v7035_v58 = vmax.f32 %v2358_v40, %v2359_v36  ;;  %v1875_v52 = vpop.f32.mrf.mxu1 }
 0x248   : > { %v7037_v16 = vpop.f32.mrf.mxu0  ;;  %v1876_v48 = vadd.f32 %v1875_v52, %v8078_v14  ;;  %v8085_v52 = vld [vmem:[#allocation30_spill] sm:$0xff] }
 0x249   : > { %8064 = vst [vmem:[#allocation9_spill] sm:$0xff] %v7035_v58  ;;  %v1877_v36 = vpop.f32.mrf.mxu1  ;;  %v8069_v58 = vld [vmem:[#allocation22_spill] sm:$0xff] }
 0x24a   : > { %v7041_v15 = vpop.f32.mrf.mxu0  ;;  %v7069_v19 = vadd.f32 %v6938_v27, %v8069_v58  ;;  %v1878_v59 = vadd.f32 %v1877_v36, %v8073_v28  ;;  %v1856_v27 = vadd.f32 %v6992_v26, %v8075_v21  ;;  %v8076_v58 = vld [vmem:[#allocation28_spill] sm:$0xff]  ;;  %v8081_v28 = vld [vmem:[#allocation29_spill] sm:$0xff] }
 0x24b   : > { %v1881_v20 = vpop.f32.mrf.mxu1  ;;  %v1858_v3 = vadd.f32 %v7004_v0, %v8076_v58  ;;  %v1862_v41 = vadd.f32 %v7014_v1, %v8081_v28  ;;  %v8083_v26 = vld [vmem:[#allocation33_spill] sm:$0xff] }
 0x24c   : > { %v7043_v54 = vpop.f32.mrf.mxu0  ;;  %v1882_v35 = vadd.f32 %v1881_v20, %v8079_v57  ;;  %v1872_v21 = vadd.f32 %v1871_v29, %v8083_v26  ;;  %v8084_v58 = vld [vmem:[#allocation41_spill] sm:$0xff]  ;;  %v1864_v20 = vadd.f32 %v7024_v4, %v8085_v52 }
 0x24d   : > { %v1883_v34 = vpop.f32.mrf.mxu1 }
 0x24e   : > { %v7045_v9 = vpop.f32.mrf.mxu0  ;;  %v1884_v11 = vadd.f32 %v1883_v34, %v8080_v55  ;;  %v8086_v34 = vld [vmem:[#allocation31_spill] sm:$0xff] }
 0x24f   : > { %v1885_v5 = vpop.f32.mrf.mxu1  ;;  %v1866_v55 = vadd.f32 %v1865_v8, %v8086_v34 }
 0x250   : > { %v2137_v51 = vpop.f32.mrf.mxu0  ;;  %v1886_v44 = vadd.f32 %v1885_v5, %v8084_v58 }
 0x251   : > { %v1887_v42 = vpop.f32.mrf.mxu1 }
 0x252   : > { %v7047_v43 = vpop.f32.mrf.mxu0 }
 0x254   : > { %v2143_v39 = vpop.f32.mrf.mxu0 }
 0x256   : > { %v7049_v25 = vpop.f32.mrf.mxu0 }
 0x258   : > { %v2147_v31 = vpop.f32.mrf.mxu0 }
 0x25a   : > { %v2151_v40 = vpop.f32.mrf.mxu0 }
 0x25c   : > { %v2153_v10 = vpop.f32.mrf.mxu0 }
 0x25d   : > { %v2233_v5 = vadd.f32 %v2153_v10, %v1864_v20 }
 0x25e   : > { %v2155_v46 = vpop.f32.mrf.mxu0 }
 0x260   : > { %v2157_v22 = vpop.f32.mrf.mxu0 }
 0x261   : > { %v2235_v57 = vadd.f32 %v2157_v22, %v1868_v61  ;;  %v2229_v22 = vadd.f32 %v2143_v39, %v1854_v45 }
 0x262   : > { %v2161_v24 = vpop.f32.mrf.mxu0 }
 0x263   : > { %v2236_v28 = vadd.f32 %v2161_v24, %v1872_v21  ;;  %v2231_v24 = vadd.f32 %v2147_v31, %v1858_v3  ;;  %v2228_v31 = vadd.f32 %v7047_v43, %v1852_v63 }
 0x264   : > { %v2163_v30 = vpop.f32.mrf.mxu0 }
 0x265   : > { %v2237_v13 = vadd.f32 %v2163_v30, %v1874_v47  ;;  %v2227_v47 = vadd.f32 %v2137_v51, %v1848_v18  ;;  %v2309_v18 = vadd.f32 %v6799_v12, %v2233_v5 }
 0x266   : > { %v2165_v56 = vpop.f32.mrf.mxu0 }
 0x267   : > { %v2238_v6 = vadd.f32 %v2165_v56, %v1876_v48  ;;  %v2234_v56 = vadd.f32 %v2155_v46, %v1866_v55  ;;  %v2313_v48 = vadd.f32 %v6799_v12, %v2237_v13  ;;  %v2230_v13 = vadd.f32 %v7049_v25, %v1856_v27 }
 0x268   : > { %v2167_v32 = vpop.f32.mrf.mxu0  ;;  %v2225_v27 = vadd.f32 %v7043_v54, %v7069_v19  ;;  %v2373_v43 = vmax.f32 %v2309_v18, 0.0  ;;  %v2223_v55 = vadd.f32 %v7037_v16, %v7061_v7  ;;  %v2304_v19 = vadd.f32 %v6792_v2, %v2228_v31  ;;  %v8088_v16 = vld [vmem:[#allocation4_spill] sm:$0xff]  ;;  %v8098_v31 = vld [vmem:[#allocation54_spill] sm:$0xff] }
 0x269   : > { %v2239_v36 = vadd.f32 %v2167_v32, %v1878_v59  ;;  %v8087_v32 = vld [vmem:[#allocation43_spill] sm:$0xff]  ;;  %v2314_v4 = vadd.f32 %v6792_v2, %v2238_v6  ;;  %v2377_v17 = vmax.f32 %v2313_v48, 0.0  ;;  %v2226_v6 = vadd.f32 %v7045_v9, %v7073_v49  ;;  %v8096_v18 = vld [vmem:[#allocation40_spill] sm:$0xff] }
 0x26a   : > { %v2171_v60 = vpop.f32.mrf.mxu0  ;;  %v1888_v59 = vadd.f32 %v1887_v42, %v8087_v32  ;;  %v2311_v42 = vadd.f32 %v6799_v12, %v2235_v57  ;;  %v2306_v52 = vadd.f32 %v6792_v2, %v2230_v13  ;;  %v2224_v32 = vadd.f32 %v7041_v15, %v7065_v38  ;;  %v8095_v13 = vld [vmem:[#allocation2_spill] sm:$0xff] }
 0x26b   : > { %v2240_v53 = vadd.f32 %v2171_v60, %v1882_v35  ;;  %v2315_v37 = vadd.f32 %v6799_v12, %v2239_v36  ;;  %v2312_v36 = vadd.f32 %v6792_v2, %v2236_v28  ;;  %v2378_v26 = vmax.f32 %v2314_v4, 0.0  ;;  %v8092_v4 = vld [vmem:[#allocation42_spill] sm:$0xff] }
 0x26c   : > { %v2173_v0 = vpop.f32.mrf.mxu0  ;;  %v2222_v28 = vadd.f32 %v7033_v50, %v7057_v33  ;;  %v2301_v7 = vadd.f32 %v6799_v12, %v2225_v27  ;;  %v2302_v15 = vadd.f32 %v6792_v2, %v2226_v6  ;;  %v2299_v5 = vadd.f32 %v6799_v12, %v2223_v55  ;;  %v8105_v27 = vld [vmem:[#allocation49_spill] sm:$0xff]  ;;  %v8113_v55 = vld [vmem:[#allocation6_spill] sm:$0xff] }
 0x26d   : > { %v2241_v14 = vadd.f32 %v2173_v0, %v1884_v11  ;;  %v2316_v8 = vadd.f32 %v6792_v2, %v2240_v53  ;;  %v2232_v11 = vadd.f32 %v2151_v40, %v1862_v41  ;;  %v2379_v51 = vmax.f32 %v2315_v37, 0.0  ;;  %v8089_v37 = vld [vmem:[#allocation44_spill] sm:$0xff] }
 0x26e   : > { %v2175_v1 = vpop.f32.mrf.mxu0  ;;  %v2310_v53 = vadd.f32 %v6792_v2, %v2234_v56  ;;  %v2307_v40 = vadd.f32 %v6799_v12, %v2231_v24  ;;  %v2375_v41 = vmax.f32 %v2311_v42, 0.0  ;;  %v2376_v0 = vmax.f32 %v2312_v36, 0.0 }
 0x26f   : > { %v2317_v30 = vadd.f32 %v6799_v12, %v2241_v14  ;;  %v2242_v29 = vadd.f32 %v2175_v1, %v1886_v44  ;;  %v2380_v21 = vmax.f32 %v2316_v8, 0.0  ;;  %v2308_v45 = vadd.f32 %v6792_v2, %v2232_v11  ;;  %v8094_v11 = vld [vmem:[#allocation8_spill] sm:$0xff] }
 0x270   : > { %v2177_v60 = vpop.f32.mrf.mxu0  ;;  %v2413_v58 = vmax.f32 %v2378_v26, %v2379_v51  ;;  %v2305_v14 = vadd.f32 %v6799_v12, %v2229_v22  ;;  %v2374_v63 = vmax.f32 %v2310_v53, 0.0  ;;  %v2412_v20 = vmax.f32 %v2376_v0, %v2377_v17  ;;  %v8101_v0 = vld [vmem:[#allocation52_spill] sm:$0xff] }
 0x271   : > { %v2318_v35 = vadd.f32 %v6792_v2, %v2242_v29  ;;  %v2243_v61 = vadd.f32 %v2177_v60, %v1888_v59  ;;  %v2381_v10 = vmax.f32 %v2317_v30, 0.0  ;;  %v2303_v59 = vadd.f32 %v6799_v12, %v2227_v47  ;;  %v8091_v60 = vld [vmem:[#allocation3_spill] sm:$0xff] }
 0x272   : > { %v2371_v54 = vmax.f32 %v2307_v40, 0.0  ;;  %v2372_v9 = vmax.f32 %v2308_v45, 0.0  ;;  %v2411_v49 = vmax.f32 %v2374_v63, %v2375_v41  ;;  %v2430_v57 = vpack.c.bf16 %v2413_v58, %v2412_v20  ;;  %v8099_v40 = vld [vmem:[#allocation53_spill] sm:$0xff]  ;;  %v8102_v58 = vld [vmem:[#allocation51_spill] sm:$0xff]  ;;  %v8110_v63 = vld [vmem:[#allocation48_spill] sm:$0xff] }
 0x273   : > { %v2319_v46 = vadd.f32 %v6799_v12, %v2243_v61  ;;  %v2382_v39 = vmax.f32 %v2318_v35, 0.0  ;;  %v2414_v44 = vmax.f32 %v2380_v21, %v2381_v10  ;;  %v2221_v1 = vadd.f32 %v7031_v23, %v7053_v62  ;;  %v8111_v20 = vld [vmem:[#allocation47_spill] sm:$0xff] }
 0x274   : > { %v8090_v38 = vpack.c.bf16 %v8088_v16, %v8089_v37  ;;  %v2369_v30 = vmax.f32 %v2305_v14, 0.0  ;;  %v2370_v29 = vmax.f32 %v2306_v52, 0.0  ;;  %v2410_v47 = vmax.f32 %v2372_v9, %v2373_v43  ;;  %v8107_v14 = vld [vmem:[#allocation9_spill] sm:$0xff]  ;;  %v8108_v52 = vld [vmem:[#allocation7_spill] sm:$0xff] }
 0x275   : > { %v2383_v3 = vmax.f32 %v2319_v46, 0.0  ;;  %v2300_v56 = vadd.f32 %v6792_v2, %v2224_v32  ;;  %v2367_v62 = vmax.f32 %v2303_v59, 0.0  ;;  %v2368_v23 = vmax.f32 %v2304_v19, 0.0  ;;  %v8114_v32 = vld [vmem:[#allocation5_spill] sm:$0xff]  ;;  %v5755_v19 = vld [vmem:[%s7943_s5] ss:$8 sps:$4 sm:$0xff]  }
 0x276   : > { %v2409_v48 = vmax.f32 %v2370_v29, %v2371_v54  ;;  %v2429_v33 = vpack.c.bf16 %v2411_v49, %v2410_v47  ;;  %v2297_v50 = vadd.f32 %v6799_v12, %v2221_v1  ;;  %v8093_v8 = vpack.c.bf16 %v8091_v60, %v8092_v4  ;;  %v8116_v54 = vld [vmem:[#allocation46_spill] sm:$0xff]  ;;  %v8117_v9 = vld [vmem:[#allocation45_spill] sm:$0xff] }
 0x277   : > { %v2415_v25 = vmax.f32 %v2382_v39, %v2383_v3  ;;  %v2298_v35 = vadd.f32 %v6792_v2, %v2222_v28  ;;  %v2365_v61 = vmax.f32 %v2301_v7, 0.0  ;;  %v2366_v22 = vmax.f32 %v2302_v15, 0.0  ;;  %v5758_v1 = vld [vmem:[%s7943_s5 + $0x10] ss:$8 sps:$4 sm:$0xff]   ;;  %v5763_v28 = vld [vmem:[%s7943_s5 + $0x24] ss:$8 sps:$4 sm:$0xff]  }
 0x278   : > { %v2408_v24 = vmax.f32 %v2368_v23, %v2369_v30  ;;  %v2296_v42 = vadd.f32 %v6792_v2, %v8094_v11  ;;  %v2363_v36 = vmax.f32 %v2299_v5, 0.0  ;;  %v2364_v51 = vmax.f32 %v2300_v56, 0.0  ;;  %v5761_v7 = vld [vmem:[%s7943_s5 + $0x20] ss:$8 sps:$4 sm:$0xff]   ;;  %v5766_v16 = vld [vmem:[%s7943_s5 + $0x34] ss:$8 sps:$4 sm:$0xff]  }
 0x279   : > { %v2431_v34 = vpack.c.bf16 %v2415_v25, %v2414_v44  ;;  %v2407_v10 = vmax.f32 %v2366_v22, %v2367_v62  ;;  %v8097_v12 = vpack.c.bf16 %v8095_v13, %v8096_v18  ;;  %v2361_v53 = vmax.f32 %v2297_v50, 0.0  ;;  %v8104_v25 = vld [vmem:[#allocation50_spill] sm:$0xff]  ;;  %v5764_v37 = vld [vmem:[%s7943_s5 + $0x30] ss:$8 sps:$4 sm:$0xff]   ;;  %v5772_v30 = vld [vmem:[%s7943_s5 + $0x54] ss:$8 sps:$4 sm:$0xff]  }
 0x27a   : > { %v2428_v46 = vpack.c.bf16 %v2409_v48, %v2408_v24  ;;  %v2362_v17 = vmax.f32 %v2298_v35, 0.0  ;;  %v2406_v26 = vmax.f32 %v2364_v51, %v2365_v61  ;;  %v2360_v21 = vmax.f32 %v2296_v42, 0.0  ;;  %v5767_v15 = vld [vmem:[%s7943_s5 + $0x40] ss:$8 sps:$4 sm:$0xff]   ;;  %v5770_v29 = vld [vmem:[%s7943_s5 + $0x50] ss:$8 sps:$4 sm:$0xff]  }
 0x27b   : > { %5188 = vmatprep.subr.bf16.mxu1 %v2431_v34  ;;  %v8100_v45 = vpack.c.bf16 %v8098_v31, %v8099_v40  ;;  %v8103_v44 = vpack.c.bf16 %v8101_v0, %v8102_v58  ;;  %v8106_v6 = vpack.c.bf16 %v8104_v25, %v8105_v27  ;;  %v8109_v43 = vpack.c.bf16 %v8107_v14, %v8108_v52  ;;  %v5775_v47 = vld [vmem:[%s7943_s5 + $0x64] ss:$8 sps:$4 sm:$0xff]   ;;  %v5773_v5 = vld [vmem:[%s7943_s5 + $0x60] ss:$8 sps:$4 sm:$0xff]   ;;  %v5778_v56 = vld [vmem:[%s7943_s5 + $0x74] ss:$8 sps:$4 sm:$0xff]  }
 0x27c   : > { %5189 = vmatpush3.bf16.msra.mxu1 %v8090_v38  ;;  %v2405_v39 = vmax.f32 %v2362_v17, %v2363_v36  ;;  %v2427_v3 = vpack.c.bf16 %v2407_v10, %v2406_v26  ;;  %v2404_v2 = vmax.f32 %v2360_v21, %v2361_v53  ;;  %v8112_v34 = vpack.c.bf16 %v8110_v63, %v8111_v20  ;;  %v5769_v38 = vld [vmem:[%s7943_s5 + $0x44] ss:$8 sps:$4 sm:$0xff]   ;;  %v5776_v62 = vld [vmem:[%s7943_s5 + $0x70] ss:$8 sps:$4 sm:$0xff]   ;;  %v5779_v48 = vld [vmem:[%s7943_s5 + $0x80] ss:$8 sps:$4 sm:$0xff]  }
 0x27d   : > { %5190 = vmatprep.subr.bf16.mxu1 %v2430_v57  ;;  %v8115_v59 = vpack.c.bf16 %v8113_v55, %v8114_v32  ;;  %v8118_v49 = vpack.c.bf16 %v8116_v54, %v8117_v9  ;;  %v5760_v57 = vld [vmem:[%s7943_s5 + $0x14] ss:$8 sps:$4 sm:$0xff]   ;;  %v5781_v23 = vld [vmem:[%s7943_s5 + $0x84] ss:$8 sps:$4 sm:$0xff]   ;;  %v5782_v50 = vld [vmem:[%s7943_s5 + $0x90] ss:$8 sps:$4 sm:$0xff]  }
 0x27e   : > { %v2426_v41 = vpack.c.bf16 %v2405_v39, %v2404_v2  ;;  %v5787_v60 = vld [vmem:[%s7943_s5 + $0xa4] ss:$8 sps:$4 sm:$0xff]   ;;  %v5785_v4 = vld [vmem:[%s7943_s5 + $0xa0] ss:$8 sps:$4 sm:$0xff]   ;;  %v5788_v35 = vld [vmem:[%s7943_s5 + $0xb0] ss:$8 sps:$4 sm:$0xff]  }
 0x27f   : > { %v5793_v61 = vld [vmem:[%s7943_s5 + $0xc4] ss:$8 sps:$4 sm:$0xff]   ;;  %v5791_v22 = vld [vmem:[%s7943_s5 + $0xc0] ss:$8 sps:$4 sm:$0xff]   ;;  %v5796_v24 = vld [vmem:[%s7943_s5 + $0xd4] ss:$8 sps:$4 sm:$0xff]  }
 0x280   : > { %5191 = vmatpush3.bf16.msra.mxu1 %v8093_v8  ;;  %v5790_v8 = vld [vmem:[%s7943_s5 + $0xb4] ss:$8 sps:$4 sm:$0xff]   ;;  %v5794_v11 = vld [vmem:[%s7943_s5 + $0xd0] ss:$8 sps:$4 sm:$0xff]   ;;  %v5799_v42 = vld [vmem:[%s7943_s5 + $0xe4] ss:$8 sps:$4 sm:$0xff]  }
 0x281   : > { %5192 = vmatprep.subr.bf16.mxu1 %v2429_v33  ;;  %v5784_v33 = vld [vmem:[%s7943_s5 + $0x94] ss:$8 sps:$4 sm:$0xff]   ;;  %v5797_v36 = vld [vmem:[%s7943_s5 + $0xe0] ss:$8 sps:$4 sm:$0xff]   ;;  %v5800_v10 = vld [vmem:[%s7943_s5 + $0xf0] ss:$8 sps:$4 sm:$0xff]  }
 0x282   : > { %v5802_v51 = vld [vmem:[%s7943_s5 + $0xf4] ss:$8 sps:$4 sm:$0xff]   ;;  %v5803_v52 = vld [vmem:[%s7946_s8] sm:$0xff]  }
 0x283   : > { %5400 = vmatprep.mubr.bf16.mxu0 %v5803_v52 }
 0x284   : > { %5193 = vmatpush3.bf16.msra.mxu1 %v8097_v12 }
 0x285   : > { %5194 = vmatprep.subr.bf16.mxu1 %v2428_v46 }
 0x288   : > { %5195 = vmatpush3.bf16.msra.mxu1 %v8100_v45 }
 0x289   : > { %5196 = vmatprep.subr.bf16.mxu1 %v2427_v3 }
 0x28c   : > { %5197 = vmatpush3.bf16.msra.mxu1 %v8103_v44 }
 0x28d   : > { %5198 = vmatprep.subr.bf16.mxu1 %v2426_v41 }
 0x290   : > { %5199 = vmatpush3.bf16.msra.mxu1 %v8106_v6 }
 0x291   : > { %5200 = vmatprep.subr.bf16.mxu1 %v8109_v43  ;;  %v5808_v43 = vld [vmem:[%s7947_s9] sm:$0xff]  }
 0x294   : > { %5201 = vmatpush3.bf16.msra.mxu1 %v8112_v34 }
 0x295   : > { %5202 = vmatprep.subr.bf16.mxu1 %v8115_v59 }
 0x298   : > { %5203 = vmatpush3.bf16.msra.mxu1 %v8118_v49 }
 0x29b   : > { %2657 = vmatmul.mubr.bf16.vlgmr.msra.gmra.mxu1 %v5755_v19 }
 0x29c   : > { %2664 = vmatprep.mubr.bf16.mxu1 %v5760_v57 }
 0x2a3   : > { %2665 = vmatmul.mubr.bf16.gmra.mxu1 %v5758_v1 }
 0x2a4   : > { %2672 = vmatprep.mubr.bf16.mxu1 %v5763_v28 }
 0x2ab   : > { %2673 = vmatmul.mubr.bf16.gmra.mxu1 %v5761_v7 }
 0x2ac   : > { %2680 = vmatprep.mubr.bf16.mxu1 %v5766_v16 }
 0x2b3   : > { %2681 = vmatmul.mubr.bf16.gmra.mxu1 %v5764_v37 }
 0x2b4   : > { %2688 = vmatprep.mubr.bf16.mxu1 %v5769_v38 }
 0x2bb   : > { %2689 = vmatmul.mubr.bf16.gmra.mxu1 %v5767_v15 }
 0x2bc   : > { %2696 = vmatprep.mubr.bf16.mxu1 %v5772_v30 }
 0x2c3   : > { %2697 = vmatmul.mubr.bf16.gmra.mxu1 %v5770_v29 }
 0x2c4   : > { %2704 = vmatprep.mubr.bf16.mxu1 %v5775_v47 }
 0x2cb   : > { %2705 = vmatmul.mubr.bf16.gmra.mxu1 %v5773_v5 }
 0x2cc   : > { %2712 = vmatprep.mubr.bf16.mxu1 %v5778_v56 }
 0x2d3   : > { %2713 = vmatmul.mubr.bf16.gmra.mxu1 %v5776_v62 }
 0x2d4   : > { %2720 = vmatprep.mubr.bf16.mxu1 %v5781_v23 }
 0x2db   : > { %2721 = vmatmul.mubr.bf16.gmra.mxu1 %v5779_v48 }
 0x2dc   : > { %2728 = vmatprep.mubr.bf16.mxu1 %v5784_v33 }
 0x2e3   : > { %2729 = vmatmul.mubr.bf16.gmra.mxu1 %v5782_v50 }
 0x2e4   : > { %2736 = vmatprep.mubr.bf16.mxu1 %v5787_v60 }
 0x2eb   : > { %2737 = vmatmul.mubr.bf16.gmra.mxu1 %v5785_v4 }
 0x2ec   : > { %2744 = vmatprep.mubr.bf16.mxu1 %v5790_v8 }
 0x2f3   : > { %2745 = vmatmul.mubr.bf16.gmra.mxu1 %v5788_v35 }
 0x2f4   : > { %2752 = vmatprep.mubr.bf16.mxu1 %v5793_v61 }
 0x2fb   : > { %2753 = vmatmul.mubr.bf16.gmra.mxu1 %v5791_v22 }
 0x2fc   : > { %2760 = vmatprep.mubr.bf16.mxu1 %v5796_v24 }
 0x303   : > { %2761 = vmatmul.mubr.bf16.gmra.mxu1 %v5794_v11 }
 0x304   : > { %2768 = vmatprep.mubr.bf16.mxu1 %v5799_v42 }
 0x30b   : > { %2769 = vmatmul.mubr.bf16.gmra.mxu1 %v5797_v36 }
 0x30c   : > { %2776 = vmatprep.mubr.bf16.mxu1 %v5802_v51 }
 0x313   : > { %2777 = vmatmul.mubr.bf16.gmra.mxu1 %v5800_v10 }
 0x314   : > { %5432 = vmatprep.mubr.bf16.mxu1 %v5808_v43 }
 0x35b   : > { %v5204_v46 = vpop.f32.mrf.mxu1 }
 0x35d   : > { %v5205_v13 = vpop.f32.mrf.mxu1 }
 0x35e   : > { %v5206_v18 = vadd.f32 %v5205_v13, %v5204_v46 }
 0x35f   : > { %v5207_v12 = vpop.f32.mrf.mxu1 }
 0x361   : > { %v5208_v53 = vpop.f32.mrf.mxu1 }
 0x362   : > { %v5209_v33 = vadd.f32 %v5208_v53, %v5207_v12 }
 0x363   : > { %v5210_v17 = vpop.f32.mrf.mxu1 }
 0x365   : > { %v5211_v26 = vpop.f32.mrf.mxu1 }
 0x366   : > { %v5212_v21 = vadd.f32 %v5211_v26, %v5210_v17 }
 0x367   : > { %v5213_v39 = vpop.f32.mrf.mxu1 }
 0x369   : > { %v5214_v3 = vpop.f32.mrf.mxu1 }
 0x36a   : > { %v5215_v42 = vadd.f32 %v5214_v3, %v5213_v39 }
 0x36b   : > { %v5216_v31 = vpop.f32.mrf.mxu1 }
 0x36d   : > { %v5217_v40 = vpop.f32.mrf.mxu1 }
 0x36e   : > { %v7261_v45 = vadd.f32 %v5217_v40, %v5216_v31 }
 0x36f   : > { %v5219_v2 = vpop.f32.mrf.mxu1 }
 0x371   : > { %v5220_v41 = vpop.f32.mrf.mxu1 }
 0x372   : > { %v5221_v26 = vadd.f32 %v5220_v41, %v5219_v2 }
 0x373   : > { %v5222_v0 = vpop.f32.mrf.mxu1 }
 0x375   : > { %v5223_v58 = vpop.f32.mrf.mxu1 }
 0x376   : > { %v7263_v44 = vadd.f32 %v5223_v58, %v5222_v0 }
 0x377   : > { %v7265_v25 = vpop.f32.mrf.mxu1 }
 0x379   : > { %v5226_v27 = vpop.f32.mrf.mxu1 }
 0x37b   : > { %v5228_v6 = vpop.f32.mrf.mxu1 }
 0x37d   : > { %v5229_v14 = vpop.f32.mrf.mxu1 }
 0x37e   : > { %v7273_v63 = vadd.f32 %v5229_v14, %v5228_v6  ;;  %v5227_v14 = vadd.f32 %v5226_v27, %v7265_v25 }
 0x37f   : > { %v7275_v20 = vpop.f32.mrf.mxu1 }
 0x381   : > { %v7277_v34 = vpop.f32.mrf.mxu1 }
 0x383   : > { %v5234_v55 = vpop.f32.mrf.mxu1 }
 0x385   : > { %v5235_v32 = vpop.f32.mrf.mxu1 }
 0x386   : > { %v7279_v59 = vadd.f32 %v5235_v32, %v5234_v55 }
 0x387   : > { %v7281_v19 = vpop.f32.mrf.mxu1 }
 0x389   : > { %v7283_v54 = vpop.f32.mrf.mxu1 }
 0x38b   : > { %v5240_v9 = vpop.f32.mrf.mxu1 }
 0x38d   : > { %v5241_v49 = vpop.f32.mrf.mxu1 }
 0x38e   : > { %v7285_v57 = vadd.f32 %v5241_v49, %v5240_v9 }
 0x38f   : > { %v5243_v1 = vpop.f32.mrf.mxu1 }
 0x391   : > { %v5244_v28 = vpop.f32.mrf.mxu1 }
 0x392   : > { %v7287_v7 = vadd.f32 %v5244_v28, %v5243_v1  ;;  %v5233_v1 = vadd.f32 %v7277_v34, %v7275_v20 }
 0x393   : > { %v5246_v16 = vpop.f32.mrf.mxu1 }
 0x395   : > { %v5247_v37 = vpop.f32.mrf.mxu1 }
 0x396   : > { %v7289_v38 = vadd.f32 %v5247_v37, %v5246_v16 }
 0x397   : > { %v5249_v15 = vpop.f32.mrf.mxu1 }
 0x399   : > { %v5250_v30 = vpop.f32.mrf.mxu1 }
 0x39a   : > { %v7291_v29 = vadd.f32 %v5250_v30, %v5249_v15 }
 0x39b   : > { %v5252_v47 = vpop.f32.mrf.mxu1 }
 0x39d   : > { %v5253_v5 = vpop.f32.mrf.mxu1 }
 0x39e   : > { %v5254_v56 = vadd.f32 %v5253_v5, %v5252_v47  ;;  %v5239_v5 = vadd.f32 %v7283_v54, %v7281_v19 }
 0x39f   : > { %v5255_v62 = vpop.f32.mrf.mxu1 }
 0x3a0   : > { %v2785_v23 = vmax.f32 %v5206_v18, %v5254_v56 }
 0x3a1   : > { %v5256_v48 = vpop.f32.mrf.mxu1 }
 0x3a2   : > { %v5257_v50 = vadd.f32 %v5256_v48, %v5255_v62 }
 0x3a3   : > { %v5258_v60 = vpop.f32.mrf.mxu1 }
 0x3a4   : > { %v2786_v4 = vmax.f32 %v5209_v33, %v5257_v50 }
 0x3a5   : > { %v5259_v8 = vpop.f32.mrf.mxu1 }
 0x3a6   : > { %v7293_v35 = vpack.c.bf16 %v2786_v4, %v2785_v23  ;;  %v5260_v61 = vadd.f32 %v5259_v8, %v5258_v60 }
 0x3a7   : > { %v5261_v22 = vpop.f32.mrf.mxu1 }
 0x3a8   : > { %v2787_v24 = vmax.f32 %v5212_v21, %v5260_v61 }
 0x3a9   : > { %v5262_v11 = vpop.f32.mrf.mxu1 }
 0x3aa   : > { %v5263_v36 = vadd.f32 %v5262_v11, %v5261_v22 }
 0x3ab   : > { %v5264_v51 = vpop.f32.mrf.mxu1 }
 0x3ac   : > { %v2788_v10 = vmax.f32 %v5215_v42, %v5263_v36 }
 0x3ad   : > { %v5265_v46 = vpop.f32.mrf.mxu1 }
 0x3ae   : > { %v7295_v13 = vpack.c.bf16 %v2788_v10, %v2787_v24  ;;  %v5266_v18 = vadd.f32 %v5265_v46, %v5264_v51  ;;  %v5805_v10 = vld [vmem:[%s7944_s6 + $0xf0] ss:$8 sps:$4 sm:$0xff]  }
 0x3af   : > { %v5267_v17 = vpop.f32.mrf.mxu1  ;;  %v5813_v46 = vld [vmem:[%s7946_s8 + $0x10] sm:$0xff]  }
 0x3b0   : > { %v2789_v12 = vmax.f32 %v7261_v45, %v5266_v18  ;;  %v5812_v18 = vld [vmem:[%s7944_s6 + $0xe4] ss:$8 sps:$4 sm:$0xff]  }
 0x3b1   : > { %v5268_v53 = vpop.f32.mrf.mxu1 }
 0x3b2   : > { %v5269_v31 = vadd.f32 %v5268_v53, %v5267_v17  ;;  %v5826_v17 = vld [vmem:[%s7947_s9 + $0x10] sm:$0xff]   ;;  %v5851_v53 = vld [vmem:[%s7944_s6 + $0x64] ss:$8 sps:$4 sm:$0xff]  }
 0x3b3   : > { %v5270_v40 = vpop.f32.mrf.mxu1 }
 0x3b4   : > { %v2790_v0 = vmax.f32 %v5221_v26, %v5269_v31  ;;  %v5810_v26 = vld [vmem:[%s7944_s6 + $0xe0] ss:$8 sps:$4 sm:$0xff]   ;;  %v5817_v31 = vld [vmem:[%s7944_s6 + $0xd4] ss:$8 sps:$4 sm:$0xff]  }
 0x3b5   : > { %v5271_v58 = vpop.f32.mrf.mxu1 }
 0x3b6   : > { %v7298_v6 = vpack.c.bf16 %v2790_v0, %v2789_v12  ;;  %v5272_v39 = vadd.f32 %v5271_v58, %v5270_v40  ;;  %v5843_v12 = vld [vmem:[%s7944_s6 + $0x70] ss:$8 sps:$4 sm:$0xff]   ;;  %v5849_v40 = vld [vmem:[%s7944_s6 + $0x60] ss:$8 sps:$4 sm:$0xff]  }
 0x3b7   : > { %v5273_v21 = vpop.f32.mrf.mxu1  ;;  %v5814_v0 = vld [vmem:[%s7946_s8 + $0x18] sm:$0xff]  }
 0x3b8   : > { %v2791_v55 = vmax.f32 %v7263_v44, %v5272_v39  ;;  %v5827_v58 = vld [vmem:[%s7947_s9 + $0x18] sm:$0xff]   ;;  %v5821_v39 = vld [vmem:[%s7946_s8 + $0x20] sm:$0xff]  }
 0x3b9   : > { %v5274_v3 = vpop.f32.mrf.mxu1 }
 0x3ba   : > { %v5275_v52 = vadd.f32 %v5274_v3, %v5273_v21  ;;  %v5815_v21 = vld [vmem:[%s7944_s6 + $0xd0] ss:$8 sps:$4 sm:$0xff]   ;;  %v5820_v3 = vld [vmem:[%s7944_s6 + $0xc4] ss:$8 sps:$4 sm:$0xff]  }
 0x3bb   : > { %v5276_v43 = vpop.f32.mrf.mxu1 }
 0x3bc   : > { %v2792_v32 = vmax.f32 %v5227_v14, %v5275_v52  ;;  %v5839_v14 = vld [vmem:[%s7947_s9 + $0x20] sm:$0xff]   ;;  %v5857_v52 = vld [vmem:[%s7944_s6 + $0x54] ss:$8 sps:$4 sm:$0xff]  }
 0x3bd   : > { %v5277_v9 = vpop.f32.mrf.mxu1 }
 0x3be   : > { %v7302_v45 = vpack.c.bf16 %v2792_v32, %v2791_v55  ;;  %v5278_v41 = vadd.f32 %v5277_v9, %v5276_v43  ;;  %v5855_v43 = vld [vmem:[%s7944_s6 + $0x50] ss:$8 sps:$4 sm:$0xff]   ;;  %v5818_v55 = vld [vmem:[%s7944_s6 + $0xc0] ss:$8 sps:$4 sm:$0xff]   ;;  %v5863_v32 = vld [vmem:[%s7944_s6 + $0x44] ss:$8 sps:$4 sm:$0xff]  }
 0x3bf   : > { %v5279_v2 = vpop.f32.mrf.mxu1  ;;  %v5825_v9 = vld [vmem:[%s7944_s6 + $0xb4] ss:$8 sps:$4 sm:$0xff]  }
 0x3c0   : > { %v2793_v37 = vmax.f32 %v7273_v63, %v5278_v41  ;;  %v5840_v41 = vld [vmem:[%s7947_s9 + $0x28] sm:$0xff]  }
 0x3c1   : > { %v5280_v49 = vpop.f32.mrf.mxu1 }
 0x3c2   : > { %v5281_v28 = vadd.f32 %v5280_v49, %v5279_v2  ;;  %v5822_v2 = vld [vmem:[%s7946_s8 + $0x28] sm:$0xff]   ;;  %v5823_v49 = vld [vmem:[%s7944_s6 + $0xb0] ss:$8 sps:$4 sm:$0xff]  }
 0x3c3   : > { %v5282_v16 = vpop.f32.mrf.mxu1 }
 0x3c4   : > { %v2794_v15 = vmax.f32 %v5233_v1, %v5281_v28  ;;  %v5831_v1 = vld [vmem:[%s7946_s8 + $0x30] sm:$0xff]   ;;  %v5830_v28 = vld [vmem:[%s7944_s6 + $0xa4] ss:$8 sps:$4 sm:$0xff]  }
 0x3c5   : > { %v5283_v25 = vpop.f32.mrf.mxu1 }
 0x3c6   : > { %v7307_v27 = vpack.c.bf16 %v2794_v15, %v2793_v37  ;;  %v5284_v44 = vadd.f32 %v5283_v25, %v5282_v16  ;;  %v5841_v16 = vld [vmem:[%s7947_s9 + $0x30] sm:$0xff]   ;;  %v5861_v37 = vld [vmem:[%s7944_s6 + $0x40] ss:$8 sps:$4 sm:$0xff]  }
 0x3c7   : > { %v5285_v30 = vpop.f32.mrf.mxu1  ;;  %v5869_v15 = vld [vmem:[%s7944_s6 + $0x34] ss:$8 sps:$4 sm:$0xff]   ;;  %v5828_v25 = vld [vmem:[%s7944_s6 + $0xa0] ss:$8 sps:$4 sm:$0xff]  }
 0x3c8   : > { %v2795_v23 = vmax.f32 %v7279_v59, %v5284_v44  ;;  %v5867_v44 = vld [vmem:[%s7944_s6 + $0x30] ss:$8 sps:$4 sm:$0xff]  }
 0x3c9   : > { %v5286_v47 = vpop.f32.mrf.mxu1 }
 0x3ca   : > { %v5287_v56 = vadd.f32 %v5286_v47, %v5285_v30  ;;  %v5835_v30 = vld [vmem:[%s7944_s6 + $0x94] ss:$8 sps:$4 sm:$0xff]  }
 0x3cb   : > { %v5288_v62 = vpop.f32.mrf.mxu1  ;;  %v5832_v47 = vld [vmem:[%s7946_s8 + $0x38] sm:$0xff]  }
 0x3cc   : > { %v2796_v48 = vmax.f32 %v5239_v5, %v5287_v56  ;;  %v5842_v5 = vld [vmem:[%s7947_s9 + $0x38] sm:$0xff]  }
 0x3cd   : > { %v5289_v20 = vpop.f32.mrf.mxu1  ;;  %v5833_v56 = vld [vmem:[%s7944_s6 + $0x90] ss:$8 sps:$4 sm:$0xff]  }
 0x3ce   : > { %v7312_v34 = vpack.c.bf16 %v2796_v48, %v2795_v23  ;;  %v5290_v63 = vadd.f32 %v5289_v20, %v5288_v62  ;;  %v5838_v62 = vld [vmem:[%s7944_s6 + $0x84] ss:$8 sps:$4 sm:$0xff]   ;;  %v5873_v48 = vld [vmem:[%s7944_s6 + $0x20] ss:$8 sps:$4 sm:$0xff]  }
 0x3cf   : > { %v5291_v33 = vpop.f32.mrf.mxu1  ;;  %v5875_v23 = vld [vmem:[%s7944_s6 + $0x24] ss:$8 sps:$4 sm:$0xff]   ;;  %v5836_v20 = vld [vmem:[%s7944_s6 + $0x80] ss:$8 sps:$4 sm:$0xff]  }
 0x3d0   : > { %v2797_v8 = vmax.f32 %v7285_v57, %v5290_v63  ;;  %v5807_v57 = vld [vmem:[%s7944_s6 + $0xf4] ss:$8 sps:$4 sm:$0xff]  }
 0x3d1   : > { %v5292_v50 = vpop.f32.mrf.mxu1  ;;  %v5848_v63 = vld [vmem:[%s7944_s6 + $0x174] ss:$8 sps:$4 sm:$0xff]  }
 0x3d2   : > { %v5293_v60 = vadd.f32 %v5292_v50, %v5291_v33  ;;  %v8119_v33 = vmov 0   ;;  %v5846_v50 = vld [vmem:[%s7944_s6 + $0x170] ss:$8 sps:$4 sm:$0xff]  }
 0x3d3   : > { %v5294_v4 = vpop.f32.mrf.mxu1 }
 0x3d4   : > { %v2798_v61 = vmax.f32 %v7287_v7, %v5293_v60  ;;  %v5845_v7 = vld [vmem:[%s7944_s6 + $0x74] ss:$8 sps:$4 sm:$0xff]   ;;  %v5854_v60 = vld [vmem:[%s7944_s6 + $0x164] ss:$8 sps:$4 sm:$0xff]  }
 0x3d5   : > { %v5295_v22 = vpop.f32.mrf.mxu1 }
 0x3d6   : > { %v7316_v24 = vpack.c.bf16 %v2798_v61, %v2797_v8  ;;  %v5296_v54 = vadd.f32 %v5295_v22, %v5294_v4  ;;  %v5852_v4 = vld [vmem:[%s7944_s6 + $0x160] ss:$8 sps:$4 sm:$0xff]   ;;  %v5860_v8 = vld [vmem:[%s7944_s6 + $0x154] ss:$8 sps:$4 sm:$0xff]   ;;  %v5858_v61 = vld [vmem:[%s7944_s6 + $0x150] ss:$8 sps:$4 sm:$0xff]  }
 0x3d7   : > { %v5297_v19 = vpop.f32.mrf.mxu1  ;;  %v5864_v22 = vld [vmem:[%s7944_s6 + $0x140] ss:$8 sps:$4 sm:$0xff]  }
 0x3d8   : > { %v2799_v42 = vmax.f32 %v7289_v38, %v5296_v54  ;;  %v5804_v38 = vld [vmem:[%s7946_s8 + $0x8] sm:$0xff]   ;;  %v5870_v54 = vld [vmem:[%s7944_s6 + $0x130] ss:$8 sps:$4 sm:$0xff]  }
 0x3d9   : > { %v5298_v11 = vpop.f32.mrf.mxu1 }
 0x3da   : > { %v5299_v59 = vadd.f32 %v5298_v11, %v5297_v19  ;;  %v5872_v19 = vld [vmem:[%s7944_s6 + $0x134] ss:$8 sps:$4 sm:$0xff]   ;;  %v5876_v11 = vld [vmem:[%s7944_s6 + $0x120] ss:$8 sps:$4 sm:$0xff]  }
 0x3dc   : > { %v2800_v36 = vmax.f32 %v7291_v29, %v5299_v59  ;;  %v5809_v29 = vld [vmem:[%s7947_s9 + $0x8] sm:$0xff]   ;;  %v5881_v59 = vld [vmem:[%s7944_s6 + $0x14] ss:$8 sps:$4 sm:$0xff]  }
 0x3de   : > { %v7320_v51 = vpack.c.bf16 %v2800_v36, %v2799_v42  ;;  %v5879_v42 = vld [vmem:[%s7944_s6 + $0x10] ss:$8 sps:$4 sm:$0xff]   ;;  %v5887_v36 = vld [vmem:[%s7944_s6 + $0x4] ss:$8 sps:$4 sm:$0xff]  }
 0x3e0   : > { %5384 = vmatprep.subr.bf16.mxu0 %v7320_v51  ;;  %5416 = vmatprep.subr.bf16.mxu1 %v7320_v51 }
 0x3e1   : > { %5385 = vmatpush3.bf16.msra.mxu0 %v7320_v51  ;;  %5417 = vmatpush3.bf16.msra.mxu1 %v7320_v51 }
 0x3e2   : > { %5386 = vmatprep.subr.bf16.mxu0 %v7316_v24  ;;  %5418 = vmatprep.subr.bf16.mxu1 %v7316_v24 }
 0x3e5   : > { %5387 = vmatpush3.bf16.msra.mxu0 %v7316_v24  ;;  %5419 = vmatpush3.bf16.msra.mxu1 %v7316_v24 }
 0x3e6   : > { %5388 = vmatprep.subr.bf16.mxu0 %v7312_v34  ;;  %5420 = vmatprep.subr.bf16.mxu1 %v7312_v34 }
 0x3e9   : > { %5389 = vmatpush3.bf16.msra.mxu0 %v7312_v34  ;;  %5421 = vmatpush3.bf16.msra.mxu1 %v7312_v34 }
 0x3ea   : > { %5390 = vmatprep.subr.bf16.mxu0 %v7307_v27  ;;  %5422 = vmatprep.subr.bf16.mxu1 %v7307_v27 }
 0x3ed   : > { %5391 = vmatpush3.bf16.msra.mxu0 %v7307_v27  ;;  %5423 = vmatpush3.bf16.msra.mxu1 %v7307_v27 }
 0x3ee   : > { %5392 = vmatprep.subr.bf16.mxu0 %v7302_v45  ;;  %5424 = vmatprep.subr.bf16.mxu1 %v7302_v45 }
 0x3f1   : > { %5393 = vmatpush3.bf16.msra.mxu0 %v7302_v45  ;;  %5425 = vmatpush3.bf16.msra.mxu1 %v7302_v45 }
 0x3f2   : > { %5394 = vmatprep.subr.bf16.mxu0 %v7298_v6  ;;  %5426 = vmatprep.subr.bf16.mxu1 %v7298_v6 }
 0x3f5   : > { %5395 = vmatpush3.bf16.msra.mxu0 %v7298_v6  ;;  %5427 = vmatpush3.bf16.msra.mxu1 %v7298_v6 }
 0x3f6   : > { %5396 = vmatprep.subr.bf16.mxu0 %v7295_v13  ;;  %5428 = vmatprep.subr.bf16.mxu1 %v7295_v13 }
 0x3f9   : > { %5397 = vmatpush3.bf16.msra.mxu0 %v7295_v13  ;;  %5429 = vmatpush3.bf16.msra.mxu1 %v7295_v13 }
 0x3fa   : > { %5398 = vmatprep.subr.bf16.mxu0 %v7293_v35  ;;  %5430 = vmatprep.subr.bf16.mxu1 %v7293_v35 }
 0x3fd   : > { %5399 = vmatpush3.bf16.msra.mxu0 %v7293_v35  ;;  %5431 = vmatpush3.bf16.msra.mxu1 %v7293_v35 }
 0x3fe   : > { %3260 = vmatprep.subr.bf16.mxu0 %v5807_v57  ;;  %3453 = vmatprep.subr.bf16.mxu1 %v5845_v7  ;;  %v5885_v57 = vld [vmem:[%s7944_s6] ss:$8 sps:$4 sm:$0xff]  }
 0x3ff   : > { %v5888_v7 = vld [vmem:[%s7944_s6 + $0x100] ss:$8 sps:$4 sm:$0xff]  }
 0x400   : > { %5401 = vmatmul.mubr.bf16.vlgmr.msra.gmra.mxu0 %v5804_v38  ;;  %5433 = vmatmul.mubr.bf16.vlgmr.msra.gmra.mxu1 %v5809_v29 }
 0x401   : > { %3261 = vmatpush1.bf16.msra.mxu0 %v5805_v10  ;;  %5404 = vmatprep.mubr.bf16.mxu0 %v5813_v46 }
 0x402   : > { %3262 = vmatprep.subr.bf16.mxu0 %v5812_v18  ;;  %5436 = vmatprep.mubr.bf16.mxu1 %v5826_v17 }
 0x403   : > { %3454 = vmatpush1.bf16.msra.mxu1 %v5843_v12 }
 0x404   : > { %3455 = vmatprep.subr.bf16.mxu1 %v5851_v53 }
 0x405   : > { %3263 = vmatpush1.bf16.msra.mxu0 %v5810_v26 }
 0x406   : > { %3264 = vmatprep.subr.bf16.mxu0 %v5817_v31 }
 0x407   : > { %3456 = vmatpush1.bf16.msra.mxu1 %v5849_v40 }
 0x408   : > { %5405 = vmatmul.mubr.bf16.gmra.mxu0 %v5814_v0  ;;  %5437 = vmatmul.mubr.bf16.gmra.mxu1 %v5827_v58 }
 0x409   : > { %3265 = vmatpush1.bf16.msra.mxu0 %v5815_v21  ;;  %5408 = vmatprep.mubr.bf16.mxu0 %v5821_v39 }
 0x40a   : > { %3266 = vmatprep.subr.bf16.mxu0 %v5820_v3  ;;  %5440 = vmatprep.mubr.bf16.mxu1 %v5839_v14 }
 0x40b   : > { %3457 = vmatprep.subr.bf16.mxu1 %v5857_v52 }
 0x40c   : > { %3458 = vmatpush1.bf16.msra.mxu1 %v5855_v43 }
 0x40d   : > { %3267 = vmatpush1.bf16.msra.mxu0 %v5818_v55  ;;  %3459 = vmatprep.subr.bf16.mxu1 %v5863_v32 }
 0x40e   : > { %3268 = vmatprep.subr.bf16.mxu0 %v5825_v9 }
 0x410   : > { %5409 = vmatmul.mubr.bf16.gmra.mxu0 %v5822_v2  ;;  %5441 = vmatmul.mubr.bf16.gmra.mxu1 %v5840_v41 }
 0x411   : > { %3269 = vmatpush1.bf16.msra.mxu0 %v5823_v49  ;;  %5412 = vmatprep.mubr.bf16.mxu0 %v5831_v1 }
 0x412   : > { %3270 = vmatprep.subr.bf16.mxu0 %v5830_v28  ;;  %5444 = vmatprep.mubr.bf16.mxu1 %v5841_v16 }
 0x413   : > { %3460 = vmatpush1.bf16.msra.mxu1 %v5861_v37 }
 0x414   : > { %3461 = vmatprep.subr.bf16.mxu1 %v5869_v15 }
 0x415   : > { %3271 = vmatpush1.bf16.msra.mxu0 %v5828_v25 }
 0x416   : > { %3272 = vmatprep.subr.bf16.mxu0 %v5835_v30 }
 0x417   : > { %3462 = vmatpush1.bf16.msra.mxu1 %v5867_v44 }
 0x418   : > { %5413 = vmatmul.mubr.bf16.gmra.mxu0 %v5832_v47  ;;  %5445 = vmatmul.mubr.bf16.gmra.mxu1 %v5842_v5 }
 0x419   : > { %3273 = vmatpush1.bf16.msra.mxu0 %v5833_v56  ;;  %3292 = vmatprep.mubr.bf16.mxu0 %v8119_v33 }
 0x41a   : > { %3274 = vmatprep.subr.bf16.mxu0 %v5838_v62  ;;  %3463 = vmatprep.subr.bf16.mxu1 %v5875_v23 }
 0x41b   : > { %3464 = vmatpush1.bf16.msra.mxu1 %v5873_v48  ;;  %3485 = vmatprep.mubr.bf16.mxu1 %v8119_v33 }
 0x41c   : > { %3465 = vmatprep.subr.bf16.mxu1 %v5881_v59 }
 0x41d   : > { %3275 = vmatpush1.bf16.msra.mxu0 %v5836_v20 }
 0x41e   : > { %3663 = vmatprep.subr.bf16.mxu0 %v5848_v63 }
 0x41f   : > { %3466 = vmatpush1.bf16.msra.mxu1 %v5879_v42 }
 0x420   : > { %3293 = vmatmul.mubr.bf16.vlgmr.msra.gmra.mxu0 %v7293_v35  ;;  %v5866_v35 = vld [vmem:[%s7944_s6 + $0x144] ss:$8 sps:$4 sm:$0xff]   ;;  %3467 = vmatprep.subr.bf16.mxu1 %v5887_v36 }
 0x421   : > { %3302 = vmatprep.mubr.bf16.mxu0 %v8119_v33  ;;  %3664 = vmatpush1.bf16.msra.mxu0 %v5846_v50 }
 0x422   : > { %3665 = vmatprep.subr.bf16.mxu0 %v5854_v60 }
 0x423   : > { %3468 = vmatpush1.bf16.msra.mxu1 %v5885_v57 }
 0x425   : > { %3666 = vmatpush1.bf16.msra.mxu0 %v5852_v4 }
 0x426   : > { %3667 = vmatprep.subr.bf16.mxu0 %v5860_v8 }
 0x428   : > { %3303 = vmatmul.mubr.bf16.gmra.mxu0 %v7295_v13  ;;  %v5878_v13 = vld [vmem:[%s7944_s6 + $0x124] ss:$8 sps:$4 sm:$0xff]  }
 0x429   : > { %3312 = vmatprep.mubr.bf16.mxu0 %v8119_v33  ;;  %3668 = vmatpush1.bf16.msra.mxu0 %v5858_v61 }
 0x42a   : > { %3669 = vmatprep.subr.bf16.mxu0 %v5866_v35 }
 0x42d   : > { %3670 = vmatpush1.bf16.msra.mxu0 %v5864_v22 }
 0x42e   : > { %3671 = vmatprep.subr.bf16.mxu0 %v5872_v19 }
 0x430   : > { %3313 = vmatmul.mubr.bf16.gmra.mxu0 %v7298_v6  ;;  %v5884_v6 = vld [vmem:[%s7944_s6 + $0x114] ss:$8 sps:$4 sm:$0xff]  }
 0x431   : > { %3322 = vmatprep.mubr.bf16.mxu0 %v8119_v33  ;;  %3672 = vmatpush1.bf16.msra.mxu0 %v5870_v54 }
 0x432   : > { %3673 = vmatprep.subr.bf16.mxu0 %v5878_v13 }
 0x435   : > { %3674 = vmatpush1.bf16.msra.mxu0 %v5876_v11 }
 0x436   : > { %3675 = vmatprep.subr.bf16.mxu0 %v5884_v6 }
 0x438   : > { %3323 = vmatmul.mubr.bf16.gmra.mxu0 %v7302_v45  ;;  %v5882_v45 = vld [vmem:[%s7944_s6 + $0x110] ss:$8 sps:$4 sm:$0xff]  }
 0x439   : > { %3332 = vmatprep.mubr.bf16.mxu0 %v8119_v33  ;;  %3676 = vmatpush1.bf16.msra.mxu0 %v5882_v45 }
 0x440   : > { %3333 = vmatmul.mubr.bf16.gmra.mxu0 %v7307_v27  ;;  %v5890_v27 = vld [vmem:[%s7944_s6 + $0x104] ss:$8 sps:$4 sm:$0xff]  }
 0x441   : > { %3342 = vmatprep.mubr.bf16.mxu0 %v8119_v33  ;;  %3677 = vmatprep.subr.bf16.mxu0 %v5890_v27 }
 0x442   : > { %3678 = vmatpush1.bf16.msra.mxu0 %v5888_v7 }
 0x448   : > { %3343 = vmatmul.mubr.bf16.gmra.mxu0 %v7312_v34 }
 0x449   : > { %3352 = vmatprep.mubr.bf16.mxu0 %v8119_v33 }
 0x450   : > { %3353 = vmatmul.mubr.bf16.gmra.mxu0 %v7316_v24 }
 0x451   : > { %3362 = vmatprep.mubr.bf16.mxu0 %v8119_v33 }
 0x458   : > { %3363 = vmatmul.mubr.bf16.gmra.mxu0 %v7320_v51 }
 0x459   : > { %3695 = vmatprep.mubr.bf16.mxu0 %v8119_v33 }
 0x4c0   : > { %v5402_v38 = vpop.f32.mrf.mxu0  ;;  %v5434_v29 = vpop.f32.mrf.mxu1 }
 0x4c2   : > { %v2907_v10 = vpop.f32.mrf.mxu0  ;;  %v3076_v46 = vpop.f32.mrf.mxu1 }
 0x4c4   : > { %v5403_v18 = vpop.f32.mrf.mxu0  ;;  %v5435_v17 = vpop.f32.mrf.mxu1 }
 0x4c5   : > { %v2971_v0 = vpack.c.bf16 %v5403_v18, %v5402_v38  ;;  %v3140_v58 = vpack.c.bf16 %v5435_v17, %v5434_v29 }
 0x4c6   : > { %v2910_v12 = vpop.f32.mrf.mxu0  ;;  %v3079_v53 = vpop.f32.mrf.mxu1 }
 0x4c7   : > { %v2970_v26 = vpack.c.bf16 %v2910_v12, %v2907_v10  ;;  %v3139_v34 = vpack.c.bf16 %v3079_v53, %v3076_v46 }
 0x4c8   : > { %v5438_v31 = vpop.f32.mrf.mxu1  ;;  %v5406_v24 = vpop.f32.mrf.mxu0 }
 0x4c9   : > { %3486 = vmatmul.mubr.bf16.vlgmr.msra.gmra.mxu1 %v2970_v26  ;;  %3696 = vmatmul.mubr.bf16.vlgmr.msra.gmra.mxu0 %v3139_v34 }
 0x4ca   : > { %3495 = vmatprep.mubr.bf16.mxu1 %v8119_v33  ;;  %3705 = vmatprep.mubr.bf16.mxu0 %v8119_v33  ;;  %v3092_v51 = vpop.f32.mrf.mxu1  ;;  %v2923_v40 = vpop.f32.mrf.mxu0 }
 0x4cc   : > { %v5439_v21 = vpop.f32.mrf.mxu1  ;;  %v5407_v39 = vpop.f32.mrf.mxu0 }
 0x4cd   : > { %v2973_v41 = vpack.c.bf16 %v5407_v39, %v5406_v24  ;;  %v3142_v49 = vpack.c.bf16 %v5439_v21, %v5438_v31  ;;  %v5891_v31 = vld [vmem:[%s7948_s10] sm:$0xff]  }
 0x4ce   : > { %v3095_v3 = vpop.f32.mrf.mxu1  ;;  %v2926_v14 = vpop.f32.mrf.mxu0  ;;  %v3808_v39 = vld [vmem:[%s7945_s7] sm:$0x3] }
 0x4cf   : > { %v2972_v52 = vpack.c.bf16 %v2926_v14, %v2923_v40  ;;  %v3141_v43 = vpack.c.bf16 %v3095_v3, %v3092_v51 }
 0x4d0   : > { %v5442_v55 = vpop.f32.mrf.mxu1  ;;  %v5410_v32 = vpop.f32.mrf.mxu0 }
 0x4d1   : > { %3496 = vmatmul.mubr.bf16.gmra.mxu1 %v2971_v0  ;;  %3706 = vmatmul.mubr.bf16.gmra.mxu0 %v3140_v58 }
 0x4d2   : > { %3505 = vmatprep.mubr.bf16.mxu1 %v8119_v33  ;;  %3715 = vmatprep.mubr.bf16.mxu0 %v8119_v33  ;;  %v3108_v9 = vpop.f32.mrf.mxu1  ;;  %v2939_v2 = vpop.f32.mrf.mxu0 }
 0x4d4   : > { %v5443_v1 = vpop.f32.mrf.mxu1  ;;  %v5411_v28 = vpop.f32.mrf.mxu0 }
 0x4d5   : > { %v2975_v56 = vpack.c.bf16 %v5411_v28, %v5410_v32  ;;  %v3144_v62 = vpack.c.bf16 %v5443_v1, %v5442_v55 }
 0x4d6   : > { %v3111_v16 = vpop.f32.mrf.mxu1  ;;  %v2942_v37 = vpop.f32.mrf.mxu0 }
 0x4d7   : > { %v2974_v15 = vpack.c.bf16 %v2942_v37, %v2939_v2  ;;  %v3143_v25 = vpack.c.bf16 %v3111_v16, %v3108_v9  ;;  %v5900_v16 = vld [vmem:[%s7949_s11 + $0x38] sm:$0xff]  }
 0x4d8   : > { %v5446_v30 = vpop.f32.mrf.mxu1  ;;  %v5414_v44 = vpop.f32.mrf.mxu0 }
 0x4d9   : > { %3506 = vmatmul.mubr.bf16.gmra.mxu1 %v2972_v52  ;;  %3716 = vmatmul.mubr.bf16.gmra.mxu0 %v3141_v43  ;;  %v8120_v43 = vld [vmem:[#allocation37_spill] sm:$0xff] }
 0x4da   : > { %3515 = vmatprep.mubr.bf16.mxu1 %v8119_v33  ;;  %3725 = vmatprep.mubr.bf16.mxu0 %v8119_v33  ;;  %v3124_v47 = vpop.f32.mrf.mxu1  ;;  %v2955_v5 = vpop.f32.mrf.mxu0  ;;  %v8121_v55 = vsub.s32 0, %v8120_v43  ;;  %v8122_v1 = vsub.s32 1, %v8120_v43 }
 0x4dc   : > { %v5447_v23 = vpop.f32.mrf.mxu1  ;;  %v5415_v48 = vpop.f32.mrf.mxu0  ;;  %v7634_v32 = vrot.slane %v3808_v39, %v8121_v55  ;;  %v7638_v28 = vrot.slane %v3808_v39, %v8122_v1 }
 0x4dd   : > { %v2977_v4 = vpack.c.bf16 %v5415_v48, %v5414_v44  ;;  %v3146_v8 = vpack.c.bf16 %v5447_v23, %v5446_v30 }
 0x4de   : > { %v3127_v20 = vpop.f32.mrf.mxu1  ;;  %v2958_v63 = vpop.f32.mrf.mxu0 }
 0x4df   : > { %v2976_v50 = vpack.c.bf16 %v2958_v63, %v2955_v5  ;;  %v3145_v60 = vpack.c.bf16 %v3127_v20, %v3124_v47  ;;  %v5902_v5 = vld [vmem:[%s7949_s11 + $0x30] sm:$0xff]  }
 0x4e0   : > { %v3294_v61 = vpop.f32.mrf.mxu0 }
 0x4e1   : > { %3516 = vmatmul.mubr.bf16.gmra.mxu1 %v2973_v41  ;;  %3726 = vmatmul.mubr.bf16.gmra.mxu0 %v3142_v49 }
 0x4e2   : > { %3525 = vmatprep.mubr.bf16.mxu1 %v8119_v33  ;;  %3735 = vmatprep.mubr.bf16.mxu0 %v8119_v33  ;;  %v3296_v35 = vpop.f32.mrf.mxu0 }
 0x4e4   : > { %v3298_v22 = vpop.f32.mrf.mxu0 }
 0x4e6   : > { %v3300_v19 = vpop.f32.mrf.mxu0 }
 0x4e8   : > { %v3304_v54 = vpop.f32.mrf.mxu0 }
 0x4e9   : > { %3526 = vmatmul.mubr.bf16.gmra.mxu1 %v2974_v15  ;;  %3736 = vmatmul.mubr.bf16.gmra.mxu0 %v3143_v25  ;;  %v7978_v25 = vmov 0.0  }
 0x4ea   : > { %3535 = vmatprep.mubr.bf16.mxu1 %v8119_v33  ;;  %3745 = vmatprep.mubr.bf16.mxu0 %v8119_v33  ;;  %v7572_v13 = vpop.f32.mrf.mxu0 }
 0x4eb   : > { %5500 = vmatprep.subr.bf16.mxu0 %v7978_v25 }
 0x4ec   : > { %v7574_v11 = vpop.f32.mrf.mxu0  ;;  %5501 = vmatpush3.bf16.msra.mxu0 %v5900_v16 }
 0x4ed   : > { %5502 = vmatprep.subr.bf16.mxu0 %v7978_v25 }
 0x4ee   : > { %v7576_v59 = vpop.f32.mrf.mxu0 }
 0x4f0   : > { %v7578_v6 = vpop.f32.mrf.mxu0  ;;  %5503 = vmatpush3.bf16.msra.mxu0 %v5902_v5 }
 0x4f1   : > { %3536 = vmatmul.mubr.bf16.gmra.mxu1 %v2975_v56  ;;  %3746 = vmatmul.mubr.bf16.gmra.mxu0 %v3144_v62 }
 0x4f2   : > { %3545 = vmatprep.mubr.bf16.mxu1 %v8119_v33  ;;  %3755 = vmatprep.mubr.bf16.mxu0 %v8119_v33  ;;  %v7580_v42 = vpop.f32.mrf.mxu0 }
 0x4f3   : > { %5504 = vmatprep.subr.bf16.mxu0 %v7978_v25 }
 0x4f9   : > { %3546 = vmatmul.mubr.bf16.gmra.mxu1 %v2976_v50  ;;  %3756 = vmatmul.mubr.bf16.gmra.mxu0 %v3145_v60 }
 0x4fa   : > { %3555 = vmatprep.mubr.bf16.mxu1 %v8119_v33  ;;  %3765 = vmatprep.mubr.bf16.mxu0 %v8119_v33  ;;  %v7582_v33 = vpop.f32.mrf.mxu0 }
 0x4fc   : > { %v7584_v45 = vpop.f32.mrf.mxu0 }
 0x4fe   : > { %v7586_v36 = vpop.f32.mrf.mxu0 }
 0x500   : > { %v7588_v27 = vpop.f32.mrf.mxu0 }
 0x501   : > { %3556 = vmatmul.mubr.bf16.gmra.mxu1 %v2977_v4  ;;  %3766 = vmatmul.mubr.bf16.gmra.mxu0 %v3146_v8 }
 0x502   : > { %v7590_v57 = vpop.f32.mrf.mxu0  ;;  %5464 = vmatprep.mubr.bf16.mxu1 %v5891_v31 }
 0x504   : > { %v7592_v7 = vpop.f32.mrf.mxu0 }
 0x506   : > { %v7594_v38 = vpop.f32.mrf.mxu0 }
 0x508   : > { %v7596_v29 = vpop.f32.mrf.mxu0 }
 0x50a   : > { %v7598_v10 = vpop.f32.mrf.mxu0 }
 0x50c   : > { %v7600_v46 = vpop.f32.mrf.mxu0 }
 0x50e   : > { %v7602_v18 = vpop.f32.mrf.mxu0 }
 0x510   : > { %v7604_v17 = vpop.f32.mrf.mxu0 }
 0x512   : > { %v7606_v12 = vpop.f32.mrf.mxu0 }
 0x514   : > { %v7608_v53 = vpop.f32.mrf.mxu0 }
 0x516   : > { %v7610_v26 = vpop.f32.mrf.mxu0 }
 0x518   : > { %v7612_v34 = vpop.f32.mrf.mxu0 }
 0x51a   : > { %v7617_v24 = vpop.f32.mrf.mxu0 }
 0x51c   : > { %v7619_v51 = vpop.f32.mrf.mxu0 }
 0x51e   : > { %v7621_v40 = vpop.f32.mrf.mxu0 }
 0x520   : > { %v7623_v0 = vpop.f32.mrf.mxu0 }
 0x522   : > { %v7625_v58 = vpop.f32.mrf.mxu0 }
 0x524   : > { %v7627_v21 = vpop.f32.mrf.mxu0 }
 0x589   : > { %v3487_v3 = vpop.f32.mrf.mxu1  ;;  %v3697_v14 = vpop.f32.mrf.mxu0 }
 0x58a   : > { %v3488_v52 = vadd.f32 %v3487_v3, %v3294_v61 }
 0x58b   : > { %v3489_v9 = vpop.f32.mrf.mxu1  ;;  %v3699_v2 = vpop.f32.mrf.mxu0 }
 0x58c   : > { %v3490_v41 = vadd.f32 %v3489_v9, %v3296_v35  ;;  %v3776_v49 = vadd.f32 %v3697_v14, %v3488_v52 }
 0x58d   : > { %v3491_v37 = vpop.f32.mrf.mxu1  ;;  %v3701_v15 = vpop.f32.mrf.mxu0 }
 0x58e   : > { %v3820_v30 = vadd.f32 %v7634_v32, %v3776_v49  ;;  %v3492_v44 = vadd.f32 %v3491_v37, %v3298_v22  ;;  %v3777_v47 = vadd.f32 %v3699_v2, %v3490_v41 }
 0x58f   : > { %v3493_v56 = vpop.f32.mrf.mxu1  ;;  %v3703_v62 = vpop.f32.mrf.mxu0 }
 0x590   : > { %v3821_v23 = vadd.f32 %v7638_v28, %v3777_v47  ;;  %v3494_v48 = vadd.f32 %v3493_v56, %v3300_v19  ;;  %v3778_v20 = vadd.f32 %v3701_v15, %v3492_v44  ;;  %v3852_v63 = vmax.f32 %v3820_v30, 0.0 }
 0x591   : > { %v3497_v50 = vpop.f32.mrf.mxu1  ;;  %v3707_v60 = vpop.f32.mrf.mxu0 }
 0x592   : > { %v3853_v4 = vmax.f32 %v3821_v23, 0.0  ;;  %v3822_v8 = vadd.f32 %v7634_v32, %v3778_v20  ;;  %v3498_v61 = vadd.f32 %v3497_v50, %v3304_v54  ;;  %v3779_v35 = vadd.f32 %v3703_v62, %v3494_v48 }
 0x593   : > { %v3499_v22 = vpop.f32.mrf.mxu1  ;;  %v3709_v31 = vpop.f32.mrf.mxu0 }
 0x594   : > { %v3884_v39 = vmax.f32 %v3852_v63, %v3853_v4  ;;  %v3823_v3 = vadd.f32 %v7638_v28, %v3779_v35  ;;  %v3500_v14 = vadd.f32 %v3499_v22, %v7572_v13  ;;  %v3780_v19 = vadd.f32 %v3707_v60, %v3498_v61 }
 0x595   : > { %v3501_v52 = vpop.f32.mrf.mxu1  ;;  %v3711_v43 = vpop.f32.mrf.mxu0  ;;  %v3854_v55 = vmax.f32 %v3822_v8, 0.0 }
 0x596   : > { %v3855_v9 = vmax.f32 %v3823_v3, 0.0  ;;  %v3502_v2 = vadd.f32 %v3501_v52, %v7574_v11  ;;  %v3781_v41 = vadd.f32 %v3709_v31, %v3500_v14  ;;  %v3824_v54 = vadd.f32 %v7634_v32, %v3780_v19 }
 0x597   : > { %v3503_v49 = vpop.f32.mrf.mxu1  ;;  %v3713_v1 = vpop.f32.mrf.mxu0 }
 0x598   : > { %v3885_v16 = vmax.f32 %v3854_v55, %v3855_v9  ;;  %v3825_v37 = vadd.f32 %v7638_v28, %v3781_v41  ;;  %v3504_v15 = vadd.f32 %v3503_v49, %v7576_v59  ;;  %v3782_v30 = vadd.f32 %v3711_v43, %v3502_v2 }
 0x599   : > { %v3856_v44 = vmax.f32 %v3824_v54, 0.0  ;;  %v3507_v13 = vpop.f32.mrf.mxu1  ;;  %v3717_v47 = vpop.f32.mrf.mxu0 }
 0x59a   : > { %v3857_v5 = vmax.f32 %v3825_v37, 0.0  ;;  %v3826_v56 = vadd.f32 %v7634_v32, %v3782_v30  ;;  %v3508_v62 = vadd.f32 %v3507_v13, %v7578_v6  ;;  %v3783_v11 = vadd.f32 %v3713_v1, %v3504_v15 }
 0x59b   : > { %v3509_v23 = vpop.f32.mrf.mxu1  ;;  %v7660_v48 = vpop.f32.mrf.mxu0  ;;  %v7662_v20 = vpack.c.bf16 %v3885_v16, %v3884_v39 }
 0x59c   : > { %8123 = vst [vmem:[#allocation10_spill] sm:$0xff] %v7660_v48  ;;  %v3886_v63 = vmax.f32 %v3856_v44, %v3857_v5  ;;  %v3827_v50 = vadd.f32 %v7638_v28, %v3783_v11  ;;  %v7665_v60 = vadd.f32 %v3717_v47, %v3508_v62  ;;  %v3858_v8 = vmax.f32 %v3826_v56, 0.0 }
 0x59d   : > { %8124 = vst [vmem:[#allocation11_spill] sm:$0xff] %v7662_v20  ;;  %v3511_v59 = vpop.f32.mrf.mxu1  ;;  %v7667_v4 = vpop.f32.mrf.mxu0  ;;  %v7692_v48 = vadd.f32 %v3509_v23, %v7580_v42 }
 0x59e   : > { %8125 = vst [vmem:[#allocation12_spill] sm:$0xff] %v7665_v60  ;;  %8126 = vst [vmem:[#allocation13_spill] sm:$0xff] %v7667_v4  ;;  %v3859_v61 = vmax.f32 %v3827_v50, 0.0 }
 0x59f   : > { %v3513_v35 = vpop.f32.mrf.mxu1  ;;  %v7669_v22 = vpop.f32.mrf.mxu0 }
 0x5a0   : > { %8127 = vst [vmem:[#allocation14_spill] sm:$0xff] %v7669_v22  ;;  %v3887_v6 = vmax.f32 %v3858_v8, %v3859_v61 }
 0x5a1   : > { %v3517_v31 = vpop.f32.mrf.mxu1  ;;  %v7671_v3 = vpop.f32.mrf.mxu0 }
 0x5a2   : > { %8128 = vst [vmem:[#allocation15_spill] sm:$0xff] %v7671_v3  ;;  %v7675_v19 = vpack.c.bf16 %v3887_v6, %v3886_v63  ;;  %v7695_v3 = vadd.f32 %v3511_v59, %v7582_v33 }
 0x5a3   : > { %v3519_v14 = vpop.f32.mrf.mxu1  ;;  %v7673_v39 = vpop.f32.mrf.mxu0 }
 0x5a4   : > { %8129 = vst [vmem:[#allocation16_spill] sm:$0xff] %v7673_v39  ;;  %8130 = vst [vmem:[#allocation17_spill] sm:$0xff] %v7675_v19  ;;  %v3520_v42 = vadd.f32 %v3519_v14, %v7588_v27 }
 0x5a5   : > { %v3521_v52 = vpop.f32.mrf.mxu1  ;;  %v7677_v43 = vpop.f32.mrf.mxu0 }
 0x5a6   : > { %8131 = vst [vmem:[#allocation18_spill] sm:$0xff] %v7677_v43  ;;  %v3522_v23 = vadd.f32 %v3521_v52, %v7590_v57 }
 0x5a7   : > { %v3523_v55 = vpop.f32.mrf.mxu1  ;;  %v3733_v9 = vpop.f32.mrf.mxu0 }
 0x5a8   : > { %v3524_v60 = vadd.f32 %v3523_v55, %v7592_v7 }
 0x5a9   : > { %v3527_v2 = vpop.f32.mrf.mxu1  ;;  %v7679_v41 = vpop.f32.mrf.mxu0 }
 0x5aa   : > { %8132 = vst [vmem:[#allocation19_spill] sm:$0xff] %v7679_v41  ;;  %v7699_v41 = vadd.f32 %v3513_v35, %v7584_v45  ;;  %v3528_v45 = vadd.f32 %v3527_v2, %v7594_v38  ;;  %v7711_v35 = vadd.f32 %v3733_v9, %v3524_v60 }
 0x5ab   : > { %v3529_v54 = vpop.f32.mrf.mxu1  ;;  %v7681_v49 = vpop.f32.mrf.mxu0 }
 0x5ad   : > { %v3531_v1 = vpop.f32.mrf.mxu1  ;;  %v7683_v16 = vpop.f32.mrf.mxu0 }
 0x5ae   : > { %8133 = vst [vmem:[#allocation20_spill] sm:$0xff] %v7683_v16  ;;  %v7702_v16 = vadd.f32 %v3517_v31, %v7586_v36 }
 0x5af   : > { %v3533_v37 = vpop.f32.mrf.mxu1  ;;  %v7685_v15 = vpop.f32.mrf.mxu0 }
 0x5b0   : > { %v3534_v38 = vadd.f32 %v3533_v37, %v7600_v46 }
 0x5b1   : > { %v3537_v30 = vpop.f32.mrf.mxu1  ;;  %v7687_v44 = vpop.f32.mrf.mxu0 }
 0x5b2   : > { %v3538_v60 = vadd.f32 %v3537_v30, %v7602_v18 }
 0x5b3   : > { %v3539_v13 = vpop.f32.mrf.mxu1  ;;  %v3749_v47 = vpop.f32.mrf.mxu0 }
 0x5b5   : > { %v3541_v5 = vpop.f32.mrf.mxu1  ;;  %v3751_v56 = vpop.f32.mrf.mxu0 }
 0x5b6   : > { %v3542_v27 = vadd.f32 %v3541_v5, %v7606_v12 }
 0x5b7   : > { %v3543_v62 = vpop.f32.mrf.mxu1  ;;  %v3753_v11 = vpop.f32.mrf.mxu0 }
 0x5b8   : > { %v3544_v33 = vadd.f32 %v3543_v62, %v7608_v53  ;;  %v3798_v9 = vadd.f32 %v3751_v56, %v3542_v27  ;;  %v8134_v62 = vld [vmem:[#allocation20_spill] sm:$0xff]  ;;  %v8137_v27 = vld [vmem:[#allocation18_spill] sm:$0xff] }
 0x5b9   : > { %v3547_v63 = vpop.f32.mrf.mxu1  ;;  %v3757_v50 = vpop.f32.mrf.mxu0 }
 0x5bb   : > { %v3549_v8 = vpop.f32.mrf.mxu1  ;;  %v3759_v61 = vpop.f32.mrf.mxu0 }
 0x5bc   : > { %v3550_v22 = vadd.f32 %v3549_v8, %v7612_v34  ;;  %v3548_v34 = vadd.f32 %v3547_v63, %v7610_v26 }
 0x5bd   : > { %v3551_v6 = vpop.f32.mrf.mxu1  ;;  %v3761_v25 = vpop.f32.mrf.mxu0 }
 0x5be   : > { %v3552_v7 = vadd.f32 %v3551_v6, %v7617_v24  ;;  %v3530_v24 = vadd.f32 %v3529_v54, %v7596_v29  ;;  %v3801_v57 = vadd.f32 %v3759_v61, %v3550_v22 }
 0x5bf   : > { %v3553_v20 = vpop.f32.mrf.mxu1  ;;  %v3763_v19 = vpop.f32.mrf.mxu0 }
 0x5c0   : > { %v3554_v4 = vadd.f32 %v3553_v20, %v7619_v51  ;;  %v3802_v52 = vadd.f32 %v3761_v25, %v3552_v7  ;;  %v3532_v25 = vadd.f32 %v3531_v1, %v7598_v10  ;;  %v3793_v30 = vadd.f32 %v7681_v49, %v3530_v24  ;;  %v8136_v24 = vld [vmem:[#allocation16_spill] sm:$0xff] }
 0x5c1   : > { %v3557_v43 = vpop.f32.mrf.mxu1  ;;  %v3767_v39 = vpop.f32.mrf.mxu0 }
 0x5c2   : > { %v3558_v51 = vadd.f32 %v3557_v43, %v7621_v40  ;;  %v3803_v36 = vadd.f32 %v3763_v19, %v3554_v4  ;;  %v3540_v40 = vadd.f32 %v3539_v13, %v7604_v17  ;;  %v3799_v4 = vadd.f32 %v3753_v11, %v3544_v33 }
 0x5c3   : > { %v3559_v20 = vpop.f32.mrf.mxu1  ;;  %v3769_v59 = vpop.f32.mrf.mxu0  ;;  %v3846_v46 = vadd.f32 %v7634_v32, %v3802_v52  ;;  %v3795_v13 = vadd.f32 %v7685_v15, %v3534_v38  ;;  %v3794_v11 = vadd.f32 %v8134_v62, %v3532_v25  ;;  %v8141_v25 = vld [vmem:[#allocation13_spill] sm:$0xff] }
 0x5c4   : > { %v3560_v31 = vadd.f32 %v3559_v20, %v7623_v0  ;;  %v3804_v26 = vadd.f32 %v3767_v39, %v3558_v51  ;;  %v3800_v0 = vadd.f32 %v3757_v50, %v3548_v34  ;;  %v3847_v29 = vadd.f32 %v7638_v28, %v3803_v36 }
 0x5c5   : > { %v3561_v14 = vpop.f32.mrf.mxu1  ;;  %v3771_v53 = vpop.f32.mrf.mxu0  ;;  %v3797_v39 = vadd.f32 %v3749_v47, %v3540_v40  ;;  %v3843_v10 = vadd.f32 %v7638_v28, %v3799_v4  ;;  %v3842_v50 = vadd.f32 %v7634_v32, %v3798_v9  ;;  %v3878_v49 = vmax.f32 %v3846_v46, 0.0 }
 0x5c6   : > { %v3562_v43 = vadd.f32 %v3561_v14, %v7625_v58  ;;  %v3805_v55 = vadd.f32 %v3769_v59, %v3560_v31  ;;  %v3845_v58 = vadd.f32 %v7638_v28, %v3801_v57  ;;  %v3848_v18 = vadd.f32 %v7634_v32, %v3804_v26 }
 0x5c7   : > { %v3563_v19 = vpop.f32.mrf.mxu1  ;;  %v3773_v2 = vpop.f32.mrf.mxu0  ;;  %v3844_v1 = vadd.f32 %v7634_v32, %v3800_v0  ;;  %v3879_v47 = vmax.f32 %v3847_v29, 0.0  ;;  %v3841_v63 = vadd.f32 %v7638_v28, %v3797_v39  ;;  %v3839_v51 = vadd.f32 %v7638_v28, %v3795_v13 }
 0x5c8   : > { %v3849_v17 = vadd.f32 %v7638_v28, %v3805_v55  ;;  %v3564_v12 = vadd.f32 %v3563_v19, %v7627_v21  ;;  %v3806_v22 = vadd.f32 %v3771_v53, %v3562_v43  ;;  %v3796_v21 = vadd.f32 %v7687_v44, %v3538_v60  ;;  %v8135_v44 = vld [vmem:[#allocation19_spill] sm:$0xff]  ;;  %v8138_v55 = vld [vmem:[#allocation14_spill] sm:$0xff] }
 0x5c9   : > { %v3877_v8 = vmax.f32 %v3845_v58, 0.0  ;;  %v3880_v61 = vmax.f32 %v3848_v18, 0.0  ;;  %v3792_v7 = vadd.f32 %v8135_v44, %v3528_v45  ;;  %v3875_v34 = vmax.f32 %v3843_v10, 0.0  ;;  %v8139_v60 = vld [vmem:[#allocation15_spill] sm:$0xff] }
 0x5ca   : > { %v3850_v54 = vadd.f32 %v7634_v32, %v3806_v22  ;;  %v3807_v37 = vadd.f32 %v3773_v2, %v3564_v12  ;;  %v3881_v5 = vmax.f32 %v3849_v17, 0.0  ;;  %v3840_v33 = vadd.f32 %v7634_v32, %v3796_v21  ;;  %v8140_v12 = vld [vmem:[#allocation10_spill] sm:$0xff]  ;;  %v8144_v44 = vld [vmem:[#allocation11_spill] sm:$0xff] }
 0x5cb   : > { %v3876_v20 = vmax.f32 %v3844_v1, 0.0  ;;  %v3897_v59 = vmax.f32 %v3878_v49, %v3879_v47  ;;  %v3789_v40 = vadd.f32 %v8136_v24, %v3520_v42  ;;  %v3790_v57 = vadd.f32 %v8137_v27, %v3522_v23  ;;  %v8142_v1 = vld [vmem:[#allocation12_spill] sm:$0xff]  ;;  %v5903_v27 = vld [vmem:[%s7949_s11 + $0x68] sm:$0xff]  }
 0x5cc   : > { %v3851_v56 = vadd.f32 %v7638_v28, %v3807_v37  ;;  %v3882_v15 = vmax.f32 %v3850_v54, 0.0  ;;  %v3898_v36 = vmax.f32 %v3880_v61, %v3881_v5  ;;  %v3837_v14 = vadd.f32 %v7638_v28, %v3793_v30  ;;  %v5897_v24 = vld [vmem:[%s7948_s10 + $0x30] sm:$0xff]  }
 0x5cd   : > { %v3838_v53 = vadd.f32 %v7634_v32, %v3794_v11  ;;  %v3873_v52 = vmax.f32 %v3841_v63, 0.0  ;;  %v3874_v26 = vmax.f32 %v3842_v50, 0.0  ;;  %v3896_v45 = vmax.f32 %v3876_v20, %v3877_v8  ;;  %v5901_v20 = vld [vmem:[%s7949_s11 + $0x70] sm:$0xff]  }
 0x5ce   : > { %v3883_v6 = vmax.f32 %v3851_v56, 0.0  ;;  %v3787_v38 = vadd.f32 %v8138_v55, %v7699_v41  ;;  %v3788_v4 = vadd.f32 %v8139_v60, %v7702_v16  ;;  %v3835_v0 = vadd.f32 %v7638_v28, %v7711_v35  ;;  %v5911_v55 = vld [vmem:[%s7949_s11 + $0x48] sm:$0xff]   ;;  %v5913_v60 = vld [vmem:[%s7949_s11 + $0x40] sm:$0xff]  }
 0x5cf   : > { %v3836_v42 = vadd.f32 %v7634_v32, %v3792_v7  ;;  %v3871_v23 = vmax.f32 %v3839_v51, 0.0  ;;  %v3872_v19 = vmax.f32 %v3840_v33, 0.0  ;;  %v3895_v29 = vmax.f32 %v3874_v26, %v3875_v34  ;;  %v5892_v7 = vld [vmem:[%s7948_s10 + $0x8] sm:$0xff]   ;;  %v5893_v51 = vld [vmem:[%s7948_s10 + $0x10] sm:$0xff]   ;;  %v5899_v33 = vld [vmem:[%s7949_s11 + $0x78] sm:$0xff]  }
 0x5d0   : > { %v3899_v31 = vmax.f32 %v3882_v15, %v3883_v6  ;;  %v3906_v17 = vpack.c.bf16 %v3897_v59, %v3896_v45  ;;  %v3785_v22 = vadd.f32 %v8140_v12, %v7692_v48  ;;  %v3786_v39 = vadd.f32 %v8141_v25, %v7695_v3  ;;  %v5894_v59 = vld [vmem:[%s7948_s10 + $0x18] sm:$0xff]   ;;  %v5909_v45 = vld [vmem:[%s7949_s11 + $0x50] sm:$0xff]  }
 0x5d1   : > { %v3833_v41 = vadd.f32 %v7638_v28, %v3789_v40  ;;  %v3834_v16 = vadd.f32 %v7634_v32, %v3790_v57  ;;  %v3869_v9 = vmax.f32 %v3837_v14, 0.0  ;;  %v3870_v35 = vmax.f32 %v3838_v53, 0.0  ;;  %v5898_v40 = vld [vmem:[%s7948_s10 + $0x38] sm:$0xff]   ;;  %v5904_v57 = vld [vmem:[%s7949_s11 + $0x28] sm:$0xff]   ;;  %v5905_v14 = vld [vmem:[%s7949_s11 + $0x60] sm:$0xff]  }
 0x5d2   : > { %v3907_v43 = vpack.c.bf16 %v3899_v31, %v3898_v36  ;;  %v3894_v58 = vmax.f32 %v3872_v19, %v3873_v52  ;;  %v3831_v2 = vadd.f32 %v7638_v28, %v3787_v38  ;;  %v3832_v46 = vadd.f32 %v7634_v32, %v3788_v4  ;;  %v5895_v36 = vld [vmem:[%s7948_s10 + $0x20] sm:$0xff]   ;;  %v5896_v31 = vld [vmem:[%s7948_s10 + $0x28] sm:$0xff]   ;;  %5505 = vmatpush3.bf16.msra.mxu0 %v5904_v57  ;;  %v5907_v52 = vld [vmem:[%s7949_s11 + $0x58] sm:$0xff]  }
 0x5d3   : > { %v3867_v18 = vmax.f32 %v3835_v0, 0.0  ;;  %v3868_v54 = vmax.f32 %v3836_v42, 0.0  ;;  %v3893_v37 = vmax.f32 %v3870_v35, %v3871_v23  ;;  %v3829_v30 = vadd.f32 %v7638_v28, %v3785_v22  ;;  %v5906_v53 = vld [vmem:[%s7949_s11 + $0x20] sm:$0xff]   ;;  %v5908_v26 = vld [vmem:[%s7949_s11 + $0x18] sm:$0xff]   ;;  %v5912_v38 = vld [vmem:[%s7949_s11 + $0x8] sm:$0xff]  }
 0x5d4   : > { %5448 = vmatprep.subr.bf16.mxu1 %v3907_v43  ;;  %v3905_v48 = vpack.c.bf16 %v3895_v29, %v3894_v58  ;;  %v3830_v3 = vadd.f32 %v7634_v32, %v3786_v39  ;;  %v3865_v13 = vmax.f32 %v3833_v41, 0.0  ;;  %v3866_v21 = vmax.f32 %v3834_v16, 0.0  ;;  %v5914_v4 = vld [vmem:[%s7949_s11] sm:$0xff]   ;;  %v5915_v58 = vld [vmem:[%s7949_s11 + $0xb8] sm:$0xff]  }
 0x5d5   : > { %5449 = vmatpush3.bf16.msra.mxu1 %v3907_v43  ;;  %v3892_v10 = vmax.f32 %v3868_v54, %v3869_v9  ;;  %v3828_v47 = vadd.f32 %v7634_v32, %v8142_v1  ;;  %v3863_v5 = vmax.f32 %v3831_v2, 0.0  ;;  %v3864_v56 = vmax.f32 %v3832_v46, 0.0  ;;  %v8143_v32 = vld [vmem:[#allocation17_spill] sm:$0xff]  ;;  %v5910_v43 = vld [vmem:[%s7949_s11 + $0x10] sm:$0xff]  }
 0x5d6   : > { %5450 = vmatprep.subr.bf16.mxu1 %v3906_v17  ;;  %v3891_v62 = vmax.f32 %v3866_v21, %v3867_v18  ;;  %v3861_v63 = vmax.f32 %v3829_v30, 0.0  ;;  %v3862_v50 = vmax.f32 %v3830_v3, 0.0  ;;  %v8145_v34 = vmov 0.0   ;;  %v5916_v54 = vld [vmem:[%s7949_s11 + $0xf8] sm:$0xff]   ;;  %v5918_v30 = vld [vmem:[%s7949_s11 + $0xf0] sm:$0xff]   ;;  %v5919_v3 = vld [vmem:[%s7949_s11 + $0xa8] sm:$0xff]  }
 0x5d7   : > { %v3904_v11 = vpack.c.bf16 %v3893_v37, %v3892_v10  ;;  %v3890_v8 = vmax.f32 %v3864_v56, %v3865_v13  ;;  %v3860_v28 = vmax.f32 %v3828_v47, 0.0  ;;  %5506 = vmatprep.subr.bf16.mxu0 %v8145_v34  ;;  %5516 = vmatprep.mubr.msk.bf16.mxu0 %vm5955_vm0, %v8145_v34  ;;  %v5920_v13 = vld [vmem:[%s7949_s11 + $0xe8] sm:$0xff]   ;;  %v5921_v21 = vld [vmem:[%s7949_s11 + $0xa0] sm:$0xff]   ;;  %v5923_v47 = vld [vmem:[%s7949_s11 + $0x98] sm:$0xff]  }
 0x5d8   : > { %v3889_v49 = vmax.f32 %v3862_v50, %v3863_v5  ;;  %5507 = vmatpush3.bf16.msra.mxu0 %v5906_v53  ;;  %v5922_v10 = vld [vmem:[%s7949_s11 + $0xe0] sm:$0xff]   ;;  %v5924_v5 = vld [vmem:[%s7949_s11 + $0xd8] sm:$0xff]   ;;  %v5927_v50 = vld [vmem:[%s7949_s11 + $0x88] sm:$0xff]  }
 0x5d9   : > { %5451 = vmatpush3.bf16.msra.mxu1 %v3906_v17  ;;  %v3903_v61 = vpack.c.bf16 %v3891_v62, %v3890_v8  ;;  %v3888_v15 = vmax.f32 %v3860_v28, %v3861_v63  ;;  %5508 = vmatprep.subr.bf16.mxu0 %v8145_v34  ;;  %v5925_v62 = vld [vmem:[%s7949_s11 + $0x90] sm:$0xff]   ;;  %v5928_v28 = vld [vmem:[%s7949_s11 + $0xc8] sm:$0xff]  }
 0x5da   : > { %5452 = vmatprep.subr.bf16.mxu1 %v3905_v48 }
 0x5db   : > { %v3902_v6 = vpack.c.bf16 %v3889_v49, %v3888_v15  ;;  %v5929_v49 = vld [vmem:[%s7949_s11 + $0x80] sm:$0xff]  }
 0x5dc   : > { %5509 = vmatpush3.bf16.msra.mxu0 %v5908_v26  ;;  %v5930_v15 = vld [vmem:[%s7949_s11 + $0xc0] sm:$0xff]  }
 0x5dd   : > { %5453 = vmatpush3.bf16.msra.mxu1 %v3905_v48  ;;  %5510 = vmatprep.subr.bf16.mxu0 %v8145_v34  ;;  %v5917_v48 = vld [vmem:[%s7949_s11 + $0xb0] sm:$0xff]   ;;  %v4961_v26 = vld [vmem:[%s7950_s12] ss:$0 sm:$0xff] }
 0x5de   : > { %5454 = vmatprep.subr.bf16.mxu1 %v3904_v11 }
 0x5e0   : > { %5511 = vmatpush3.bf16.msra.mxu0 %v5910_v43 }
 0x5e1   : > { %5455 = vmatpush3.bf16.msra.mxu1 %v3904_v11  ;;  %5512 = vmatprep.subr.bf16.mxu0 %v8145_v34  ;;  %v5926_v11 = vld [vmem:[%s7949_s11 + $0xd0] sm:$0xff]  }
 0x5e2   : > { %5456 = vmatprep.subr.bf16.mxu1 %v3903_v61 }
 0x5e4   : > { %5513 = vmatpush3.bf16.msra.mxu0 %v5912_v38 }
 0x5e5   : > { %5457 = vmatpush3.bf16.msra.mxu1 %v3903_v61  ;;  %5514 = vmatprep.subr.bf16.mxu0 %v8145_v34 }
 0x5e6   : > { %5458 = vmatprep.subr.bf16.mxu1 %v3902_v6 }
 0x5e8   : > { %5515 = vmatpush3.bf16.msra.mxu0 %v5914_v4 }
 0x5e9   : > { %5459 = vmatpush3.bf16.msra.mxu1 %v3902_v6  ;;  %5540 = vmatprep.subr.bf16.mxu0 %v8145_v34 }
 0x5ea   : > { %5460 = vmatprep.subr.bf16.mxu1 %v8143_v32 }
 0x5ed   : > { %5461 = vmatpush3.bf16.msra.mxu1 %v8143_v32 }
 0x5ee   : > { %5462 = vmatprep.subr.bf16.mxu1 %v8144_v44 }
 0x5f1   : > { %5463 = vmatpush3.bf16.msra.mxu1 %v8144_v44 }
 0x5f2   : > { %5480 = vmatprep.subr.bf16.mxu1 %v8145_v34 }
 0x5f4   : > { %5465 = vmatmul.mubr.bf16.vlgmr.msra.gmra.mxu1 %v5892_v7 }
 0x5f5   : > { %5468 = vmatprep.mubr.bf16.mxu1 %v5893_v51  ;;  %5481 = vmatpush3.bf16.msra.mxu1 %v5899_v33 }
 0x5f6   : > { %5482 = vmatprep.subr.bf16.mxu1 %v8145_v34 }
 0x5f9   : > { %5483 = vmatpush3.bf16.msra.mxu1 %v5901_v20 }
 0x5fa   : > { %5484 = vmatprep.subr.bf16.mxu1 %v8145_v34 }
 0x5fc   : > { %5469 = vmatmul.mubr.bf16.gmra.mxu1 %v5894_v59 }
 0x5fd   : > { %5472 = vmatprep.mubr.bf16.mxu1 %v5895_v36  ;;  %5485 = vmatpush3.bf16.msra.mxu1 %v5903_v27 }
 0x5fe   : > { %5486 = vmatprep.subr.bf16.mxu1 %v8145_v34 }
 0x601   : > { %5487 = vmatpush3.bf16.msra.mxu1 %v5905_v14 }
 0x602   : > { %5488 = vmatprep.subr.bf16.mxu1 %v8145_v34 }
 0x604   : > { %5473 = vmatmul.mubr.bf16.gmra.mxu1 %v5896_v31 }
 0x605   : > { %5476 = vmatprep.mubr.bf16.mxu1 %v5897_v24  ;;  %5489 = vmatpush3.bf16.msra.mxu1 %v5907_v52 }
 0x606   : > { %5490 = vmatprep.subr.bf16.mxu1 %v8145_v34 }
 0x609   : > { %5491 = vmatpush3.bf16.msra.mxu1 %v5909_v45 }
 0x60a   : > { %5492 = vmatprep.subr.bf16.mxu1 %v8145_v34 }
 0x60c   : > { %5477 = vmatmul.mubr.bf16.gmra.mxu1 %v5898_v40 }
 0x60d   : > { %5493 = vmatpush3.bf16.msra.mxu1 %v5911_v55  ;;  %5496 = vmatprep.mubr.msk.bf16.mxu1 %vm5955_vm0, %v8145_v34 }
 0x60e   : > { %5494 = vmatprep.subr.bf16.mxu1 %v8145_v34 }
 0x611   : > { %5495 = vmatpush3.bf16.msra.mxu1 %v5913_v60 }
 0x612   : > { %5520 = vmatprep.subr.bf16.mxu1 %v8145_v34 }
 0x6b4   : > { %v5466_v0 = vpop.f32.mrf.mxu1 }
 0x6b6   : > { %v4006_v42 = vpop.f32.mrf.mxu1 }
 0x6b8   : > { %v5467_v23 = vpop.f32.mrf.mxu1 }
 0x6ba   : > { %v4009_v19 = vpop.f32.mrf.mxu1 }
 0x6bc   : > { %v7849_v29 = vpop.f32.mrf.mxu1 }
 0x6be   : > { %v7851_v17 = vpop.f32.mrf.mxu1 }
 0x6c0   : > { %v7853_v12 = vpop.f32.mrf.mxu1 }
 0x6c2   : > { %v7855_v22 = vpop.f32.mrf.mxu1 }
 0x6c4   : > { %v5474_v25 = vpop.f32.mrf.mxu1 }
 0x6c5   : > { %v4071_v16 = vmax.f32 %v5466_v0, %v5474_v25 }
 0x6c6   : > { %v4038_v39 = vpop.f32.mrf.mxu1 }
 0x6c7   : > { %v4069_v2 = vmax.f32 %v4006_v42, %v4038_v39 }
 0x6c8   : > { %v5475_v41 = vpop.f32.mrf.mxu1 }
 0x6c9   : > { %v4072_v9 = vmax.f32 %v5467_v23, %v5475_v41 }
 0x6ca   : > { %v4041_v35 = vpop.f32.mrf.mxu1 }
 0x6cb   : > { %v4078_v46 = vpack.c.bf16 %v4072_v9, %v4071_v16  ;;  %v4070_v18 = vmax.f32 %v4009_v19, %v4041_v35 }
 0x6cc   : > { %v5478_v1 = vpop.f32.mrf.mxu1 }
 0x6cd   : > { %v4077_v37 = vpack.c.bf16 %v4070_v18, %v4069_v2  ;;  %5497 = vmatmul.mubr.bf16.vlgmr.msra.gmra.mxu1 %v4078_v46  ;;  %v4075_v44 = vmax.f32 %v7849_v29, %v5478_v1 }
 0x6ce   : > { %5521 = vmatpush3.bf16.msra.mxu1 %v5915_v58  ;;  %5536 = vmatprep.mubr.msk.bf16.mxu1 %vm5955_vm0, %v8145_v34  ;;  %v4054_v56 = vpop.f32.mrf.mxu1 }
 0x6cf   : > { %5517 = vmatmul.mubr.bf16.vlgmr.msra.gmra.mxu0 %v4077_v37  ;;  %5522 = vmatprep.subr.bf16.mxu1 %v8145_v34  ;;  %v4073_v6 = vmax.f32 %v7851_v17, %v4054_v56 }
 0x6d0   : > { %5541 = vmatpush3.bf16.msra.mxu0 %v5916_v54  ;;  %5556 = vmatprep.mubr.msk.bf16.mxu0 %vm5955_vm0, %v8145_v34  ;;  %v5479_v63 = vpop.f32.mrf.mxu1 }
 0x6d1   : > { %5542 = vmatprep.subr.bf16.mxu0 %v8145_v34  ;;  %v4076_v32 = vmax.f32 %v7853_v12, %v5479_v63 }
 0x6d2   : > { %5523 = vmatpush3.bf16.msra.mxu1 %v5917_v48  ;;  %v4057_v8 = vpop.f32.mrf.mxu1 }
 0x6d3   : > { %5524 = vmatprep.subr.bf16.mxu1 %v8145_v34  ;;  %v4074_v61 = vmax.f32 %v7855_v22, %v4057_v8  ;;  %v4080_v51 = vpack.c.bf16 %v4076_v32, %v4075_v44 }
 0x6d4   : > { %5543 = vmatpush3.bf16.msra.mxu0 %v5918_v30 }
 0x6d5   : > { %5544 = vmatprep.subr.bf16.mxu0 %v8145_v34  ;;  %v4079_v7 = vpack.c.bf16 %v4074_v61, %v4073_v6 }
 0x6d6   : > { %5525 = vmatpush3.bf16.msra.mxu1 %v5919_v3 }
 0x6d7   : > { %5526 = vmatprep.subr.bf16.mxu1 %v8145_v34 }
 0x6d8   : > { %5545 = vmatpush3.bf16.msra.mxu0 %v5920_v13 }
 0x6d9   : > { %5546 = vmatprep.subr.bf16.mxu0 %v8145_v34 }
 0x6da   : > { %5527 = vmatpush3.bf16.msra.mxu1 %v5921_v21 }
 0x6db   : > { %5528 = vmatprep.subr.bf16.mxu1 %v8145_v34 }
 0x6dc   : > { %5547 = vmatpush3.bf16.msra.mxu0 %v5922_v10 }
 0x6dd   : > { %5548 = vmatprep.subr.bf16.mxu0 %v8145_v34 }
 0x6de   : > { %5529 = vmatpush3.bf16.msra.mxu1 %v5923_v47 }
 0x6df   : > { %5530 = vmatprep.subr.bf16.mxu1 %v8145_v34 }
 0x6e0   : > { %5549 = vmatpush3.bf16.msra.mxu0 %v5924_v5 }
 0x6e1   : > { %5550 = vmatprep.subr.bf16.mxu0 %v8145_v34 }
 0x6e2   : > { %5531 = vmatpush3.bf16.msra.mxu1 %v5925_v62 }
 0x6e3   : > { %5532 = vmatprep.subr.bf16.mxu1 %v8145_v34 }
 0x6e4   : > { %5551 = vmatpush3.bf16.msra.mxu0 %v5926_v11 }
 0x6e5   : > { %5552 = vmatprep.subr.bf16.mxu0 %v8145_v34 }
 0x6e6   : > { %5533 = vmatpush3.bf16.msra.mxu1 %v5927_v50 }
 0x6e7   : > { %5534 = vmatprep.subr.bf16.mxu1 %v8145_v34 }
 0x6e8   : > { %5553 = vmatpush3.bf16.msra.mxu0 %v5928_v28 }
 0x6e9   : > { %5554 = vmatprep.subr.bf16.mxu0 %v8145_v34 }
 0x6ea   : > { %5535 = vmatpush3.bf16.msra.mxu1 %v5929_v49 }
 0x6ec   : > { %5555 = vmatpush3.bf16.msra.mxu0 %v5930_v15 }
 0x6ed   : > { %5537 = vmatmul.mubr.bf16.vlgmr.msra.gmra.mxu1 %v4079_v7 }
 0x6ef   : > { %5557 = vmatmul.mubr.bf16.vlgmr.msra.gmra.mxu0 %v4080_v51 }
 0x78d   : > { %v4196_v33 = vpop.f32.mrf.mxu1 }
 0x78f   : > { %v5498_v20 = vpop.f32.mrf.mxu1  ;;  %v4285_v59 = vpop.f32.mrf.mxu0 }
 0x790   : > { %v4286_v34 = vadd.f32 %v4285_v59, %v4196_v33 }
 0x791   : > { %v4199_v36 = vpop.f32.mrf.mxu1  ;;  %v5518_v31 = vpop.f32.mrf.mxu0 }
 0x793   : > { %v5499_v24 = vpop.f32.mrf.mxu1  ;;  %v4288_v40 = vpop.f32.mrf.mxu0 }
 0x794   : > { %v4289_v45 = vadd.f32 %v4288_v40, %v4199_v36 }
 0x795   : > { %v5519_v27 = vpop.f32.mrf.mxu0 }
 0x7ad   : > { %v4391_v57 = vpop.f32.mrf.mxu1 }
 0x7ae   : > { %v4398_v14 = vadd.f32 %v4391_v57, %v4286_v34 }
 0x7af   : > { %v5538_v53 = vpop.f32.mrf.mxu1  ;;  %v4499_v52 = vpop.f32.mrf.mxu0 }
 0x7b0   : > { %v4506_v43 = vadd.f32 %v4499_v52, %v4398_v14 }
 0x7b1   : > { %v4394_v55 = vpop.f32.mrf.mxu1  ;;  %v5558_v38 = vpop.f32.mrf.mxu0 }
 0x7b2   : > { %v4515_v60 = vadd.f32 %v4961_v26, %v4506_v43  ;;  %v4399_v4 = vadd.f32 %v4394_v55, %v4289_v45 }
 0x7b3   : > { %v4502_v0 = vpop.f32.mrf.mxu0  ;;  %v5539_v42 = vpop.f32.mrf.mxu1 }
 0x7b4   : > { %4518 = vst.msk [vmem:[%s442_s28] sm:$0xff] %vm4517_vm1, %v4515_v60  ;;  %v4507_v23 = vadd.f32 %v4502_v0, %v4399_v4 }
 0x7b5   : > { %v5559_v19 = vpop.f32.mrf.mxu0 }
 0x7b6   : > { %v4516_v29 = vadd.f32 %v4961_v26, %v4507_v23 }
 0x7b8   : > { %4519 = vst.msk [vmem:[%s442_s28 + $0x8] sm:$0xff] %vm4517_vm1, %v4516_v29 }
 0x7b9 PF: > { %s23_s25 = sadd.s32 1, %s5951_s25  }
 0x7ba   : > { %p20_p5 = scmp.ge.s32.totalorder %s23_s25, 4  }
 0x7bc   :  { %22 = sbr.rel (!%p20_p5) target bundleno = 1 (0x1), region = 109 }

</bundles_post_ra>
